<compile_context>
chip_gen: v5e
topology: v5e:2x2
jax: 0.10.0
libtpu: 0.0.40
codegen_flags: <defaults>
</compile_context>

<pallas_src>
import functools

import jax
import jax.numpy as jnp
from jax.experimental import pallas as pl
from jax.experimental.pallas import tpu as pltpu

_HIGHEST = jax.lax.Precision.HIGHEST  # used only by the pure-JAX reference


def _dot(a, b):
    # DEFAULT matmul precision (review: HIGHEST forces multi-pass MXU
    # emulation); accumulate in f32 on the MXU.
    return jnp.dot(a, b, preferred_element_type=jnp.float32)


def _round_up(v, m):
    return -(-v // m) * m


# ----------------------------------------------------------------------------
# Fused forward kernel: whole encoder + GAPs + FC for a block of `bn` samples.
# ----------------------------------------------------------------------------
def _fused_forward_kernel(x_ref, w_ref, b_ref, p_ref, out_ref, *,
                          bn, s1, s2, s3, c_in, c1, c2, c3, ncls,
                          r1, r2, r3, r4, out_w):
    # ---- unpack the packed constant slabs (static slices, tiny) ------------
    w1 = w_ref[r1:r1 + c_in, 0:c1]
    w2 = w_ref[r2:r2 + c1, 0:c2]
    w3 = w_ref[r3:r3 + c2, 0:c3]
    wfc = w_ref[r4:r4 + c3, 0:ncls]
    b1 = b_ref[0:1, 0:c1]
    b2 = b_ref[1:2, 0:c2]
    b3 = b_ref[2:3, 0:c3]
    bfc = b_ref[3:4, 0:ncls]
    p1 = p_ref[0:s2, 0:s1]            # (s2, s1) 2x2-avg-pool matrix, stage 1
    p2 = p_ref[s2:s2 + s3, 0:s2]      # (s3, s2) 2x2-avg-pool matrix, stage 2

    # ---- stage 1: batch-folded 1x1 conv + ReLU (ONE MXU matmul) ------------
    x2d = x_ref[...].reshape(bn * s1, c_in)
    h1 = jnp.maximum(_dot(x2d, w1) + b1, 0.0)              # (bn*s1, c1)

    # 2x2 avg-pool as a batched matmul against the shared pool matrix.
    d1 = jnp.einsum("bos,bsc->boc",
                    jnp.broadcast_to(p1, (bn, s2, s1)),
                    h1.reshape(bn, s1, c1),
                    preferred_element_type=jnp.float32)    # (bn, s2, c1)
    # GAP(full stage-1 map) == mean of the 2x2-averaged map (exact).
    g1 = jnp.mean(d1, axis=1)                              # (bn, c1)

    # ---- stage 2 ------------------------------------------------------------
    h2 = jnp.maximum(_dot(d1.reshape(bn * s2, c1), w2) + b2, 0.0)   # (bn*s2, c2)
    d2 = jnp.einsum("bos,bsc->boc",
                    jnp.broadcast_to(p2, (bn, s3, s2)),
                    h2.reshape(bn, s2, c2),
                    preferred_element_type=jnp.float32)    # (bn, s3, c2)
    g2 = jnp.mean(d2, axis=1)                              # (bn, c2)

    # ---- stage 3 ------------------------------------------------------------
    h3 = jnp.maximum(_dot(d2.reshape(bn * s3, c2), w3) + b3, 0.0)   # (bn*s3, c3)
    g3 = jnp.mean(h3.reshape(bn, s3, c3), axis=1)          # (bn, c3)

    # ---- classifier head on the stacked stage-3 GAPs (one matmul) ----------
    logits = _dot(g3, wfc) + bfc                           # (bn, ncls)

    # ---- single lane-dense merged output store per grid step ---------------
    pieces = [logits, g1, g2, g3]
    used = ncls + c1 + c2 + c3
    if out_w > used:
        pieces.append(jnp.zeros((bn, out_w - used), jnp.float32))
    out_ref[...] = jnp.concatenate(pieces, axis=1)         # (bn, out_w)


# ----------------------------------------------------------------------------
# Host-side helpers
# ----------------------------------------------------------------------------
def _make_pool2x2_matrix(h, w):
    """(h*w/4, h*w) matrix P with P[o, s] = 0.25 iff input pixel s is in
    output window o (row-major spatial flattening)."""
    assert h % 2 == 0 and w % 2 == 0
    ow = w // 2
    s_in = jnp.arange(h * w)
    hi, wi = s_in // w, s_in % w
    s_out = (hi // 2) * ow + (wi // 2)
    out_idx = jnp.arange((h // 2) * (w // 2))
    return 0.25 * (out_idx[:, None] == s_out[None, :]).astype(jnp.float32)


def fused_forward(params, x_nchw, *, block_batch=16):
    """Whole encoder forward in one Pallas kernel.

    Returns (logits, [gap1, gap2, gap3]) with gap_i == GAP(feature_i), (N, C_i).
    """
    n, c_in, h, w = x_nchw.shape
    assert h % 4 == 0 and w % 4 == 0
    s1, s2, s3 = h * w, (h * w) // 4, (h * w) // 16
    assert s2 % 8 == 0 and s3 % 8 == 0, "spatial extent too small for this tiling"

    (w1, b1), (w2, b2), (w3, b3) = params["stages"]
    wfc, bfc = params["fc"]
    c1, c2, c3 = w1.shape[1], w2.shape[1], w3.shape[1]
    ncls = wfc.shape[1]

    # NCHW -> channels-last, exactly once, then flatten spatial.
    x_cl = jnp.transpose(x_nchw, (0, 2, 3, 1)).reshape(n, s1, c_in)

    # Block size: multiple of 8 (sublane-aligned output blocks), capped near
    # N/2 so the grid keeps >= 2 steps when the batch allows it (v7x: 2 TCs).
    # The batch is zero-padded to a block multiple (no bn=1 fallback).
    bb = max(8, _round_up(block_batch, 8))
    bn = min(bb, max(8, _round_up(-(-n // 2), 8)))
    n_pad = _round_up(n, bn)
    if n_pad != n:
        x_cl = jnp.pad(x_cl, ((0, n_pad - n), (0, 0), (0, 0)))
    grid = (n_pad // bn,)

    # ---- pack the 10 small constants into 3 slabs (fewer input streams) ----
    lanes = _round_up(max(c1, c2, c3, ncls), 128)
    r1 = 0
    r2 = r1 + _round_up(c_in, 8)
    r3 = r2 + _round_up(c1, 8)
    r4 = r3 + _round_up(c2, 8)
    w_rows = r4 + _round_up(c3, 8)
    wslab = jnp.zeros((w_rows, lanes), jnp.float32)
    wslab = wslab.at[r1:r1 + c_in, :c1].set(w1)
    wslab = wslab.at[r2:r2 + c1, :c2].set(w2)
    wslab = wslab.at[r3:r3 + c2, :c3].set(w3)
    wslab = wslab.at[r4:r4 + c3, :ncls].set(wfc)

    bslab = jnp.zeros((8, lanes), jnp.float32)
    bslab = bslab.at[0, :c1].set(b1)
    bslab = bslab.at[1, :c2].set(b2)
    bslab = bslab.at[2, :c3].set(b3)
    bslab = bslab.at[3, :ncls].set(bfc)

    pslab = jnp.zeros((s2 + s3, s1), jnp.float32)
    pslab = pslab.at[:s2, :].set(_make_pool2x2_matrix(h, w))
    pslab = pslab.at[s2:, :s2].set(_make_pool2x2_matrix(h // 2, w // 2))

    out_w = _round_up(ncls + c1 + c2 + c3, 128)

    kernel = functools.partial(
        _fused_forward_kernel, bn=bn, s1=s1, s2=s2, s3=s3, c_in=c_in,
        c1=c1, c2=c2, c3=c3, ncls=ncls, r1=r1, r2=r2, r3=r3, r4=r4, out_w=out_w)

    merged = pl.pallas_call(
        kernel,
        out_shape=jax.ShapeDtypeStruct((n_pad, out_w), jnp.float32),
        grid=grid,
        in_specs=[
            pl.BlockSpec((bn, s1, c_in), lambda i: (i, 0, 0)),
            pl.BlockSpec(wslab.shape, lambda i: (0, 0)),
            pl.BlockSpec(bslab.shape, lambda i: (0, 0)),
            pl.BlockSpec(pslab.shape, lambda i: (0, 0)),
        ],
        out_specs=pl.BlockSpec((bn, out_w), lambda i: (i, 0)),
        compiler_params=pltpu.CompilerParams(
            dimension_semantics=("parallel",)),
    )(x_cl, wslab, bslab, pslab)

    o0, o1, o2 = ncls, ncls + c1, ncls + c1 + c2
    logits = merged[:n, 0:o0]
    g1 = merged[:n, o0:o1]
    g2 = merged[:n, o1:o2]
    g3 = merged[:n, o2:o2 + c3]
    return logits, [g1, g2, g3]


# ----------------------------------------------------------------------------
# FeatureConcatNetwork forward (mirrors the PyTorch module, n_spatial_dims=2)
# ----------------------------------------------------------------------------
def feature_concat_forward(params, x_nchw, layers, return_feature=False):
    logits, pooled = fused_forward(params, x_nchw)
    if not return_feature:
        return logits
    # avg_pool(f).flatten(1) == pooled[i]; select features (encoder order)
    # whose 1-based index is in `layers`, concat on dim 1.
    selected = [g for i, g in enumerate(pooled) if i + 1 in layers]
    concatenated_features = jnp.concatenate(selected, axis=1)
    return logits, concatenated_features


# ----------------------------------------------------------------------------
# Synthetic encoder params + pure-JAX reference (for correctness check)
# ----------------------------------------------------------------------------
def init_encoder_params(key, in_ch=4, widths=(16, 32, 64), num_classes=10):
    params = {"stages": [], "fc": None}
    c_prev = in_ch
    keys = jax.random.split(key, 2 * len(widths) + 2)
    for i, c_out in enumerate(widths):
        wmat = 0.1 * jax.random.normal(keys[2 * i], (c_prev, c_out), jnp.float32)
        bvec = 0.1 * jax.random.normal(keys[2 * i + 1], (c_out,), jnp.float32)
        params["stages"].append((wmat, bvec))
        c_prev = c_out
    w_fc = 0.1 * jax.random.normal(keys[-2], (c_prev, num_classes), jnp.float32)
    b_fc = 0.1 * jax.random.normal(keys[-1], (num_classes,), jnp.float32)
    params["fc"] = (w_fc, b_fc)
    return params


def _reference_forward(params, x_nchw, layers):
    feats = []
    hcur = x_nchw
    for i, (wmat, bvec) in enumerate(params["stages"]):
        hcur = jnp.einsum("nchw,cd->ndhw", hcur, wmat, precision=_HIGHEST)
        hcur = jnp.maximum(hcur + bvec[None, :, None, None], 0.0)
        feats.append(hcur)
        if i != len(params["stages"]) - 1:
            n, c, hh, ww = hcur.shape
            hcur = hcur.reshape(n, c, hh // 2, 2, ww // 2, 2).mean(axis=(3, 5))
    wfc, bfc = params["fc"]
    gap3 = feats[-1].mean(axis=(2, 3))
    logits = jnp.dot(gap3, wfc, precision=_HIGHEST) + bfc
    concat = jnp.concatenate(
        [f.mean(axis=(2, 3)) for i, f in enumerate(feats) if i + 1 in layers],
        axis=1)
    return logits, concat


if __name__ == "__main__":
    key = jax.random.PRNGKey(0)
    k_param, k_x1, k_x2 = jax.random.split(key, 3)

    params = init_encoder_params(k_param, in_ch=4,
                                 widths=(16, 32, 64), num_classes=10)
    layers = [1, 2, 3]

    # --- primary test: batch=2 (pads to one sublane-aligned block) ----------
    x = jax.random.normal(k_x1, (2, 4, 16, 16), jnp.float32)  # NCHW
    logits, feats = feature_concat_forward(params, x, layers,
                                           return_feature=True)
    logits_only = feature_concat_forward(params, x, layers,
                                         return_feature=False)
    jax.block_until_ready((logits, feats, logits_only))

    assert logits.shape == (2, 10), logits.shape
    assert feats.shape == (2, 16 + 32 + 64), feats.shape
    assert logits_only.shape == (2, 10), logits_only.shape

    ref_logits, ref_feats = _reference_forward(params, x, layers)
    assert jnp.allclose(logits, ref_logits, rtol=5e-2, atol=5e-3), \
        float(jnp.max(jnp.abs(logits - ref_logits)))
    assert jnp.allclose(feats, ref_feats, rtol=5e-2, atol=5e-3), \
        float(jnp.max(jnp.abs(feats - ref_feats)))

    # --- secondary test: odd batch -> padding + multi-step grid, layer subset
    x2 = jax.random.normal(k_x2, (10, 4, 16, 16), jnp.float32)
    logits2, feats2 = feature_concat_forward(params, x2, [2, 3],
                                             return_feature=True)
    jax.block_until_ready((logits2, feats2))
    assert logits2.shape == (10, 10), logits2.shape
    assert feats2.shape == (10, 32 + 64), feats2.shape

    ref_logits2, ref_feats2 = _reference_forward(params, x2, [2, 3])
    assert jnp.allclose(logits2, ref_logits2, rtol=5e-2, atol=5e-3), \
        float(jnp.max(jnp.abs(logits2 - ref_logits2)))
    assert jnp.allclose(feats2, ref_feats2, rtol=5e-2, atol=5e-3), \
        float(jnp.max(jnp.abs(feats2 - ref_feats2)))

    print("KERNEL_OK")
</pallas_src>

<mosaic_0001>
module attributes {stable_mosaic.version = 11 : i64} {
  func.func @_fused_forward_kernel(%arg0: i32, %arg1: memref<8x256x4xf32, #tpu.memory_space<vmem>>, %arg2: memref<120x128xf32, #tpu.memory_space<vmem>>, %arg3: memref<8x128xf32, #tpu.memory_space<vmem>>, %arg4: memref<80x256xf32, #tpu.memory_space<vmem>>, %arg5: memref<8x128xf32, #tpu.memory_space<vmem>>) attributes {dimension_semantics = [#tpu.dimension_semantics<parallel>], iteration_bounds = array<i64: 1>, scalar_prefetch = 0 : i64, scratch_operands = 0 : i64, tpu.core_type = #tpu.core_type<tc>, window_params = [{transform_indices = @transform_0, window_bounds = array<i64: 8, 256, 4>}, {pipeline_mode = #tpu.pipeline_mode<synchronous>, transform_indices = @transform_1, window_bounds = array<i64: 120, 128>}, {pipeline_mode = #tpu.pipeline_mode<synchronous>, transform_indices = @transform_2, window_bounds = array<i64: 8, 128>}, {pipeline_mode = #tpu.pipeline_mode<synchronous>, transform_indices = @transform_3, window_bounds = array<i64: 80, 256>}, {transform_indices = @transform_4, window_bounds = array<i64: 8, 128>}]} {
    %c0 = arith.constant 0 : index
    %c0_0 = arith.constant 0 : index
    %0 = vector.load %arg2[%c0, %c0_0] : memref<120x128xf32, #tpu.memory_space<vmem>>, vector<4x16xf32>
    %c8 = arith.constant 8 : index
    %c0_1 = arith.constant 0 : index
    %1 = vector.load %arg2[%c8, %c0_1] : memref<120x128xf32, #tpu.memory_space<vmem>>, vector<16x32xf32>
    %c24 = arith.constant 24 : index
    %c0_2 = arith.constant 0 : index
    %2 = vector.load %arg2[%c24, %c0_2] : memref<120x128xf32, #tpu.memory_space<vmem>>, vector<32x64xf32>
    %c56 = arith.constant 56 : index
    %c0_3 = arith.constant 0 : index
    %3 = vector.load %arg2[%c56, %c0_3] : memref<120x128xf32, #tpu.memory_space<vmem>>, vector<64x10xf32>
    %c0_4 = arith.constant 0 : index
    %c0_5 = arith.constant 0 : index
    %4 = vector.load %arg3[%c0_4, %c0_5] : memref<8x128xf32, #tpu.memory_space<vmem>>, vector<1x16xf32>
    %c1 = arith.constant 1 : index
    %c0_6 = arith.constant 0 : index
    %5 = vector.load %arg3[%c1, %c0_6] : memref<8x128xf32, #tpu.memory_space<vmem>>, vector<1x32xf32>
    %c2 = arith.constant 2 : index
    %c0_7 = arith.constant 0 : index
    %6 = vector.load %arg3[%c2, %c0_7] : memref<8x128xf32, #tpu.memory_space<vmem>>, vector<1x64xf32>
    %c3 = arith.constant 3 : index
    %c0_8 = arith.constant 0 : index
    %7 = vector.load %arg3[%c3, %c0_8] : memref<8x128xf32, #tpu.memory_space<vmem>>, vector<1x10xf32>
    %c0_9 = arith.constant 0 : index
    %c0_10 = arith.constant 0 : index
    %8 = vector.load %arg4[%c0_9, %c0_10] : memref<80x256xf32, #tpu.memory_space<vmem>>, vector<64x256xf32>
    %c64 = arith.constant 64 : index
    %c0_11 = arith.constant 0 : index
    %9 = vector.load %arg4[%c64, %c0_11] : memref<80x256xf32, #tpu.memory_space<vmem>>, vector<16x64xf32>
    %c0_12 = arith.constant 0 : index
    %c0_13 = arith.constant 0 : index
    %c0_14 = arith.constant 0 : index
    %10 = vector.load %arg1[%c0_12, %c0_13, %c0_14] : memref<8x256x4xf32, #tpu.memory_space<vmem>>, vector<8x256x4xf32>
    %11 = vector.shape_cast %10 : vector<8x256x4xf32> to vector<2048x4xf32>
    %cst = arith.constant dense<0.000000e+00> : vector<2048x16xf32>
    %12 = tpu.matmul %11, %0, %cst {dimension_numbers = #tpu.dot_dimension_numbers<[1], [0], [0], [1], [0, 0, 1, 1], [], []>} : vector<2048x4xf32>, vector<4x16xf32>, vector<2048x16xf32> -> vector<2048x16xf32>
    %13 = vector.broadcast %4 : vector<1x16xf32> to vector<2048x16xf32>
    %14 = arith.addf %12, %13 : vector<2048x16xf32>
    %cst_15 = arith.constant 0.000000e+00 : f32
    %15 = vector.broadcast %cst_15 : f32 to vector<2048x16xf32>
    %16 = arith.maximumf %14, %15 : vector<2048x16xf32>
    %17 = vector.shape_cast %8 : vector<64x256xf32> to vector<1x64x256xf32>
    %18 = vector.broadcast %17 : vector<1x64x256xf32> to vector<8x64x256xf32>
    %19 = vector.shape_cast %16 : vector<2048x16xf32> to vector<8x256x16xf32>
    "tpu.trace_start"() <{level = 10 : i32, message = "bos,bsc->boc"}> : () -> ()
    %cst_16 = arith.constant dense<0.000000e+00> : vector<8x64x16xf32>
    %20 = tpu.matmul %18, %19, %cst_16 {dimension_numbers = #tpu.dot_dimension_numbers<[2], [1], [1], [2], [0, 0, 0, 1, 1, 2], [0], [0]>} : vector<8x64x256xf32>, vector<8x256x16xf32>, vector<8x64x16xf32> -> vector<8x64x16xf32>
    "tpu.trace_stop"() : () -> ()
    %cst_17 = arith.constant dense<0.000000e+00> : vector<8x16xf32>
    %21 = vector.multi_reduction <add>, %20, %cst_17 [1] : vector<8x64x16xf32> to vector<8x16xf32>
    %cst_18 = arith.constant 6.400000e+01 : f32
    %22 = vector.broadcast %cst_18 : f32 to vector<8x16xf32>
    %23 = arith.divf %21, %22 : vector<8x16xf32>
    %24 = vector.shape_cast %20 : vector<8x64x16xf32> to vector<512x16xf32>
    %cst_19 = arith.constant dense<0.000000e+00> : vector<512x32xf32>
    %25 = tpu.matmul %24, %1, %cst_19 {dimension_numbers = #tpu.dot_dimension_numbers<[1], [0], [0], [1], [0, 0, 1, 1], [], []>} : vector<512x16xf32>, vector<16x32xf32>, vector<512x32xf32> -> vector<512x32xf32>
    %26 = vector.broadcast %5 : vector<1x32xf32> to vector<512x32xf32>
    %27 = arith.addf %25, %26 : vector<512x32xf32>
    %cst_20 = arith.constant 0.000000e+00 : f32
    %28 = vector.broadcast %cst_20 : f32 to vector<512x32xf32>
    %29 = arith.maximumf %27, %28 : vector<512x32xf32>
    %30 = vector.shape_cast %9 : vector<16x64xf32> to vector<1x16x64xf32>
    %31 = vector.broadcast %30 : vector<1x16x64xf32> to vector<8x16x64xf32>
    %32 = vector.shape_cast %29 : vector<512x32xf32> to vector<8x64x32xf32>
    "tpu.trace_start"() <{level = 10 : i32, message = "bos,bsc->boc"}> : () -> ()
    %cst_21 = arith.constant dense<0.000000e+00> : vector<8x16x32xf32>
    %33 = tpu.matmul %31, %32, %cst_21 {dimension_numbers = #tpu.dot_dimension_numbers<[2], [1], [1], [2], [0, 0, 0, 1, 1, 2], [0], [0]>} : vector<8x16x64xf32>, vector<8x64x32xf32>, vector<8x16x32xf32> -> vector<8x16x32xf32>
    "tpu.trace_stop"() : () -> ()
    %cst_22 = arith.constant dense<0.000000e+00> : vector<8x32xf32>
    %34 = vector.multi_reduction <add>, %33, %cst_22 [1] : vector<8x16x32xf32> to vector<8x32xf32>
    %cst_23 = arith.constant 1.600000e+01 : f32
    %35 = vector.broadcast %cst_23 : f32 to vector<8x32xf32>
    %36 = arith.divf %34, %35 : vector<8x32xf32>
    %37 = vector.shape_cast %33 : vector<8x16x32xf32> to vector<128x32xf32>
    %cst_24 = arith.constant dense<0.000000e+00> : vector<128x64xf32>
    %38 = tpu.matmul %37, %2, %cst_24 {dimension_numbers = #tpu.dot_dimension_numbers<[1], [0], [0], [1], [0, 0, 1, 1], [], []>} : vector<128x32xf32>, vector<32x64xf32>, vector<128x64xf32> -> vector<128x64xf32>
    %39 = vector.broadcast %6 : vector<1x64xf32> to vector<128x64xf32>
    %40 = arith.addf %38, %39 : vector<128x64xf32>
    %cst_25 = arith.constant 0.000000e+00 : f32
    %41 = vector.broadcast %cst_25 : f32 to vector<128x64xf32>
    %42 = arith.maximumf %40, %41 : vector<128x64xf32>
    %43 = vector.shape_cast %42 : vector<128x64xf32> to vector<8x16x64xf32>
    %cst_26 = arith.constant dense<0.000000e+00> : vector<8x64xf32>
    %44 = vector.multi_reduction <add>, %43, %cst_26 [1] : vector<8x16x64xf32> to vector<8x64xf32>
    %cst_27 = arith.constant 1.600000e+01 : f32
    %45 = vector.broadcast %cst_27 : f32 to vector<8x64xf32>
    %46 = arith.divf %44, %45 : vector<8x64xf32>
    %cst_28 = arith.constant dense<0.000000e+00> : vector<8x10xf32>
    %47 = tpu.matmul %46, %3, %cst_28 {dimension_numbers = #tpu.dot_dimension_numbers<[1], [0], [0], [1], [0, 0, 1, 1], [], []>} : vector<8x64xf32>, vector<64x10xf32>, vector<8x10xf32> -> vector<8x10xf32>
    %48 = vector.broadcast %7 : vector<1x10xf32> to vector<8x10xf32>
    %49 = arith.addf %47, %48 : vector<8x10xf32>
    %cst_29 = arith.constant 0.000000e+00 : f32
    %50 = vector.broadcast %cst_29 : f32 to vector<8x6xf32>
    %51 = tpu.concatenate %49, %23, %36, %46, %50 in 1 : vector<8x10xf32>, vector<8x16xf32>, vector<8x32xf32>, vector<8x64xf32>, vector<8x6xf32> -> vector<8x128xf32>
    %c0_30 = arith.constant 0 : index
    %c0_31 = arith.constant 0 : index
    %52 = vector.load %arg5[%c0_30, %c0_31] : memref<8x128xf32, #tpu.memory_space<vmem>>, vector<8x128xf32>
    tpu.vector_store %arg5[%c0_30, %c0_31], %51 {strides = array<i32>} : memref<8x128xf32, #tpu.memory_space<vmem>>, vector<8x128xf32>,
    return
  }
  func.func @transform_0(%arg0: i32) -> (i32, i32, i32) {
    %c0_i32 = arith.constant 0 : i32
    %c0_i32_0 = arith.constant 0 : i32
    %c0_i32_1 = arith.constant 0 : i32
    return %arg0, %c0_i32, %c0_i32_0 : i32, i32, i32
  }
  func.func @transform_1(%arg0: i32) -> (i32, i32) {
    %c0_i32 = arith.constant 0 : i32
    %c0_i32_0 = arith.constant 0 : i32
    %c0_i32_1 = arith.constant 0 : i32
    return %c0_i32, %c0_i32_0 : i32, i32
  }
  func.func @transform_2(%arg0: i32) -> (i32, i32) {
    %c0_i32 = arith.constant 0 : i32
    %c0_i32_0 = arith.constant 0 : i32
    %c0_i32_1 = arith.constant 0 : i32
    return %c0_i32, %c0_i32_0 : i32, i32
  }
  func.func @transform_3(%arg0: i32) -> (i32, i32) {
    %c0_i32 = arith.constant 0 : i32
    %c0_i32_0 = arith.constant 0 : i32
    %c0_i32_1 = arith.constant 0 : i32
    return %c0_i32, %c0_i32_0 : i32, i32
  }
  func.func @transform_4(%arg0: i32) -> (i32, i32) {
    %c0_i32 = arith.constant 0 : i32
    %c0_i32_0 = arith.constant 0 : i32
    return %arg0, %c0_i32 : i32, i32
  }
}

</mosaic_0001>

<bundles_post_ra>
// kernel: tpu_custom_call.1
= control target key start
LH: loop header
LB: loop body
LE: loop exit
PB: predicated region body
PF: predicated region fallthrough
CT: control target
= control target key end

     0   :  { %vm1081_vm0 = vcmask 1043456   ;;  %vm312_vm1 = vcmask 31744   ;;  %s7692_s0 = inlined_call_operand.vmem [shape: f32[8,256,4], index: 0, kind: input, shape index: {}]   ;;  %s7693_s1 = inlined_call_operand.vmem [shape: f32[120,128], index: 1, kind: input, shape index: {}]   ;;  %s7694_s2 = inlined_call_operand.vmem [shape: f32[8,128], index: 2, kind: input, shape index: {}]   ;;  %s7695_s3 = inlined_call_operand.vmem [shape: f32[80,256], index: 3, kind: input, shape index: {}]   ;;  %s7696_s4 = inlined_call_operand.hbm [shape: f32[8,128], index: 4, kind: output, shape index: {}]  }
   0x1   :  { %v18_v0 = vld [vmem:[%s7693_s1] sm:$0xf] }
   0x2   :  { %v55_v1 = vld [vmem:[%s7692_s0] sm:$0xff]  ;;  %4030 = vmatpush.msk.msra.mxu0 %vm1081_vm0, %v18_v0  ;;  %4384 = vmatpush.msk.msra.mxu1 %vm1081_vm0, %v18_v0 }
   0x3   :  { %4031 = vmatmul.msk.f32.vlgmr.msra.gmra.mxu0 %vm312_vm1, %v55_v1  ;;  %4386 = vmatpush.msk.msra.mxu3 %vm1081_vm0, %v18_v0 }
   0x4   :  { %4385 = vmatpush.msk.msra.mxu2 %vm1081_vm0, %v18_v0 }
   0x5   :  { %9 = vsyncpa [#allocation3], 0  ;;  %v56_v2 = vld [vmem:[%s7692_s0 + $0x8] sm:$0xff]  ;;  %v57_v3 = vld [vmem:[%s7692_s0 + $0x10] sm:$0xff]  ;;  %vm2782_vm2 = vcmask 130048   ;;  %vm3930_vm4 = vcmask 1041409  }
   0x6   :  { %v58_v4 = vld [vmem:[%s7692_s0 + $0x18] sm:$0xff]  ;;  %v59_v5 = vld [vmem:[%s7692_s0 + $0x20] sm:$0xff]  ;;  %v60_v6 = vld [vmem:[%s7692_s0 + $0x28] sm:$0xff]  ;;  %vm3932_vm5 = vcmask 1042434   ;;  %vm3934_vm6 = vcmask 1043459   ;;  %vm3936_vm7 = vcmask 1044484  }
   0x7   :  { %v61_v7 = vld [vmem:[%s7692_s0 + $0x30] sm:$0xff]  ;;  %v62_v8 = vld [vmem:[%s7692_s0 + $0x38] sm:$0xff]  ;;  %v63_v9 = vld [vmem:[%s7692_s0 + $0x40] sm:$0xff]  ;;  %vm3938_vm8 = vcmask 1045509   ;;  %vm3940_vm9 = vcmask 1046534   ;;  %vm3942_vm10 = vcmask 1047559  }
   0x8   :  { %v64_v10 = vld [vmem:[%s7692_s0 + $0x48] sm:$0xff]  ;;  %v65_v11 = vld [vmem:[%s7692_s0 + $0x50] sm:$0xff]  ;;  %v66_v12 = vld [vmem:[%s7692_s0 + $0x58] sm:$0xff]  ;;  %s4447_s5 = smov 10   ;;  %vm3432_vm11 = vcmask 523264   ;;  %vm3623_vm12 = vcmask 261120  }
   0x9   :  { %v67_v13 = vld [vmem:[%s7692_s0 + $0x60] sm:$0xff]  ;;  %v68_v14 = vld [vmem:[%s7692_s0 + $0x68] sm:$0xff]  ;;  %v69_v15 = vld [vmem:[%s7692_s0 + $0x70] sm:$0xff]  ;;  %vm4005_vm14 = vcmask 80896   ;;  %vm4007_vm15 = vcmask 211968   ;;  %vm4009_vm0 = vcmask 474112  }
   0xa   :  { %v70_v16 = vld [vmem:[%s7692_s0 + $0x78] sm:$0xff]  ;;  %v71_v18 = vld [vmem:[%s7692_s0 + $0x80] sm:$0xff]  ;;  %v72_v20 = vld [vmem:[%s7692_s0 + $0x88] sm:$0xff]  ;;  %s4451_s12 = smov [#allocation2]   ;;  %s4021_s16 = sshll.u32 %s7696_s4, 4  ;;  %s4022_s16 = int_to_ptr.hbm [resolvable:$true] %s4021_s16 }
   0xb   :  { %4032 = vmatmul.msk.f32.gmra.mxu0 %vm312_vm1, %v56_v2  ;;  %v73_v22 = vld [vmem:[%s7692_s0 + $0x90] sm:$0xff]  ;;  %v74_v24 = vld [vmem:[%s7692_s0 + $0x98] sm:$0xff]  ;;  %v75_v26 = vld [vmem:[%s7692_s0 + $0xa0] sm:$0xff]  ;;  %s4019_s13 = sshll.u32 %s4451_s12, 4  ;;  %s4020_s13 = int_to_ptr.vmem [resolvable:$true] %s4019_s13 }
   0xc   :  { %v76_v28 = vld [vmem:[%s7692_s0 + $0xa8] sm:$0xff]  ;;  %v77_v30 = vld [vmem:[%s7692_s0 + $0xb0] sm:$0xff]  ;;  %v78_v32 = vld [vmem:[%s7692_s0 + $0xb8] sm:$0xff] }
   0xd   :  { %v79_v34 = vld [vmem:[%s7692_s0 + $0xc0] sm:$0xff]  ;;  %v80_v36 = vld [vmem:[%s7692_s0 + $0xc8] sm:$0xff]  ;;  %v81_v38 = vld [vmem:[%s7692_s0 + $0xd0] sm:$0xff] }
   0xe   :  { %v82_v40 = vld [vmem:[%s7692_s0 + $0xd8] sm:$0xff]  ;;  %v83_v42 = vld [vmem:[%s7692_s0 + $0xe0] sm:$0xff]  ;;  %v84_v44 = vld [vmem:[%s7692_s0 + $0xe8] sm:$0xff] }
   0xf   :  { %v85_v46 = vld [vmem:[%s7692_s0 + $0xf0] sm:$0xff]  ;;  %v4619_v47 = vld [vmem:[%s7694_s2] ss:$0 sm:$0xff]  ;;  %v86_v49 = vld [vmem:[%s7692_s0 + $0xf8] sm:$0xff] }
  0x10   :  { %v87_v59 = vld [vmem:[%s7692_s0 + $0x100] sm:$0xff] }
  0x13   :  { %4033 = vmatmul.msk.f32.gmra.mxu0 %vm312_vm1, %v57_v3 }
  0x1b   :  { %4034 = vmatmul.msk.f32.gmra.mxu0 %vm312_vm1, %v58_v4 }
  0x23   :  { %4035 = vmatmul.msk.f32.gmra.mxu0 %vm312_vm1, %v59_v5  ;;  %v88_v5 = vld [vmem:[%s7692_s0 + $0x108] sm:$0xff] }
  0x2b   :  { %4036 = vmatmul.msk.f32.gmra.mxu0 %vm312_vm1, %v60_v6 }
  0x33   :  { %4037 = vmatmul.msk.f32.gmra.mxu0 %vm312_vm1, %v61_v7 }
  0x3b   :  { %4038 = vmatmul.msk.f32.gmra.mxu0 %vm312_vm1, %v62_v8 }
  0x43   :  { %4039 = vmatmul.msk.f32.gmra.mxu0 %vm312_vm1, %v63_v9 }
  0x4b   :  { %4040 = vmatmul.msk.f32.gmra.mxu0 %vm312_vm1, %v64_v10 }
  0x53   :  { %4041 = vmatmul.msk.f32.gmra.mxu0 %vm312_vm1, %v65_v11 }
  0x5b   :  { %4042 = vmatmul.msk.f32.gmra.mxu0 %vm312_vm1, %v66_v12 }
  0x63   :  { %4043 = vmatmul.msk.f32.gmra.mxu0 %vm312_vm1, %v67_v13 }
  0x6b   :  { %4044 = vmatmul.msk.f32.gmra.mxu0 %vm312_vm1, %v68_v14 }
  0x73   :  { %4045 = vmatmul.msk.f32.gmra.mxu0 %vm312_vm1, %v69_v15  ;;  %v89_v15 = vld [vmem:[%s7692_s0 + $0x110] sm:$0xff] }
  0x7b   :  { %4046 = vmatmul.msk.f32.gmra.mxu0 %vm312_vm1, %v70_v16 }
  0x80   :  { %v4544_v17 = vpop.f32.mrf.mxu0 }
  0x83   :  { %4047 = vmatmul.msk.f32.gmra.mxu0 %vm312_vm1, %v71_v18 }
  0x88   :  { %v4550_v19 = vpop.f32.mrf.mxu0 }
  0x8b   :  { %4048 = vmatmul.msk.f32.gmra.mxu0 %vm312_vm1, %v72_v20  ;;  %v1106_v20 = vadd.f32 %v4619_v47, %v4550_v19 }
  0x90   :  { %v4556_v21 = vpop.f32.mrf.mxu0 }
  0x91   :  { %v1109_v16 = vadd.f32 %v4619_v47, %v4556_v21  ;;  %v90_v21 = vld [vmem:[%s7692_s0 + $0x118] sm:$0xff] }
  0x93   :  { %4049 = vmatmul.msk.f32.gmra.mxu0 %vm312_vm1, %v73_v22 }
  0x98   :  { %v4562_v23 = vpop.f32.mrf.mxu0 }
  0x99   :  { %v1112_v12 = vadd.f32 %v4619_v47, %v4562_v23  ;;  %v1103_v23 = vadd.f32 %v4619_v47, %v4544_v17  ;;  %v91_v17 = vld [vmem:[%s7692_s0 + $0x120] sm:$0xff] }
  0x9b   :  { %4050 = vmatmul.msk.f32.gmra.mxu0 %vm312_vm1, %v74_v24  ;;  %v1873_v22 = vmax.f32 %v1112_v12, 0.0  ;;  %v1872_v24 = vmax.f32 %v1109_v16, 0.0 }
  0xa0   :  { %v4568_v25 = vpop.f32.mrf.mxu0 }
  0xa1   :  { %v1115_v10 = vadd.f32 %v4619_v47, %v4568_v25  ;;  %v1871_v25 = vmax.f32 %v1106_v20, 0.0 }
  0xa3   :  { %4051 = vmatmul.msk.f32.gmra.mxu0 %vm312_vm1, %v75_v26  ;;  %v1874_v18 = vmax.f32 %v1115_v10, 0.0 }
  0xa8   :  { %v4574_v27 = vpop.f32.mrf.mxu0 }
  0xa9   :  { %v1118_v8 = vadd.f32 %v4619_v47, %v4574_v27  ;;  %v1870_v27 = vmax.f32 %v1103_v23, 0.0  ;;  %v104_v23 = vld [vmem:[%s7692_s0 + $0x188] sm:$0xff] }
  0xab   :  { %4052 = vmatmul.msk.f32.gmra.mxu0 %vm312_vm1, %v76_v28  ;;  %v1875_v13 = vmax.f32 %v1118_v8, 0.0  ;;  %v103_v8 = vld [vmem:[%s7692_s0 + $0x180] sm:$0xff] }
  0xb0   :  { %v1120_v29 = vpop.f32.mrf.mxu0 }
  0xb1   :  { %v1121_v6 = vadd.f32 %v4619_v47, %v1120_v29  ;;  %v92_v29 = vld [vmem:[%s7692_s0 + $0x128] sm:$0xff] }
  0xb3   :  { %4053 = vmatmul.msk.f32.gmra.mxu0 %vm312_vm1, %v77_v30  ;;  %v1876_v11 = vmax.f32 %v1121_v6, 0.0 }
  0xb8   :  { %v1123_v31 = vpop.f32.mrf.mxu0 }
  0xb9   :  { %v1124_v2 = vadd.f32 %v4619_v47, %v1123_v31  ;;  %v93_v31 = vld [vmem:[%s7692_s0 + $0x130] sm:$0xff] }
  0xbb   :  { %4054 = vmatmul.msk.f32.gmra.mxu0 %vm312_vm1, %v78_v32  ;;  %v1877_v9 = vmax.f32 %v1124_v2, 0.0  ;;  %v242_v32 = vld [vmem:[%s7692_s0 + $0x5d8] sm:$0xff] }
  0xbc   :  { %4218 = vmatmul.msk.f32.vlgmr.msra.gmra.mxu3 %vm312_vm1, %v242_v32 }
  0xc0   :  { %v1126_v33 = vpop.f32.mrf.mxu0 }
  0xc1   :  { %v1127_v0 = vadd.f32 %v4619_v47, %v1126_v33 }
  0xc3   :  { %4055 = vmatmul.msk.f32.gmra.mxu0 %vm312_vm1, %v79_v34  ;;  %v1878_v7 = vmax.f32 %v1127_v0, 0.0  ;;  %v94_v34 = vld [vmem:[%s7692_s0 + $0x138] sm:$0xff] }
  0xc8   :  { %v1129_v35 = vpop.f32.mrf.mxu0 }
  0xc9   :  { %v1130_v62 = vadd.f32 %v4619_v47, %v1129_v35  ;;  %v243_v35 = vld [vmem:[%s7692_s0 + $0x5e0] sm:$0xff] }
  0xca   :  { %4219 = vmatmul.msk.f32.gmra.mxu3 %vm312_vm1, %v243_v35 }
  0xcb   :  { %4056 = vmatmul.msk.f32.gmra.mxu0 %vm312_vm1, %v80_v36  ;;  %v1879_v3 = vmax.f32 %v1130_v62, 0.0 }
  0xd0   :  { %v1132_v37 = vpop.f32.mrf.mxu0 }
  0xd1   :  { %v1133_v60 = vadd.f32 %v4619_v47, %v1132_v37  ;;  %v95_v37 = vld [vmem:[%s7692_s0 + $0x140] sm:$0xff] }
  0xd3   :  { %4057 = vmatmul.msk.f32.gmra.mxu0 %vm312_vm1, %v81_v38  ;;  %v1880_v1 = vmax.f32 %v1133_v60, 0.0  ;;  %v244_v38 = vld [vmem:[%s7692_s0 + $0x5e8] sm:$0xff]  ;;  %v102_v60 = vld [vmem:[%s7692_s0 + $0x178] sm:$0xff] }
  0xd4   :  { %4220 = vmatmul.msk.f32.gmra.mxu3 %vm312_vm1, %v244_v38 }
  0xd8   :  { %v1135_v39 = vpop.f32.mrf.mxu0 }
  0xd9   :  { %v1136_v56 = vadd.f32 %v4619_v47, %v1135_v39 }
  0xdb   :  { %4058 = vmatmul.msk.f32.gmra.mxu0 %vm312_vm1, %v82_v40  ;;  %v1881_v63 = vmax.f32 %v1136_v56, 0.0  ;;  %v96_v40 = vld [vmem:[%s7692_s0 + $0x148] sm:$0xff]  ;;  %v101_v56 = vld [vmem:[%s7692_s0 + $0x170] sm:$0xff] }
  0xe0   :  { %v1138_v41 = vpop.f32.mrf.mxu0 }
  0xe1   :  { %v1139_v54 = vadd.f32 %v4619_v47, %v1138_v41  ;;  %v245_v41 = vld [vmem:[%s7692_s0 + $0x5f0] sm:$0xff] }
  0xe2   :  { %4221 = vmatmul.msk.f32.gmra.mxu3 %vm312_vm1, %v245_v41 }
  0xe3   :  { %4059 = vmatmul.msk.f32.gmra.mxu0 %vm312_vm1, %v83_v42  ;;  %v1882_v61 = vmax.f32 %v1139_v54, 0.0  ;;  %v249_v54 = vld [vmem:[%s7692_s0 + $0x610] sm:$0xff] }
  0xe8   :  { %v1141_v43 = vpop.f32.mrf.mxu0 }
  0xe9   :  { %v1142_v52 = vadd.f32 %v4619_v47, %v1141_v43  ;;  %v97_v43 = vld [vmem:[%s7692_s0 + $0x150] sm:$0xff] }
  0xeb   :  { %4060 = vmatmul.msk.f32.gmra.mxu0 %vm312_vm1, %v84_v44  ;;  %v1883_v57 = vmax.f32 %v1142_v52, 0.0  ;;  %v246_v44 = vld [vmem:[%s7692_s0 + $0x5f8] sm:$0xff] }
  0xec   :  { %4222 = vmatmul.msk.f32.gmra.mxu3 %vm312_vm1, %v246_v44 }
  0xf0   :  { %v1144_v45 = vpop.f32.mrf.mxu0 }
  0xf1   :  { %v1145_v50 = vadd.f32 %v4619_v47, %v1144_v45 }
  0xf3   :  { %4061 = vmatmul.msk.f32.gmra.mxu0 %vm312_vm1, %v85_v46  ;;  %v1884_v55 = vmax.f32 %v1145_v50, 0.0  ;;  %v98_v46 = vld [vmem:[%s7692_s0 + $0x158] sm:$0xff]  ;;  %v99_v50 = vld [vmem:[%s7692_s0 + $0x160] sm:$0xff] }
  0xf8   :  { %v1147_v48 = vpop.f32.mrf.mxu0 }
  0xf9   :  { %v1148_v51 = vadd.f32 %v4619_v47, %v1147_v48  ;;  %v247_v48 = vld [vmem:[%s7692_s0 + $0x600] sm:$0xff] }
  0xfa   :  { %4223 = vmatmul.msk.f32.gmra.mxu3 %vm312_vm1, %v247_v48 }
  0xfb   :  { %4062 = vmatmul.msk.f32.gmra.mxu0 %vm312_vm1, %v86_v49  ;;  %v1885_v53 = vmax.f32 %v1148_v51, 0.0  ;;  %v248_v51 = vld [vmem:[%s7692_s0 + $0x608] sm:$0xff] }
  0xfd   :  { %2126 = vmatpush.msrb.mxu1 %v1885_v53  ;;  %v100_v53 = vld [vmem:[%s7692_s0 + $0x168] sm:$0xff] }
  0xff   :  { %2127 = vmatpush.msrb.mxu1 %v1884_v55 }
 0x100   :  { %v4630_v58 = vpop.f32.mrf.mxu0 }
 0x101   :  { %2128 = vmatpush.msrb.mxu1 %v1883_v57  ;;  %v250_v57 = vld [vmem:[%s7692_s0 + $0x618] sm:$0xff] }
 0x102   :  { %4224 = vmatmul.msk.f32.gmra.mxu3 %vm312_vm1, %v248_v51 }
 0x103   :  { %4063 = vmatmul.msk.f32.gmra.mxu0 %vm312_vm1, %v87_v59  ;;  %2129 = vmatpush.msrb.mxu1 %v1882_v61  ;;  %v251_v61 = vld [vmem:[%s7692_s0 + $0x620] sm:$0xff] }
 0x105   :  { %2130 = vmatpush.msrb.mxu1 %v1881_v63 }
 0x107   :  { %2131 = vmatpush.msrb.mxu1 %v1880_v1 }
 0x108   :  { %v4640_v4 = vpop.f32.mrf.mxu0 }
 0x109   :  { %2132 = vmatpush.msrb.mxu1 %v1879_v3 }
 0x10a   :  { %4225 = vmatmul.msk.f32.gmra.mxu3 %vm312_vm1, %v249_v54  ;;  %v110_v54 = vld [vmem:[%s7692_s0 + $0x1b8] sm:$0xff] }
 0x10b   :  { %4064 = vmatmul.msk.f32.gmra.mxu0 %vm312_vm1, %v88_v5  ;;  %2133 = vmatpush.msrb.mxu1 %v1878_v7 }
 0x10d   :  { %2134 = vmatpush.msrb.mxu1 %v1877_v9  ;;  %v252_v9 = vld [vmem:[%s7692_s0 + $0x628] sm:$0xff] }
 0x10f   :  { %2135 = vmatpush.msrb.mxu1 %v1876_v11 }
 0x110   :  { %v4653_v14 = vpop.f32.mrf.mxu0 }
 0x111   :  { %2136 = vmatpush.msrb.mxu1 %v1875_v13 }
 0x112   :  { %4226 = vmatmul.msk.f32.gmra.mxu3 %vm312_vm1, %v250_v57  ;;  %v179_v57 = vld [vmem:[%s7692_s0 + $0x3e0] sm:$0xff] }
 0x113   :  { %4065 = vmatmul.msk.f32.gmra.mxu0 %vm312_vm1, %v89_v15  ;;  %2137 = vmatpush.msrb.mxu1 %v1874_v18 }
 0x115   :  { %2138 = vmatpush.msrb.mxu1 %v1873_v22 }
 0x117   :  { %2139 = vmatpush.msrb.mxu1 %v1872_v24  ;;  %v253_v24 = vld [vmem:[%s7692_s0 + $0x630] sm:$0xff] }
 0x118   :  { %v4665_v26 = vpop.f32.mrf.mxu0 }
 0x119   :  { %2140 = vmatpush.msrb.mxu1 %v1871_v25  ;;  %v1160_v32 = vadd.f32 %v4619_v47, %v4665_v26  ;;  %v1154_v26 = vadd.f32 %v4619_v47, %v4640_v4  ;;  %v255_v4 = vld [vmem:[%s7692_s0 + $0x640] sm:$0xff] }
 0x11a   :  { %4227 = vmatmul.msk.f32.gmra.mxu3 %vm312_vm1, %v251_v61  ;;  %v260_v61 = vld [vmem:[%s7692_s0 + $0x668] sm:$0xff] }
 0x11b   :  { %4066 = vmatmul.msk.f32.gmra.mxu0 %vm312_vm1, %v90_v21  ;;  %2141 = vmatpush.msrb.mxu1 %v1870_v27 }
 0x120   :  { %v4671_v19 = vpop.f32.mrf.mxu0 }
 0x122   :  { %4228 = vmatmul.msk.f32.gmra.mxu3 %vm312_vm1, %v252_v9  ;;  %v262_v9 = vld [vmem:[%s7692_s0 + $0x678] sm:$0xff] }
 0x123   :  { %4067 = vmatmul.msk.f32.gmra.mxu0 %vm312_vm1, %v91_v17 }
 0x128   :  { %v4677_v28 = vpop.f32.mrf.mxu0 }
 0x129   :  { %v1166_v27 = vadd.f32 %v4619_v47, %v4677_v28  ;;  %v105_v28 = vld [vmem:[%s7692_s0 + $0x190] sm:$0xff] }
 0x12a   :  { %4229 = vmatmul.msk.f32.gmra.mxu3 %vm312_vm1, %v253_v24  ;;  %v264_v24 = vld [vmem:[%s7692_s0 + $0x688] sm:$0xff] }
 0x12b   :  { %4068 = vmatmul.msk.f32.gmra.mxu0 %vm312_vm1, %v92_v29  ;;  %v1163_v29 = vadd.f32 %v4619_v47, %v4671_v19  ;;  %v1157_v19 = vadd.f32 %v4619_v47, %v4653_v14  ;;  %v106_v14 = vld [vmem:[%s7692_s0 + $0x198] sm:$0xff] }
 0x12d   :  { %v1890_v35 = vmax.f32 %v1163_v29, 0.0  ;;  %v1888_v38 = vmax.f32 %v1157_v19, 0.0  ;;  %v265_v29 = vld [vmem:[%s7692_s0 + $0x690] sm:$0xff] }
 0x130   :  { %v4683_v30 = vpop.f32.mrf.mxu0 }
 0x131   :  { %v1169_v25 = vadd.f32 %v4619_v47, %v4683_v30  ;;  %v1891_v30 = vmax.f32 %v1166_v27, 0.0 }
 0x133   :  { %4069 = vmatmul.msk.f32.gmra.mxu0 %vm312_vm1, %v93_v31  ;;  %v1892_v31 = vmax.f32 %v1169_v25, 0.0 }
 0x138   :  { %v4693_v33 = vpop.f32.mrf.mxu0 }
 0x139   :  { %v1172_v18 = vadd.f32 %v4619_v47, %v4693_v33 }
 0x13b   :  { %4070 = vmatmul.msk.f32.gmra.mxu0 %vm312_vm1, %v94_v34  ;;  %v1893_v17 = vmax.f32 %v1172_v18, 0.0  ;;  %v254_v34 = vld [vmem:[%s7692_s0 + $0x638] sm:$0xff]  ;;  %v183_v18 = vld [vmem:[%s7692_s0 + $0x400] sm:$0xff] }
 0x13c   :  { %4230 = vmatmul.msk.f32.gmra.mxu3 %vm312_vm1, %v254_v34  ;;  %v266_v34 = vld [vmem:[%s7692_s0 + $0x698] sm:$0xff] }
 0x13f   :  { %v4861_v51 = vpop.f32.mrf.mxu3 }
 0x140   :  { %v1174_v36 = vpop.f32.mrf.mxu0 }
 0x141   :  { %v1175_v15 = vadd.f32 %v4619_v47, %v1174_v36  ;;  %v1889_v36 = vmax.f32 %v1160_v32, 0.0  ;;  %v185_v32 = vld [vmem:[%s7692_s0 + $0x410] sm:$0xff] }
 0x143   :  { %4071 = vmatmul.msk.f32.gmra.mxu0 %vm312_vm1, %v95_v37  ;;  %v1894_v21 = vmax.f32 %v1175_v15, 0.0  ;;  %v1151_v37 = vadd.f32 %v4619_v47, %v4630_v58  ;;  %v263_v15 = vld [vmem:[%s7692_s0 + $0x680] sm:$0xff] }
 0x144   :  { %4231 = vmatmul.msk.f32.gmra.mxu3 %vm312_vm1, %v255_v4 }
 0x145   :  { %v1886_v41 = vmax.f32 %v1151_v37, 0.0  ;;  %v267_v37 = vld [vmem:[%s7692_s0 + $0x6a0] sm:$0xff] }
 0x148   :  { %v1177_v39 = vpop.f32.mrf.mxu0 }
 0x149   :  { %v1178_v12 = vadd.f32 %v4619_v47, %v1177_v39  ;;  %v1887_v39 = vmax.f32 %v1154_v26, 0.0 }
 0x14b   :  { %4072 = vmatmul.msk.f32.gmra.mxu0 %vm312_vm1, %v96_v40  ;;  %v1895_v20 = vmax.f32 %v1178_v12, 0.0 }
 0x150   :  { %v1180_v42 = vpop.f32.mrf.mxu0 }
 0x151   :  { %v1181_v10 = vadd.f32 %v4619_v47, %v1180_v42  ;;  %v107_v42 = vld [vmem:[%s7692_s0 + $0x1a0] sm:$0xff] }
 0x153   :  { %4073 = vmatmul.msk.f32.gmra.mxu0 %vm312_vm1, %v97_v43  ;;  %v1896_v16 = vmax.f32 %v1181_v10, 0.0  ;;  %v256_v43 = vld [vmem:[%s7692_s0 + $0x648] sm:$0xff] }
 0x154   :  { %4232 = vmatmul.msk.f32.gmra.mxu3 %vm312_vm1, %v256_v43 }
 0x158   :  { %v1183_v45 = vpop.f32.mrf.mxu0 }
 0x159   :  { %v1184_v5 = vadd.f32 %v4619_v47, %v1183_v45  ;;  %v108_v45 = vld [vmem:[%s7692_s0 + $0x1a8] sm:$0xff] }
 0x15b   :  { %4074 = vmatmul.msk.f32.gmra.mxu0 %vm312_vm1, %v98_v46  ;;  %v1897_v13 = vmax.f32 %v1184_v5, 0.0  ;;  %v257_v46 = vld [vmem:[%s7692_s0 + $0x650] sm:$0xff] }
 0x15c   :  { %4233 = vmatmul.msk.f32.gmra.mxu3 %vm312_vm1, %v257_v46  ;;  %v181_v5 = vld [vmem:[%s7692_s0 + $0x3f0] sm:$0xff] }
 0x160   :  { %v1186_v49 = vpop.f32.mrf.mxu0 }
 0x161   :  { %v1187_v2 = vadd.f32 %v4619_v47, %v1186_v49  ;;  %v109_v49 = vld [vmem:[%s7692_s0 + $0x1b0] sm:$0xff] }
 0x163   :  { %4075 = vmatmul.msk.f32.gmra.mxu0 %vm312_vm1, %v99_v50  ;;  %v1898_v11 = vmax.f32 %v1187_v2, 0.0  ;;  %v258_v50 = vld [vmem:[%s7692_s0 + $0x658] sm:$0xff]  ;;  %v261_v2 = vld [vmem:[%s7692_s0 + $0x670] sm:$0xff] }
 0x164   :  { %4234 = vmatmul.msk.f32.gmra.mxu3 %vm312_vm1, %v258_v50 }
 0x168   :  { %v1189_v52 = vpop.f32.mrf.mxu0 }
 0x169   :  { %v1190_v0 = vadd.f32 %v4619_v47, %v1189_v52  ;;  %v178_v52 = vld [vmem:[%s7692_s0 + $0x3d8] sm:$0xff] }
 0x16a   :  { %4154 = vmatmul.msk.f32.vlgmr.msra.gmra.mxu1 %vm312_vm1, %v178_v52  ;;  %v119_v52 = vld [vmem:[%s7692_s0 + $0x200] sm:$0xff] }
 0x16b   :  { %4076 = vmatmul.msk.f32.gmra.mxu0 %vm312_vm1, %v100_v53  ;;  %v1899_v6 = vmax.f32 %v1190_v0, 0.0 }
 0x170   :  { %v1192_v55 = vpop.f32.mrf.mxu0 }
 0x171   :  { %v1193_v62 = vadd.f32 %v4619_v47, %v1192_v55  ;;  %v259_v55 = vld [vmem:[%s7692_s0 + $0x660] sm:$0xff] }
 0x172   :  { %4235 = vmatmul.msk.f32.gmra.mxu3 %vm312_vm1, %v259_v55  ;;  %4155 = vmatmul.msk.f32.gmra.mxu1 %vm312_vm1, %v179_v57 }
 0x173   :  { %4077 = vmatmul.msk.f32.gmra.mxu0 %vm312_vm1, %v101_v56  ;;  %v1900_v3 = vmax.f32 %v1193_v62, 0.0  ;;  %v4877_v56 = vpop.f32.mrf.mxu3 }
 0x178   :  { %v1195_v59 = vpop.f32.mrf.mxu0 }
 0x179   :  { %v1196_v63 = vadd.f32 %v4619_v47, %v1195_v59 }
 0x17a   :  { %4236 = vmatmul.msk.f32.gmra.mxu3 %vm312_vm1, %v260_v61 }
 0x17b   :  { %4078 = vmatmul.msk.f32.gmra.mxu0 %vm312_vm1, %v102_v60  ;;  %v1901_v1 = vmax.f32 %v1196_v63, 0.0  ;;  %v111_v60 = vld [vmem:[%s7692_s0 + $0x1c0] sm:$0xff]  ;;  %v4893_v62 = vpop.f32.mrf.mxu3  ;;  %v180_v63 = vld [vmem:[%s7692_s0 + $0x3e8] sm:$0xff] }
 0x17c   :  { %4156 = vmatmul.msk.f32.gmra.mxu1 %vm312_vm1, %v180_v63 }
 0x17d   :  { %2167 = vmatpush.msrb.mxu2 %v1901_v1  ;;  %v112_v1 = vld [vmem:[%s7692_s0 + $0x1c8] sm:$0xff] }
 0x17f   :  { %2168 = vmatpush.msrb.mxu2 %v1900_v3 }
 0x180   :  { %v4772_v7 = vpop.f32.mrf.mxu0 }
 0x181   :  { %2169 = vmatpush.msrb.mxu2 %v1899_v6 }
 0x182   :  { %4237 = vmatmul.msk.f32.gmra.mxu3 %vm312_vm1, %v261_v2 }
 0x183   :  { %4079 = vmatmul.msk.f32.gmra.mxu0 %vm312_vm1, %v103_v8  ;;  %2170 = vmatpush.msrb.mxu2 %v1898_v11  ;;  %v4909_v3 = vpop.f32.mrf.mxu3  ;;  %v113_v8 = vld [vmem:[%s7692_s0 + $0x1d0] sm:$0xff]  ;;  %v182_v11 = vld [vmem:[%s7692_s0 + $0x3f8] sm:$0xff] }
 0x184   :  { %4157 = vmatmul.msk.f32.gmra.mxu1 %vm312_vm1, %v181_v5  ;;  %v188_v5 = vld [vmem:[%s7692_s0 + $0x428] sm:$0xff] }
 0x185   :  { %2171 = vmatpush.msrb.mxu2 %v1897_v13  ;;  %v114_v13 = vld [vmem:[%s7692_s0 + $0x1d8] sm:$0xff] }
 0x187   :  { %2172 = vmatpush.msrb.mxu2 %v1896_v16 }
 0x188   :  { %v4787_v22 = vpop.f32.mrf.mxu0 }
 0x189   :  { %2173 = vmatpush.msrb.mxu2 %v1895_v20 }
 0x18a   :  { %4238 = vmatmul.msk.f32.gmra.mxu3 %vm312_vm1, %v262_v9  ;;  %v120_v9 = vld [vmem:[%s7692_s0 + $0x208] sm:$0xff] }
 0x18b   :  { %4080 = vmatmul.msk.f32.gmra.mxu0 %vm312_vm1, %v104_v23  ;;  %2174 = vmatpush.msrb.mxu2 %v1894_v21  ;;  %v4923_v10 = vpop.f32.mrf.mxu3  ;;  %v115_v23 = vld [vmem:[%s7692_s0 + $0x1e0] sm:$0xff]  ;;  %v184_v21 = vld [vmem:[%s7692_s0 + $0x408] sm:$0xff] }
 0x18c   :  { %4158 = vmatmul.msk.f32.gmra.mxu1 %vm312_vm1, %v182_v11 }
 0x18d   :  { %2175 = vmatpush.msrb.mxu2 %v1893_v17  ;;  %v116_v17 = vld [vmem:[%s7692_s0 + $0x1e8] sm:$0xff] }
 0x18f   :  { %2176 = vmatpush.msrb.mxu2 %v1892_v31 }
 0x190   :  { %v4805_v33 = vpop.f32.mrf.mxu0 }
 0x191   :  { %2177 = vmatpush.msrb.mxu2 %v1891_v30 }
 0x192   :  { %4239 = vmatmul.msk.f32.gmra.mxu3 %vm312_vm1, %v263_v15 }
 0x193   :  { %4081 = vmatmul.msk.f32.gmra.mxu0 %vm312_vm1, %v105_v28  ;;  %2178 = vmatpush.msrb.mxu2 %v1890_v35  ;;  %v4937_v16 = vpop.f32.mrf.mxu3  ;;  %v117_v28 = vld [vmem:[%s7692_s0 + $0x1f0] sm:$0xff]  ;;  %v186_v35 = vld [vmem:[%s7692_s0 + $0x418] sm:$0xff] }
 0x194   :  { %7716 = vst [vmem:[#allocation5_spill] sm:$0xff] %v4937_v16  ;;  %4159 = vmatmul.msk.f32.gmra.mxu1 %vm312_vm1, %v183_v18  ;;  %v218_v16 = vld [vmem:[%s7692_s0 + $0x518] sm:$0xff] }
 0x195   :  { %2179 = vmatpush.msrb.mxu2 %v1889_v36  ;;  %v118_v36 = vld [vmem:[%s7692_s0 + $0x1f8] sm:$0xff] }
 0x197   :  { %2180 = vmatpush.msrb.mxu2 %v1888_v38 }
 0x198   :  { %v4821_v40 = vpop.f32.mrf.mxu0 }
 0x199   :  { %2181 = vmatpush.msrb.mxu2 %v1887_v39 }
 0x19a   :  { %4240 = vmatmul.msk.f32.gmra.mxu3 %vm312_vm1, %v264_v24 }
 0x19b   :  { %4082 = vmatmul.msk.f32.gmra.mxu0 %vm312_vm1, %v106_v14  ;;  %2182 = vmatpush.msrb.mxu2 %v1886_v41  ;;  %v4951_v25 = vpop.f32.mrf.mxu3 }
 0x19c   :  { %7717 = vst [vmem:[#allocation6_spill] sm:$0xff] %v4951_v25  ;;  %4160 = vmatmul.msk.f32.gmra.mxu1 %vm312_vm1, %v184_v21  ;;  %v121_v21 = vld [vmem:[%s7692_s0 + $0x210] sm:$0xff] }
 0x1a0   :  { %v4831_v58 = vpop.f32.mrf.mxu0 }
 0x1a1   :  { %v1211_v18 = vadd.f32 %v4619_v47, %v4831_v58  ;;  %v270_v58 = vld [vmem:[%s7692_s0 + $0x6b8] sm:$0xff] }
 0x1a2   :  { %4241 = vmatmul.msk.f32.gmra.mxu3 %vm312_vm1, %v265_v29 }
 0x1a3   :  { %4083 = vmatmul.msk.f32.gmra.mxu0 %vm312_vm1, %v107_v42  ;;  %v4965_v31 = vpop.f32.mrf.mxu3 }
 0x1a4   :  { %7718 = vst [vmem:[#allocation7_spill] sm:$0xff] %v4965_v31  ;;  %4161 = vmatmul.msk.f32.gmra.mxu1 %vm312_vm1, %v185_v32  ;;  %v217_v31 = vld [vmem:[%s7692_s0 + $0x510] sm:$0xff] }
 0x1a8   :  { %v4841_v44 = vpop.f32.mrf.mxu0 }
 0x1aa   :  { %4242 = vmatmul.msk.f32.gmra.mxu3 %vm312_vm1, %v266_v34 }
 0x1ab   :  { %4084 = vmatmul.msk.f32.gmra.mxu0 %vm312_vm1, %v108_v45  ;;  %v4979_v19 = vpop.f32.mrf.mxu3  ;;  %v187_v45 = vld [vmem:[%s7692_s0 + $0x420] sm:$0xff] }
 0x1ac   :  { %7719 = vst [vmem:[#allocation8_spill] sm:$0xff] %v4979_v19  ;;  %4162 = vmatmul.msk.f32.gmra.mxu1 %vm312_vm1, %v186_v35  ;;  %v122_v35 = vld [vmem:[%s7692_s0 + $0x218] sm:$0xff] }
 0x1b0   :  { %v4851_v48 = vpop.f32.mrf.mxu0 }
 0x1b1   :  { %v1217_v11 = vadd.f32 %v4619_v47, %v4851_v48  ;;  %v189_v48 = vld [vmem:[%s7692_s0 + $0x430] sm:$0xff] }
 0x1b2   :  { %4243 = vmatmul.msk.f32.gmra.mxu3 %vm312_vm1, %v267_v37  ;;  %v191_v37 = vld [vmem:[%s7692_s0 + $0x440] sm:$0xff] }
 0x1b3   :  { %4085 = vmatmul.msk.f32.gmra.mxu0 %vm312_vm1, %v109_v49  ;;  %v4996_v41 = vpop.f32.mrf.mxu3 }
 0x1b4   :  { %7720 = vst [vmem:[#allocation9_spill] sm:$0xff] %v4996_v41  ;;  %4163 = vmatmul.msk.f32.gmra.mxu1 %vm312_vm1, %v187_v45  ;;  %v124_v45 = vld [vmem:[%s7692_s0 + $0x228] sm:$0xff] }
 0x1b8   :  { %v4867_v53 = vpop.f32.mrf.mxu0 }
 0x1bb   :  { %4086 = vmatmul.msk.f32.gmra.mxu0 %vm312_vm1, %v110_v54  ;;  %v268_v54 = vld [vmem:[%s7692_s0 + $0x6a8] sm:$0xff]  ;;  %v5017_v63 = vpop.f32.mrf.mxu3 }
 0x1bc   :  { %4244 = vmatmul.msk.f32.gmra.mxu3 %vm312_vm1, %v268_v54  ;;  %7721 = vst [vmem:[#allocation10_spill] sm:$0xff] %v5017_v63  ;;  %4164 = vmatmul.msk.f32.gmra.mxu1 %vm312_vm1, %v188_v5  ;;  %v126_v5 = vld [vmem:[%s7692_s0 + $0x238] sm:$0xff] }
 0x1c0   :  { %v4883_v59 = vpop.f32.mrf.mxu0 }
 0x1c3   :  { %4087 = vmatmul.msk.f32.gmra.mxu0 %vm312_vm1, %v111_v60  ;;  %v5041_v15 = vpop.f32.mrf.mxu3 }
 0x1c4   :  { %7722 = vst [vmem:[#allocation11_spill] sm:$0xff] %v5041_v15  ;;  %4165 = vmatmul.msk.f32.gmra.mxu1 %vm312_vm1, %v189_v48 }
 0x1c8   :  { %v4899_v0 = vpop.f32.mrf.mxu0 }
 0x1c9   :  { %v1226_v60 = vadd.f32 %v4619_v47, %v4899_v0  ;;  %v1220_v0 = vadd.f32 %v4619_v47, %v4867_v53  ;;  %v1214_v53 = vadd.f32 %v4619_v47, %v4841_v44  ;;  %v1208_v44 = vadd.f32 %v4619_v47, %v4821_v40 }
 0x1ca   :  { %v1202_v40 = vadd.f32 %v4619_v47, %v4787_v22 }
 0x1cb   :  { %4088 = vmatmul.msk.f32.gmra.mxu0 %vm312_vm1, %v112_v1  ;;  %v1223_v1 = vadd.f32 %v4619_v47, %v4883_v59  ;;  %v269_v59 = vld [vmem:[%s7692_s0 + $0x6b0] sm:$0xff]  ;;  %v1905_v29 = vmax.f32 %v1208_v44, 0.0  ;;  %v5065_v32 = vpop.f32.mrf.mxu3  ;;  %v128_v44 = vld [vmem:[%s7692_s0 + $0x248] sm:$0xff] }
 0x1cc   :  { %4245 = vmatmul.msk.f32.gmra.mxu3 %vm312_vm1, %v269_v59  ;;  %7723 = vst [vmem:[#allocation12_spill] sm:$0xff] %v5065_v32  ;;  %v1903_v34 = vmax.f32 %v1202_v40, 0.0  ;;  %v195_v59 = vld [vmem:[%s7692_s0 + $0x460] sm:$0xff]  ;;  %v129_v40 = vld [vmem:[%s7692_s0 + $0x250] sm:$0xff] }
 0x1d0   :  { %v1228_v6 = vpop.f32.mrf.mxu0 }
 0x1d1   :  { %v1229_v55 = vadd.f32 %v4619_v47, %v1228_v6  ;;  %v1911_v6 = vmax.f32 %v1226_v60, 0.0 }
 0x1d3   :  { %4089 = vmatmul.msk.f32.gmra.mxu0 %vm312_vm1, %v113_v8  ;;  %v1912_v2 = vmax.f32 %v1229_v55, 0.0  ;;  %v125_v55 = vld [vmem:[%s7692_s0 + $0x230] sm:$0xff] }
 0x1d4   :  { %4246 = vmatmul.msk.f32.gmra.mxu3 %vm312_vm1, %v270_v58 }
 0x1d8   :  { %v1231_v12 = vpop.f32.mrf.mxu0 }
 0x1d9   :  { %v1232_v46 = vadd.f32 %v4619_v47, %v1231_v12  ;;  %v1910_v12 = vmax.f32 %v1223_v1, 0.0  ;;  %v194_v1 = vld [vmem:[%s7692_s0 + $0x458] sm:$0xff] }
 0x1db   :  { %4090 = vmatmul.msk.f32.gmra.mxu0 %vm312_vm1, %v114_v13  ;;  %v1913_v61 = vmax.f32 %v1232_v46, 0.0  ;;  %v1909_v13 = vmax.f32 %v1220_v0, 0.0  ;;  %v273_v46 = vld [vmem:[%s7692_s0 + $0x6d0] sm:$0xff]  ;;  %v275_v0 = vld [vmem:[%s7692_s0 + $0x6e0] sm:$0xff] }
 0x1e0   :  { %v1234_v20 = vpop.f32.mrf.mxu0 }
 0x1e1   :  { %v1235_v42 = vadd.f32 %v4619_v47, %v1234_v20  ;;  %v1908_v20 = vmax.f32 %v1217_v11, 0.0 }
 0x1e3   :  { %4091 = vmatmul.msk.f32.gmra.mxu0 %vm312_vm1, %v115_v23  ;;  %v1914_v57 = vmax.f32 %v1235_v42, 0.0  ;;  %v1907_v23 = vmax.f32 %v1214_v53, 0.0  ;;  %v192_v42 = vld [vmem:[%s7692_s0 + $0x448] sm:$0xff] }
 0x1e4   :  { %v276_v53 = vld [vmem:[%s7692_s0 + $0x6e8] sm:$0xff] }
 0x1e7   :  { %v5131_v60 = vpop.f32.mrf.mxu1 }
 0x1e8   :  { %v1237_v27 = vpop.f32.mrf.mxu0 }
 0x1e9   :  { %v1238_v14 = vadd.f32 %v4619_v47, %v1237_v27  ;;  %v1205_v27 = vadd.f32 %v4619_v47, %v4805_v33  ;;  %v190_v33 = vld [vmem:[%s7692_s0 + $0x438] sm:$0xff] }
 0x1ea   :  { %4166 = vmatmul.msk.f32.gmra.mxu1 %vm312_vm1, %v190_v33  ;;  %v198_v33 = vld [vmem:[%s7692_s0 + $0x478] sm:$0xff] }
 0x1eb   :  { %4092 = vmatmul.msk.f32.gmra.mxu0 %vm312_vm1, %v116_v17  ;;  %v1915_v49 = vmax.f32 %v1238_v14, 0.0  ;;  %v1906_v17 = vmax.f32 %v1211_v18, 0.0  ;;  %v272_v14 = vld [vmem:[%s7692_s0 + $0x6c8] sm:$0xff] }
 0x1f0   :  { %v1240_v30 = vpop.f32.mrf.mxu0 }
 0x1f1   :  { %v1241_v38 = vadd.f32 %v4619_v47, %v1240_v30  ;;  %v1199_v30 = vadd.f32 %v4619_v47, %v4772_v7  ;;  %v271_v7 = vld [vmem:[%s7692_s0 + $0x6c0] sm:$0xff] }
 0x1f2   :  { %4247 = vmatmul.msk.f32.gmra.mxu3 %vm312_vm1, %v271_v7  ;;  %4167 = vmatmul.msk.f32.gmra.mxu1 %vm312_vm1, %v191_v37  ;;  %v279_v7 = vld [vmem:[%s7692_s0 + $0x700] sm:$0xff] }
 0x1f3   :  { %4093 = vmatmul.msk.f32.gmra.mxu0 %vm312_vm1, %v117_v28  ;;  %v1916_v43 = vmax.f32 %v1241_v38, 0.0  ;;  %v1904_v28 = vmax.f32 %v1205_v27, 0.0  ;;  %v197_v27 = vld [vmem:[%s7692_s0 + $0x470] sm:$0xff] }
 0x1f8   :  { %v1243_v26 = vpop.f32.mrf.mxu0 }
 0x1f9   :  { %v1244_v39 = vadd.f32 %v4619_v47, %v1243_v26  ;;  %v1902_v26 = vmax.f32 %v1199_v30, 0.0 }
 0x1fa   :  { %4248 = vmatmul.msk.f32.gmra.mxu3 %vm312_vm1, %v272_v14  ;;  %4168 = vmatmul.msk.f32.gmra.mxu1 %vm312_vm1, %v192_v42  ;;  %v131_v42 = vld [vmem:[%s7692_s0 + $0x260] sm:$0xff] }
 0x1fb   :  { %4094 = vmatmul.msk.f32.gmra.mxu0 %vm312_vm1, %v118_v36  ;;  %v1917_v4 = vmax.f32 %v1244_v39, 0.0  ;;  %v5083_v36 = vpop.f32.mrf.mxu3  ;;  %v123_v39 = vld [vmem:[%s7692_s0 + $0x220] sm:$0xff] }
 0x1fc   :  { %7724 = vst [vmem:[#allocation13_spill] sm:$0xff] %v5083_v36 }
 0x1fd   :  { %2208 = vmatpush.msrb.mxu3 %v1917_v4 }
 0x1ff   :  { %2209 = vmatpush.msrb.mxu3 %v1916_v43 }
 0x200   :  { %v5004_v50 = vpop.f32.mrf.mxu0 }
 0x201   :  { %2210 = vmatpush.msrb.mxu3 %v1915_v49 }
 0x202   :  { %4249 = vmatmul.msk.f32.gmra.mxu3 %vm312_vm1, %v273_v46 }
 0x203   :  { %4095 = vmatmul.msk.f32.gmra.mxu0 %vm312_vm1, %v119_v52  ;;  %2211 = vmatpush.msrb.mxu3 %v1914_v57  ;;  %v5099_v4 = vpop.f32.mrf.mxu3  ;;  %v193_v52 = vld [vmem:[%s7692_s0 + $0x450] sm:$0xff]  ;;  %v274_v57 = vld [vmem:[%s7692_s0 + $0x6d8] sm:$0xff] }
 0x204   :  { %7725 = vst [vmem:[#allocation14_spill] sm:$0xff] %v5099_v4  ;;  %4169 = vmatmul.msk.f32.gmra.mxu1 %vm312_vm1, %v193_v52 }
 0x205   :  { %2212 = vmatpush.msrb.mxu3 %v1913_v61 }
 0x207   :  { %2213 = vmatpush.msrb.mxu3 %v1912_v2 }
 0x208   :  { %v5027_v8 = vpop.f32.mrf.mxu0 }
 0x209   :  { %2214 = vmatpush.msrb.mxu3 %v1911_v6  ;;  %v5149_v6 = vpop.f32.mrf.mxu1 }
 0x20a   :  { %4250 = vmatmul.msk.f32.gmra.mxu3 %vm312_vm1, %v274_v57 }
 0x20b   :  { %4096 = vmatmul.msk.f32.gmra.mxu0 %vm312_vm1, %v120_v9  ;;  %2215 = vmatpush.msrb.mxu3 %v1910_v12  ;;  %v5115_v49 = vpop.f32.mrf.mxu3  ;;  %v127_v12 = vld [vmem:[%s7692_s0 + $0x240] sm:$0xff] }
 0x20c   :  { %7726 = vst [vmem:[#allocation15_spill] sm:$0xff] %v5115_v49  ;;  %4170 = vmatmul.msk.f32.gmra.mxu1 %vm312_vm1, %v194_v1  ;;  %v132_v1 = vld [vmem:[%s7692_s0 + $0x268] sm:$0xff] }
 0x20d   :  { %2216 = vmatpush.msrb.mxu3 %v1909_v13 }
 0x20f   :  { %2217 = vmatpush.msrb.mxu3 %v1908_v20  ;;  %v196_v20 = vld [vmem:[%s7692_s0 + $0x468] sm:$0xff] }
 0x210   :  { %v5051_v24 = vpop.f32.mrf.mxu0 }
 0x211   :  { %2218 = vmatpush.msrb.mxu3 %v1907_v23  ;;  %v5167_v13 = vpop.f32.mrf.mxu1  ;;  %v277_v23 = vld [vmem:[%s7692_s0 + $0x6f0] sm:$0xff] }
 0x212   :  { %4251 = vmatmul.msk.f32.gmra.mxu3 %vm312_vm1, %v275_v0 }
 0x213   :  { %4097 = vmatmul.msk.f32.gmra.mxu0 %vm312_vm1, %v121_v21  ;;  %2219 = vmatpush.msrb.mxu3 %v1906_v17  ;;  %v5133_v61 = vpop.f32.mrf.mxu3 }
 0x214   :  { %7727 = vst [vmem:[#allocation16_spill] sm:$0xff] %v5133_v61  ;;  %4171 = vmatmul.msk.f32.gmra.mxu1 %vm312_vm1, %v195_v59 }
 0x215   :  { %2220 = vmatpush.msrb.mxu3 %v1905_v29  ;;  %v278_v29 = vld [vmem:[%s7692_s0 + $0x6f8] sm:$0xff] }
 0x217   :  { %2221 = vmatpush.msrb.mxu3 %v1904_v28 }
 0x218   :  { %v5073_v22 = vpop.f32.mrf.mxu0 }
 0x219   :  { %2222 = vmatpush.msrb.mxu3 %v1903_v34  ;;  %v5185_v21 = vpop.f32.mrf.mxu1 }
 0x21a   :  { %4252 = vmatmul.msk.f32.gmra.mxu3 %vm312_vm1, %v276_v53 }
 0x21b   :  { %4098 = vmatmul.msk.f32.gmra.mxu0 %vm312_vm1, %v122_v35  ;;  %2223 = vmatpush.msrb.mxu3 %v1902_v26  ;;  %v5151_v9 = vpop.f32.mrf.mxu3  ;;  %v130_v35 = vld [vmem:[%s7692_s0 + $0x258] sm:$0xff] }
 0x21c   :  { %7728 = vst [vmem:[#allocation17_spill] sm:$0xff] %v5151_v9  ;;  %4172 = vmatmul.msk.f32.gmra.mxu1 %vm312_vm1, %v196_v20  ;;  %v133_v20 = vld [vmem:[%s7692_s0 + $0x270] sm:$0xff] }
 0x220   :  { %v5089_v38 = vpop.f32.mrf.mxu0 }
 0x221   :  { %v5203_v30 = vpop.f32.mrf.mxu1 }
 0x222   :  { %4253 = vmatmul.msk.f32.gmra.mxu3 %vm312_vm1, %v277_v23 }
 0x223   :  { %4099 = vmatmul.msk.f32.gmra.mxu0 %vm312_vm1, %v123_v39  ;;  %v5169_v18 = vpop.f32.mrf.mxu3  ;;  %v199_v39 = vld [vmem:[%s7692_s0 + $0x480] sm:$0xff] }
 0x224   :  { %7729 = vst [vmem:[#allocation18_spill] sm:$0xff] %v5169_v18  ;;  %4173 = vmatmul.msk.f32.gmra.mxu1 %vm312_vm1, %v197_v27 }
 0x228   :  { %v5105_v43 = vpop.f32.mrf.mxu0 }
 0x229   :  { %v5219_v26 = vpop.f32.mrf.mxu1 }
 0x22a   :  { %4254 = vmatmul.msk.f32.gmra.mxu3 %vm312_vm1, %v278_v29 }
 0x22b   :  { %4100 = vmatmul.msk.f32.gmra.mxu0 %vm312_vm1, %v124_v45  ;;  %v5187_v58 = vpop.f32.mrf.mxu3  ;;  %v280_v45 = vld [vmem:[%s7692_s0 + $0x708] sm:$0xff] }
 0x22c   :  { %7730 = vst [vmem:[#allocation19_spill] sm:$0xff] %v5187_v58  ;;  %4174 = vmatmul.msk.f32.gmra.mxu1 %vm312_vm1, %v198_v33  ;;  %v134_v33 = vld [vmem:[%s7692_s0 + $0x278] sm:$0xff] }
 0x230   :  { %v5121_v54 = vpop.f32.mrf.mxu0 }
 0x231   :  { %v5235_v46 = vpop.f32.mrf.mxu1 }
 0x232   :  { %4255 = vmatmul.msk.f32.gmra.mxu3 %vm312_vm1, %v279_v7 }
 0x233   :  { %4101 = vmatmul.msk.f32.gmra.mxu0 %vm312_vm1, %v125_v55  ;;  %v5205_v28 = vpop.f32.mrf.mxu3  ;;  %v200_v55 = vld [vmem:[%s7692_s0 + $0x488] sm:$0xff] }
 0x234   :  { %7731 = vst [vmem:[#allocation20_spill] sm:$0xff] %v5205_v28  ;;  %4175 = vmatmul.msk.f32.gmra.mxu1 %vm312_vm1, %v199_v39  ;;  %v160_v28 = vld [vmem:[%s7692_s0 + $0x348] sm:$0xff] }
 0x238   :  { %v5139_v2 = vpop.f32.mrf.mxu0 }
 0x239   :  { %v5251_v0 = vpop.f32.mrf.mxu1 }
 0x23a   :  { %4256 = vmatmul.msk.f32.gmra.mxu3 %vm312_vm1, %v280_v45 }
 0x23b   :  { %4102 = vmatmul.msk.f32.gmra.mxu0 %vm312_vm1, %v126_v5  ;;  %v5221_v37 = vpop.f32.mrf.mxu3  ;;  %v281_v5 = vld [vmem:[%s7692_s0 + $0x710] sm:$0xff] }
 0x23c   :  { %7732 = vst [vmem:[#allocation21_spill] sm:$0xff] %v5221_v37  ;;  %4176 = vmatmul.msk.f32.gmra.mxu1 %vm312_vm1, %v200_v55  ;;  %v211_v37 = vld [vmem:[%s7692_s0 + $0x4e0] sm:$0xff] }
 0x240   :  { %v5157_v11 = vpop.f32.mrf.mxu0 }
 0x241   :  { %v5267_v23 = vpop.f32.mrf.mxu1 }
 0x242   :  { %4257 = vmatmul.msk.f32.gmra.mxu3 %vm312_vm1, %v281_v5 }
 0x243   :  { %4103 = vmatmul.msk.f32.gmra.mxu0 %vm312_vm1, %v127_v12  ;;  %v5237_v52 = vpop.f32.mrf.mxu3  ;;  %v201_v12 = vld [vmem:[%s7692_s0 + $0x490] sm:$0xff] }
 0x244   :  { %7733 = vst [vmem:[#allocation22_spill] sm:$0xff] %v5237_v52  ;;  %4177 = vmatmul.msk.f32.gmra.mxu1 %vm312_vm1, %v201_v12 }
 0x248   :  { %v5175_v48 = vpop.f32.mrf.mxu0 }
 0x249   :  { %v5286_v55 = vpop.f32.mrf.mxu1 }
 0x24b   :  { %4104 = vmatmul.msk.f32.gmra.mxu0 %vm312_vm1, %v128_v44  ;;  %v5253_v59 = vpop.f32.mrf.mxu3  ;;  %v282_v44 = vld [vmem:[%s7692_s0 + $0x718] sm:$0xff] }
 0x24c   :  { %7734 = vst [vmem:[#allocation23_spill] sm:$0xff] %v5253_v59  ;;  %4258 = vmatmul.msk.f32.gmra.mxu3 %vm312_vm1, %v282_v44 }
 0x250   :  { %v5193_v17 = vpop.f32.mrf.mxu0 }
 0x253   :  { %4105 = vmatmul.msk.f32.gmra.mxu0 %vm312_vm1, %v129_v40  ;;  %v5269_v27 = vpop.f32.mrf.mxu3  ;;  %v202_v40 = vld [vmem:[%s7692_s0 + $0x498] sm:$0xff] }
 0x254   :  { %7735 = vst [vmem:[#allocation24_spill] sm:$0xff] %v5269_v27  ;;  %4178 = vmatmul.msk.f32.gmra.mxu1 %vm312_vm1, %v202_v40  ;;  %v135_v40 = vld [vmem:[%s7692_s0 + $0x280] sm:$0xff]  ;;  %v212_v27 = vld [vmem:[%s7692_s0 + $0x4e8] sm:$0xff] }
 0x258   :  { %v1279_v34 = vpop.f32.mrf.mxu0 }
 0x25b   :  { %4106 = vmatmul.msk.f32.gmra.mxu0 %vm312_vm1, %v130_v35  ;;  %v283_v35 = vld [vmem:[%s7692_s0 + $0x720] sm:$0xff] }
 0x25c   :  { %4259 = vmatmul.msk.f32.gmra.mxu3 %vm312_vm1, %v283_v35 }
 0x260   :  { %v1282_v14 = vpop.f32.mrf.mxu0 }
 0x261   :  { %v1283_v5 = vadd.f32 %v4619_v47, %v1282_v14  ;;  %v284_v14 = vld [vmem:[%s7692_s0 + $0x728] sm:$0xff] }
 0x263   :  { %4107 = vmatmul.msk.f32.gmra.mxu0 %vm312_vm1, %v131_v42 }
 0x264   :  { %4260 = vmatmul.msk.f32.gmra.mxu3 %vm312_vm1, %v284_v14 }
 0x268   :  { %v1285_v57 = vpop.f32.mrf.mxu0 }
 0x269   :  { %v1286_v42 = vadd.f32 %v4619_v47, %v1285_v57 }
 0x26b   :  { %4108 = vmatmul.msk.f32.gmra.mxu0 %vm312_vm1, %v132_v1  ;;  %v5288_v1 = vpop.f32.mrf.mxu3  ;;  %v1931_v57 = vmax.f32 %v1286_v42, 0.0 }
 0x26c   :  { %7736 = vst [vmem:[#allocation25_spill] sm:$0xff] %v5288_v1 }
 0x270   :  { %v1288_v53 = vpop.f32.mrf.mxu0 }
 0x271   :  { %v1289_v7 = vadd.f32 %v4619_v47, %v1288_v53  ;;  %v203_v53 = vld [vmem:[%s7692_s0 + $0x4a0] sm:$0xff] }
 0x272   :  { %4179 = vmatmul.msk.f32.gmra.mxu1 %vm312_vm1, %v203_v53  ;;  %v285_v53 = vld [vmem:[%s7692_s0 + $0x730] sm:$0xff] }
 0x273   :  { %4109 = vmatmul.msk.f32.gmra.mxu0 %vm312_vm1, %v133_v20  ;;  %v1932_v12 = vmax.f32 %v1289_v7, 0.0  ;;  %v1280_v20 = vadd.f32 %v4619_v47, %v1279_v34  ;;  %v1274_v34 = vadd.f32 %v4619_v47, %v5175_v48  ;;  %v5310_v7 = vpop.f32.mrf.mxu1  ;;  %v1268_v48 = vadd.f32 %v4619_v47, %v5139_v2  ;;  %4261 = vmatmul.msk.f32.gmra.mxu3 %vm312_vm1, %v285_v53 }
 0x274   :  { %v1262_v2 = vadd.f32 %v4619_v47, %v5105_v43  ;;  %v5349_v43 = vld [vmem:[%s7694_s2] ss:$0 sm:$0xff] }
 0x275   :  { %v1929_v35 = vmax.f32 %v1280_v20, 0.0  ;;  %v1265_v20 = vadd.f32 %v4619_v47, %v5121_v54  ;;  %v205_v54 = vld [vmem:[%s7692_s0 + $0x4b0] sm:$0xff]  ;;  %v1247_v53 = vadd.f32 %v5349_v43, %v5004_v50  ;;  %v287_v50 = vld [vmem:[%s7692_s0 + $0x740] sm:$0xff] }
 0x278   :  { %v1291_v29 = vpop.f32.mrf.mxu0 }
 0x279   :  { %v1292_v39 = vadd.f32 %v4619_v47, %v1291_v29  ;;  %v1277_v29 = vadd.f32 %v4619_v47, %v5193_v17  ;;  %v204_v17 = vld [vmem:[%s7692_s0 + $0x4a8] sm:$0xff] }
 0x27a   :  { %4180 = vmatmul.msk.f32.gmra.mxu1 %vm312_vm1, %v204_v17  ;;  %v1253_v17 = vadd.f32 %v5349_v43, %v5051_v24  ;;  %v206_v24 = vld [vmem:[%s7692_s0 + $0x4b8] sm:$0xff] }
 0x27b   :  { %v1933_v45 = vmax.f32 %v1292_v39, 0.0  ;;  %4110 = vmatmul.msk.f32.gmra.mxu0 %vm312_vm1, %v134_v33  ;;  %v1930_v33 = vmax.f32 %v1283_v5, 0.0  ;;  %v1271_v39 = vadd.f32 %v4619_v47, %v5157_v11  ;;  %v1928_v42 = vmax.f32 %v1277_v29, 0.0  ;;  %v136_v11 = vld [vmem:[%s7692_s0 + $0x288] sm:$0xff]  ;;  %v5336_v14 = vpop.f32.mrf.mxu1 }
 0x27c   :  { %v1927_v5 = vmax.f32 %v1274_v34, 0.0  ;;  %v1259_v29 = vadd.f32 %v4619_v47, %v5089_v38  ;;  %v137_v38 = vld [vmem:[%s7692_s0 + $0x290] sm:$0xff] }
 0x27d   :  { %2249 = vmatpush.msra.mxu1 %v1933_v45  ;;  %v5314_v45 = vpop.f32.mrf.mxu3 }
 0x27e   :  { %7737 = vst [vmem:[#allocation26_spill] sm:$0xff] %v5314_v45 }
 0x27f   :  { %2250 = vmatpush.msra.mxu1 %v1932_v12 }
 0x280   :  { %v5296_v44 = vpop.f32.mrf.mxu0 }
 0x281   :  { %2251 = vmatpush.msra.mxu1 %v1931_v57  ;;  %v1926_v57 = vmax.f32 %v1271_v39, 0.0  ;;  %v1923_v39 = vmax.f32 %v1262_v2, 0.0 }
 0x282   :  { %4181 = vmatmul.msk.f32.gmra.mxu1 %vm312_vm1, %v205_v54 }
 0x283   :  { %4111 = vmatmul.msk.f32.gmra.mxu0 %vm312_vm1, %v135_v40  ;;  %2252 = vmatpush.msra.mxu1 %v1930_v33  ;;  %v1925_v40 = vmax.f32 %v1268_v48, 0.0  ;;  %v1924_v33 = vmax.f32 %v1265_v20, 0.0  ;;  %v1922_v48 = vmax.f32 %v1259_v29, 0.0  ;;  %v1920_v20 = vmax.f32 %v1253_v17, 0.0  ;;  %v231_v17 = vld [vmem:[%s7692_s0 + $0x580] sm:$0xff] }
 0x284   :  { %v1918_v29 = vmax.f32 %v1247_v53, 0.0  ;;  %4207 = vmatmul.msk.f32.vlgmr.msra.gmra.mxu2 %vm312_vm1, %v231_v17  ;;  %v233_v17 = vld [vmem:[%s7692_s0 + $0x590] sm:$0xff] }
 0x285   :  { %2253 = vmatpush.msra.mxu1 %v1929_v35  ;;  %v5340_v34 = vpop.f32.mrf.mxu3  ;;  %v1256_v35 = vadd.f32 %v5349_v43, %v5073_v22  ;;  %v1250_v22 = vadd.f32 %v5349_v43, %v5027_v8 }
 0x286   :  { %7738 = vst [vmem:[#allocation27_spill] sm:$0xff] %v5340_v34  ;;  %v213_v34 = vld [vmem:[%s7692_s0 + $0x4f0] sm:$0xff] }
 0x287   :  { %2254 = vmatpush.msra.mxu1 %v1928_v42  ;;  %v286_v42 = vld [vmem:[%s7692_s0 + $0x738] sm:$0xff]  ;;  %v1919_v8 = vmax.f32 %v1250_v22, 0.0 }
 0x288   :  { %v5322_v12 = vpop.f32.mrf.mxu0  ;;  %4262 = vmatmul.msk.f32.gmra.mxu3 %vm312_vm1, %v286_v42  ;;  %v288_v42 = vld [vmem:[%s7692_s0 + $0x748] sm:$0xff] }
 0x289   :  { %2255 = vmatpush.msra.mxu1 %v1927_v5  ;;  %v1921_v5 = vmax.f32 %v1256_v35, 0.0  ;;  %v207_v35 = vld [vmem:[%s7692_s0 + $0x4c0] sm:$0xff] }
 0x28a   :  { %4182 = vmatmul.msk.f32.gmra.mxu1 %vm312_vm1, %v206_v24  ;;  %v289_v24 = vld [vmem:[%s7692_s0 + $0x750] sm:$0xff] }
 0x28b   :  { %4112 = vmatmul.msk.f32.gmra.mxu0 %vm312_vm1, %v136_v11  ;;  %2256 = vmatpush.msra.mxu1 %v1926_v57  ;;  %v5367_v11 = vpop.f32.mrf.mxu1 }
 0x28d   :  { %2257 = vmatpush.msra.mxu1 %v1925_v40  ;;  %v5371_v57 = vpop.f32.mrf.mxu3  ;;  %v138_v40 = vld [vmem:[%s7692_s0 + $0x298] sm:$0xff] }
 0x28e   :  { %7739 = vst [vmem:[#allocation28_spill] sm:$0xff] %v5371_v57 }
 0x28f   :  { %2258 = vmatpush.msra.mxu1 %v1924_v33 }
 0x290   :  { %v5353_v47 = vpop.f32.mrf.mxu0  ;;  %4263 = vmatmul.msk.f32.gmra.mxu3 %vm312_vm1, %v287_v50 }
 0x291   :  { %2259 = vmatpush.msra.mxu1 %v1923_v39 }
 0x292   :  { %4183 = vmatmul.msk.f32.gmra.mxu1 %vm312_vm1, %v207_v35 }
 0x293   :  { %4113 = vmatmul.msk.f32.gmra.mxu0 %vm312_vm1, %v137_v38  ;;  %2260 = vmatpush.msra.mxu1 %v1922_v48  ;;  %v5387_v33 = vpop.f32.mrf.mxu1  ;;  %v139_v38 = vld [vmem:[%s7692_s0 + $0x2a0] sm:$0xff] }
 0x295   :  { %2261 = vmatpush.msra.mxu1 %v1921_v5  ;;  %v5389_v54 = vpop.f32.mrf.mxu3  ;;  %v208_v5 = vld [vmem:[%s7692_s0 + $0x4c8] sm:$0xff] }
 0x296   :  { %7740 = vst [vmem:[#allocation29_spill] sm:$0xff] %v5389_v54 }
 0x297   :  { %2262 = vmatpush.msra.mxu1 %v1920_v20  ;;  %v140_v20 = vld [vmem:[%s7692_s0 + $0x2a8] sm:$0xff] }
 0x298   :  { %v5377_v2 = vpop.f32.mrf.mxu0  ;;  %4264 = vmatmul.msk.f32.gmra.mxu3 %vm312_vm1, %v288_v42  ;;  %v290_v42 = vld [vmem:[%s7692_s0 + $0x758] sm:$0xff] }
 0x299   :  { %2263 = vmatpush.msra.mxu1 %v1919_v8  ;;  %v232_v8 = vld [vmem:[%s7692_s0 + $0x588] sm:$0xff] }
 0x29a   :  { %4184 = vmatmul.msk.f32.gmra.mxu1 %vm312_vm1, %v208_v5  ;;  %4208 = vmatmul.msk.f32.gmra.mxu2 %vm312_vm1, %v232_v8 }
 0x29b   :  { %4114 = vmatmul.msk.f32.gmra.mxu0 %vm312_vm1, %v138_v40  ;;  %2264 = vmatpush.msra.mxu1 %v1918_v29  ;;  %v5408_v48 = vpop.f32.mrf.mxu1  ;;  %v209_v29 = vld [vmem:[%s7692_s0 + $0x4d0] sm:$0xff] }
 0x29d   :  { %v5411_v22 = vpop.f32.mrf.mxu3 }
 0x29e   :  { %7741 = vst [vmem:[#allocation30_spill] sm:$0xff] %v5411_v22  ;;  %v214_v22 = vld [vmem:[%s7692_s0 + $0x4f8] sm:$0xff] }
 0x2a0   :  { %v5395_v39 = vpop.f32.mrf.mxu0  ;;  %4265 = vmatmul.msk.f32.gmra.mxu3 %vm312_vm1, %v289_v24  ;;  %v210_v24 = vld [vmem:[%s7692_s0 + $0x4d8] sm:$0xff] }
 0x2a2   :  { %4185 = vmatmul.msk.f32.gmra.mxu1 %vm312_vm1, %v209_v29  ;;  %4209 = vmatmul.msk.f32.gmra.mxu2 %vm312_vm1, %v233_v17  ;;  %v142_v29 = vld [vmem:[%s7692_s0 + $0x2b8] sm:$0xff] }
 0x2a3   :  { %4115 = vmatmul.msk.f32.gmra.mxu0 %vm312_vm1, %v139_v38  ;;  %v5430_v40 = vpop.f32.mrf.mxu1  ;;  %v141_v38 = vld [vmem:[%s7692_s0 + $0x2b0] sm:$0xff] }
 0x2a5   :  { %v5433_v50 = vpop.f32.mrf.mxu3 }
 0x2a6   :  { %7742 = vst [vmem:[#allocation31_spill] sm:$0xff] %v5433_v50 }
 0x2a8   :  { %v5417_v53 = vpop.f32.mrf.mxu0  ;;  %4266 = vmatmul.msk.f32.gmra.mxu3 %vm312_vm1, %v290_v42  ;;  %v234_v42 = vld [vmem:[%s7692_s0 + $0x598] sm:$0xff] }
 0x2aa   :  { %4186 = vmatmul.msk.f32.gmra.mxu1 %vm312_vm1, %v210_v24  ;;  %4210 = vmatmul.msk.f32.gmra.mxu2 %vm312_vm1, %v234_v42  ;;  %v235_v42 = vld [vmem:[%s7692_s0 + $0x5a0] sm:$0xff] }
 0x2ab   :  { %4116 = vmatmul.msk.f32.gmra.mxu0 %vm312_vm1, %v140_v20  ;;  %v5452_v5 = vpop.f32.mrf.mxu1 }
 0x2ad   :  { %v5455_v20 = vpop.f32.mrf.mxu3 }
 0x2ae   :  { %7743 = vst [vmem:[#allocation32_spill] sm:$0xff] %v5455_v20 }
 0x2b0   :  { %v5439_v35 = vpop.f32.mrf.mxu0 }
 0x2b2   :  { %4187 = vmatmul.msk.f32.gmra.mxu1 %vm312_vm1, %v211_v37  ;;  %4211 = vmatmul.msk.f32.gmra.mxu2 %vm312_vm1, %v235_v42  ;;  %v236_v42 = vld [vmem:[%s7692_s0 + $0x5a8] sm:$0xff] }
 0x2b3   :  { %4117 = vmatmul.msk.f32.gmra.mxu0 %vm312_vm1, %v141_v38  ;;  %v291_v38 = vld [vmem:[%s7692_s0 + $0x760] sm:$0xff]  ;;  %v5474_v17 = vpop.f32.mrf.mxu1 }
 0x2b4   :  { %4267 = vmatmul.msk.f32.gmra.mxu3 %vm312_vm1, %v291_v38  ;;  %v292_v38 = vld [vmem:[%s7692_s0 + $0x768] sm:$0xff] }
 0x2b5   :  { %v5477_v24 = vpop.f32.mrf.mxu3 }
 0x2b6   :  { %7744 = vst [vmem:[#allocation33_spill] sm:$0xff] %v5477_v24  ;;  %v215_v24 = vld [vmem:[%s7692_s0 + $0x500] sm:$0xff] }
 0x2b8   :  { %v5461_v8 = vpop.f32.mrf.mxu0 }
 0x2ba   :  { %4188 = vmatmul.msk.f32.gmra.mxu1 %vm312_vm1, %v212_v27  ;;  %4212 = vmatmul.msk.f32.gmra.mxu2 %vm312_vm1, %v236_v42  ;;  %v237_v42 = vld [vmem:[%s7692_s0 + $0x5b0] sm:$0xff] }
 0x2bb   :  { %4118 = vmatmul.msk.f32.gmra.mxu0 %vm312_vm1, %v142_v29  ;;  %v143_v29 = vld [vmem:[%s7692_s0 + $0x2c0] sm:$0xff]  ;;  %v5496_v59 = vpop.f32.mrf.mxu1 }
 0x2bc   :  { %4268 = vmatmul.msk.f32.gmra.mxu3 %vm312_vm1, %v292_v38  ;;  %v293_v38 = vld [vmem:[%s7692_s0 + $0x770] sm:$0xff] }
 0x2bd   :  { %v5499_v37 = vpop.f32.mrf.mxu3 }
 0x2be   :  { %7745 = vst [vmem:[#allocation34_spill] sm:$0xff] %v5499_v37 }
 0x2c0   :  { %v5483_v52 = vpop.f32.mrf.mxu0 }
 0x2c2   :  { %4189 = vmatmul.msk.f32.gmra.mxu1 %vm312_vm1, %v213_v34  ;;  %4213 = vmatmul.msk.f32.gmra.mxu2 %vm312_vm1, %v237_v42  ;;  %v238_v42 = vld [vmem:[%s7692_s0 + $0x5b8] sm:$0xff] }
 0x2c3   :  { %4119 = vmatmul.msk.f32.gmra.mxu0 %vm312_vm1, %v143_v29  ;;  %v144_v29 = vld [vmem:[%s7692_s0 + $0x2c8] sm:$0xff]  ;;  %v5518_v45 = vpop.f32.mrf.mxu1 }
 0x2c4   :  { %4269 = vmatmul.msk.f32.gmra.mxu3 %vm312_vm1, %v293_v38  ;;  %v294_v38 = vld [vmem:[%s7692_s0 + $0x778] sm:$0xff] }
 0x2c5   :  { %v5521_v27 = vpop.f32.mrf.mxu3 }
 0x2c6   :  { %7746 = vst [vmem:[#allocation35_spill] sm:$0xff] %v5521_v27 }
 0x2c8   :  { %v5505_v1 = vpop.f32.mrf.mxu0 }
 0x2ca   :  { %4190 = vmatmul.msk.f32.gmra.mxu1 %vm312_vm1, %v214_v22  ;;  %4214 = vmatmul.msk.f32.gmra.mxu2 %vm312_vm1, %v238_v42  ;;  %v239_v42 = vld [vmem:[%s7692_s0 + $0x5c0] sm:$0xff] }
 0x2cb   :  { %4120 = vmatmul.msk.f32.gmra.mxu0 %vm312_vm1, %v144_v29  ;;  %v145_v29 = vld [vmem:[%s7692_s0 + $0x2d0] sm:$0xff]  ;;  %v5540_v54 = vpop.f32.mrf.mxu1 }
 0x2cc   :  { %4270 = vmatmul.msk.f32.gmra.mxu3 %vm312_vm1, %v294_v38  ;;  %v295_v38 = vld [vmem:[%s7692_s0 + $0x780] sm:$0xff] }
 0x2cd   :  { %v5543_v34 = vpop.f32.mrf.mxu3 }
 0x2ce   :  { %7747 = vst [vmem:[#allocation36_spill] sm:$0xff] %v5543_v34  ;;  %v216_v34 = vld [vmem:[%s7692_s0 + $0x508] sm:$0xff] }
 0x2d0   :  { %v5527_v57 = vpop.f32.mrf.mxu0 }
 0x2d2   :  { %4191 = vmatmul.msk.f32.gmra.mxu1 %vm312_vm1, %v215_v24  ;;  %4215 = vmatmul.msk.f32.gmra.mxu2 %vm312_vm1, %v239_v42  ;;  %v240_v42 = vld [vmem:[%s7692_s0 + $0x5c8] sm:$0xff] }
 0x2d3   :  { %4121 = vmatmul.msk.f32.gmra.mxu0 %vm312_vm1, %v145_v29  ;;  %v146_v29 = vld [vmem:[%s7692_s0 + $0x2d8] sm:$0xff]  ;;  %v5560_v20 = vpop.f32.mrf.mxu1 }
 0x2d4   :  { %4271 = vmatmul.msk.f32.gmra.mxu3 %vm312_vm1, %v295_v38  ;;  %7748 = vst [vmem:[#allocation37_spill] sm:$0xff] %v5560_v20  ;;  %v296_v38 = vld [vmem:[%s7692_s0 + $0x788] sm:$0xff] }
 0x2d5   :  { %v5563_v22 = vpop.f32.mrf.mxu3 }
 0x2d6   :  { %7749 = vst [vmem:[#allocation38_spill] sm:$0xff] %v5563_v22 }
 0x2d8   :  { %v1327_v50 = vpop.f32.mrf.mxu0 }
 0x2da   :  { %4192 = vmatmul.msk.f32.gmra.mxu1 %vm312_vm1, %v216_v34  ;;  %4216 = vmatmul.msk.f32.gmra.mxu2 %vm312_vm1, %v240_v42  ;;  %v241_v42 = vld [vmem:[%s7692_s0 + $0x5d0] sm:$0xff] }
 0x2db   :  { %4122 = vmatmul.msk.f32.gmra.mxu0 %vm312_vm1, %v146_v29  ;;  %v147_v29 = vld [vmem:[%s7692_s0 + $0x2e0] sm:$0xff]  ;;  %v5580_v27 = vpop.f32.mrf.mxu1 }
 0x2dc   :  { %4272 = vmatmul.msk.f32.gmra.mxu3 %vm312_vm1, %v296_v38  ;;  %7750 = vst [vmem:[#allocation39_spill] sm:$0xff] %v5580_v27  ;;  %v297_v38 = vld [vmem:[%s7692_s0 + $0x790] sm:$0xff] }
 0x2dd   :  { %v5583_v24 = vpop.f32.mrf.mxu3 }
 0x2de   :  { %7751 = vst [vmem:[#allocation40_spill] sm:$0xff] %v5583_v24  ;;  %v166_v24 = vld [vmem:[%s7692_s0 + $0x378] sm:$0xff] }
 0x2e0   :  { %v1330_v37 = vpop.f32.mrf.mxu0 }
 0x2e2   :  { %4193 = vmatmul.msk.f32.gmra.mxu1 %vm312_vm1, %v217_v31  ;;  %4217 = vmatmul.msk.f32.gmra.mxu2 %vm312_vm1, %v241_v42 }
 0x2e3   :  { %4123 = vmatmul.msk.f32.gmra.mxu0 %vm312_vm1, %v147_v29  ;;  %v148_v29 = vld [vmem:[%s7692_s0 + $0x2e8] sm:$0xff]  ;;  %v5600_v19 = vpop.f32.mrf.mxu1 }
 0x2e4   :  { %4273 = vmatmul.msk.f32.gmra.mxu3 %vm312_vm1, %v297_v38  ;;  %7752 = vst [vmem:[#allocation41_spill] sm:$0xff] %v5600_v19  ;;  %v298_v38 = vld [vmem:[%s7692_s0 + $0x798] sm:$0xff] }
 0x2e5   :  { %v5603_v34 = vpop.f32.mrf.mxu3 }
 0x2e6   :  { %7753 = vst [vmem:[#allocation42_spill] sm:$0xff] %v5603_v34  ;;  %v5970_v34 = vld [vmem:[%s7695_s3 + $0x40] sm:$0xff] }
 0x2e8   :  { %v1333_v41 = vpop.f32.mrf.mxu0 }
 0x2e9   :  { %v1334_v36 = vadd.f32 %v5349_v43, %v1333_v41  ;;  %v219_v41 = vld [vmem:[%s7692_s0 + $0x520] sm:$0xff] }
 0x2ea   :  { %4194 = vmatmul.msk.f32.gmra.mxu1 %vm312_vm1, %v218_v16  ;;  %v5643_v16 = vld [vmem:[%s7695_s3 + $0x8] sm:$0xff] }
 0x2eb   :  { %4124 = vmatmul.msk.f32.gmra.mxu0 %vm312_vm1, %v148_v29  ;;  %v149_v29 = vld [vmem:[%s7692_s0 + $0x2f0] sm:$0xff]  ;;  %v5620_v63 = vpop.f32.mrf.mxu1  ;;  %2183 = vmatmul.f32.vlgmr.msrb.gmra.mxu2 %v5643_v16 }
 0x2ec   :  { %4274 = vmatmul.msk.f32.gmra.mxu3 %vm312_vm1, %v298_v38  ;;  %7754 = vst [vmem:[#allocation43_spill] sm:$0xff] %v5620_v63  ;;  %v299_v38 = vld [vmem:[%s7692_s0 + $0x7a0] sm:$0xff]  ;;  %v161_v63 = vld [vmem:[%s7692_s0 + $0x350] sm:$0xff] }
 0x2ed   :  { %v5623_v31 = vpop.f32.mrf.mxu3 }
 0x2ee   :  { %7755 = vst [vmem:[#allocation44_spill] sm:$0xff] %v5623_v31 }
 0x2f0   :  { %v1336_v25 = vpop.f32.mrf.mxu0 }
 0x2f1   :  { %v1337_v32 = vadd.f32 %v5349_v43, %v1336_v25  ;;  %v1331_v25 = vadd.f32 %v5349_v43, %v1330_v37  ;;  %v151_v37 = vld [vmem:[%s7692_s0 + $0x300] sm:$0xff] }
 0x2f2   :  { %4195 = vmatmul.msk.f32.gmra.mxu1 %vm312_vm1, %v219_v41  ;;  %v1319_v41 = vadd.f32 %v5349_v43, %v5483_v52  ;;  %v152_v52 = vld [vmem:[%s7692_s0 + $0x308] sm:$0xff] }
 0x2f3   :  { %4125 = vmatmul.msk.f32.gmra.mxu0 %vm312_vm1, %v149_v29  ;;  %v150_v29 = vld [vmem:[%s7692_s0 + $0x2f8] sm:$0xff]  ;;  %v5645_v49 = vpop.f32.mrf.mxu1  ;;  %v1948_v61 = vmax.f32 %v1337_v32, 0.0  ;;  %v300_v32 = vld [vmem:[%s7692_s0 + $0x7a8] sm:$0xff]  ;;  %v1946_v9 = vmax.f32 %v1331_v25, 0.0 }
 0x2f4   :  { %4275 = vmatmul.msk.f32.gmra.mxu3 %vm312_vm1, %v299_v38  ;;  %7756 = vst [vmem:[#allocation45_spill] sm:$0xff] %v5645_v49  ;;  %v1947_v38 = vmax.f32 %v1334_v36, 0.0  ;;  %v1322_v36 = vadd.f32 %v5349_v43, %v5505_v1  ;;  %v1316_v1 = vadd.f32 %v5349_v43, %v5461_v8 }
 0x2f6   :  { %v1943_v25 = vmax.f32 %v1322_v36, 0.0  ;;  %v1941_v8 = vmax.f32 %v1316_v1, 0.0  ;;  %v302_v1 = vld [vmem:[%s7692_s0 + $0x7b8] sm:$0xff] }
 0x2f8   :  { %v1339_v15 = vpop.f32.mrf.mxu0 }
 0x2f9   :  { %v1340_v42 = vadd.f32 %v5349_v43, %v1339_v15  ;;  %v5649_v15 = vpop.f32.mrf.mxu3 }
 0x2fa   :  { %7757 = vst [vmem:[#allocation46_spill] sm:$0xff] %v5649_v15 }
 0x2fb   :  { %v1949_v4 = vmax.f32 %v1340_v42, 0.0  ;;  %4126 = vmatmul.msk.f32.gmra.mxu0 %vm312_vm1, %v150_v29  ;;  %v1328_v29 = vadd.f32 %v5349_v43, %v1327_v50  ;;  %v5670_v50 = vpop.f32.mrf.mxu1 }
 0x2fc   :  { %4276 = vmatmul.msk.f32.gmra.mxu3 %vm312_vm1, %v300_v32  ;;  %7758 = vst [vmem:[#allocation47_spill] sm:$0xff] %v5670_v50 }
 0x2fd   :  { %2290 = vmatpush.msra.mxu2 %v1949_v4  ;;  %v1325_v4 = vadd.f32 %v5349_v43, %v5527_v57  ;;  %v220_v57 = vld [vmem:[%s7692_s0 + $0x528] sm:$0xff] }
 0x2fe   :  { %4196 = vmatmul.msk.f32.gmra.mxu1 %vm312_vm1, %v220_v57 }
 0x2ff   :  { %2291 = vmatpush.msra.mxu2 %v1948_v61  ;;  %v1945_v61 = vmax.f32 %v1328_v29, 0.0  ;;  %v1944_v18 = vmax.f32 %v1325_v4, 0.0  ;;  %v301_v29 = vld [vmem:[%s7692_s0 + $0x7b0] sm:$0xff]  ;;  %v1307_v4 = vadd.f32 %v5349_v43, %v5395_v39 }
 0x300   :  { %v5656_v42 = vpop.f32.mrf.mxu0  ;;  %v153_v39 = vld [vmem:[%s7692_s0 + $0x310] sm:$0xff] }
 0x301   :  { %2292 = vmatpush.msra.mxu2 %v1947_v38  ;;  %v5674_v58 = vpop.f32.mrf.mxu3  ;;  %v1313_v38 = vadd.f32 %v5349_v43, %v5439_v35  ;;  %v221_v35 = vld [vmem:[%s7692_s0 + $0x530] sm:$0xff] }
 0x302   :  { %7759 = vst [vmem:[#allocation48_spill] sm:$0xff] %v5674_v58 }
 0x303   :  { %4127 = vmatmul.msk.f32.gmra.mxu0 %vm312_vm1, %v151_v37  ;;  %2293 = vmatpush.msra.mxu2 %v1946_v9  ;;  %v1942_v37 = vmax.f32 %v1319_v41, 0.0  ;;  %v5696_v32 = vpop.f32.mrf.mxu1  ;;  %v1940_v36 = vmax.f32 %v1313_v38, 0.0 }
 0x304   :  { %4277 = vmatmul.msk.f32.gmra.mxu3 %vm312_vm1, %v301_v29  ;;  %7760 = vst [vmem:[#allocation49_spill] sm:$0xff] %v5696_v32  ;;  %v162_v32 = vld [vmem:[%s7692_s0 + $0x358] sm:$0xff] }
 0x305   :  { %2294 = vmatpush.msra.mxu2 %v1945_v61 }
 0x306   :  { %4197 = vmatmul.msk.f32.gmra.mxu1 %vm312_vm1, %v221_v35 }
 0x307   :  { %2295 = vmatpush.msra.mxu2 %v1944_v18  ;;  %v1310_v18 = vadd.f32 %v5349_v43, %v5417_v53  ;;  %v1304_v53 = vadd.f32 %v5349_v43, %v5377_v2  ;;  %v1298_v2 = vadd.f32 %v5349_v43, %v5322_v12  ;;  %v1484_v12 = vadd.f32 %v5349_v43, %v5203_v30 }
 0x308   :  { %v5682_v9 = vpop.f32.mrf.mxu0  ;;  %v1478_v30 = vadd.f32 %v5349_v43, %v5167_v13  ;;  %v1472_v13 = vadd.f32 %v5349_v43, %v5131_v60 }
 0x309   :  { %2296 = vmatpush.msra.mxu2 %v1943_v25  ;;  %v5700_v61 = vpop.f32.mrf.mxu3  ;;  %v1939_v41 = vmax.f32 %v1310_v18, 0.0  ;;  %v1301_v25 = vadd.f32 %v5349_v43, %v5353_v47  ;;  %v1937_v29 = vmax.f32 %v1304_v53, 0.0  ;;  %v222_v47 = vld [vmem:[%s7692_s0 + $0x538] sm:$0xff]  ;;  %v303_v53 = vld [vmem:[%s7692_s0 + $0x7c0] sm:$0xff] }
 0x30a   :  { %7761 = vst [vmem:[#allocation50_spill] sm:$0xff] %v5700_v61 }
 0x30b   :  { %4128 = vmatmul.msk.f32.gmra.mxu0 %vm312_vm1, %v152_v52  ;;  %2297 = vmatpush.msra.mxu2 %v1942_v37  ;;  %v1938_v52 = vmax.f32 %v1307_v4, 0.0  ;;  %v5722_v38 = vpop.f32.mrf.mxu1  ;;  %v1295_v37 = vadd.f32 %v5349_v43, %v5296_v44  ;;  %v1936_v18 = vmax.f32 %v1301_v25, 0.0  ;;  %v1935_v4 = vmax.f32 %v1298_v2, 0.0  ;;  %v154_v44 = vld [vmem:[%s7692_s0 + $0x318] sm:$0xff]  ;;  %v223_v2 = vld [vmem:[%s7692_s0 + $0x540] sm:$0xff] }
 0x30c   :  { %4278 = vmatmul.msk.f32.gmra.mxu3 %vm312_vm1, %v302_v1  ;;  %7762 = vst [vmem:[#allocation51_spill] sm:$0xff] %v5722_v38  ;;  %v1475_v1 = vadd.f32 %v5349_v43, %v5149_v6  ;;  %v155_v6 = vld [vmem:[%s7692_s0 + $0x320] sm:$0xff] }
 0x30d   :  { %2298 = vmatpush.msra.mxu2 %v1941_v8 }
 0x30e   :  { %4198 = vmatmul.msk.f32.gmra.mxu1 %vm312_vm1, %v222_v47  ;;  %v304_v47 = vld [vmem:[%s7692_s0 + $0x7c8] sm:$0xff] }
 0x30f   :  { %2299 = vmatpush.msra.mxu2 %v1940_v36  ;;  %v1481_v36 = vadd.f32 %v5349_v43, %v5185_v21 }
 0x310   :  { %v5708_v57 = vpop.f32.mrf.mxu0 }
 0x311   :  { %2300 = vmatpush.msra.mxu2 %v1939_v41  ;;  %v5726_v8 = vpop.f32.mrf.mxu3  ;;  %v1934_v41 = vmax.f32 %v1295_v37, 0.0  ;;  %v1996_v25 = vmax.f32 %v1481_v36, 0.0  ;;  %v1994_v37 = vmax.f32 %v1475_v1, 0.0  ;;  %v224_v36 = vld [vmem:[%s7692_s0 + $0x548] sm:$0xff]  ;;  %v225_v1 = vld [vmem:[%s7692_s0 + $0x550] sm:$0xff] }
 0x312   :  { %7763 = vst [vmem:[#allocation52_spill] sm:$0xff] %v5726_v8 }
 0x313   :  { %4129 = vmatmul.msk.f32.gmra.mxu0 %vm312_vm1, %v153_v39  ;;  %2301 = vmatpush.msra.mxu2 %v1938_v52  ;;  %v1997_v39 = vmax.f32 %v1484_v12, 0.0  ;;  %v5748_v21 = vpop.f32.mrf.mxu1  ;;  %v1993_v12 = vmax.f32 %v1472_v13, 0.0  ;;  %v306_v13 = vld [vmem:[%s7692_s0 + $0x7d8] sm:$0xff] }
 0x314   :  { %4279 = vmatmul.msk.f32.gmra.mxu3 %vm312_vm1, %v303_v53  ;;  %7764 = vst [vmem:[#allocation53_spill] sm:$0xff] %v5748_v21  ;;  %v156_v53 = vld [vmem:[%s7692_s0 + $0x328] sm:$0xff]  ;;  %v163_v21 = vld [vmem:[%s7692_s0 + $0x360] sm:$0xff] }
 0x315   :  { %2302 = vmatpush.msra.mxu2 %v1937_v29  ;;  %v1995_v29 = vmax.f32 %v1478_v30, 0.0 }
 0x316   :  { %4199 = vmatmul.msk.f32.gmra.mxu1 %vm312_vm1, %v223_v2  ;;  %v157_v2 = vld [vmem:[%s7692_s0 + $0x330] sm:$0xff] }
 0x317   :  { %2303 = vmatpush.msra.mxu2 %v1936_v18 }
 0x318   :  { %v5736_v35 = vpop.f32.mrf.mxu0 }
 0x319   :  { %2304 = vmatpush.msra.mxu2 %v1935_v4  ;;  %v5752_v52 = vpop.f32.mrf.mxu3 }
 0x31a   :  { %7765 = vst [vmem:[#allocation54_spill] sm:$0xff] %v5752_v52 }
 0x31b   :  { %4130 = vmatmul.msk.f32.gmra.mxu0 %vm312_vm1, %v154_v44  ;;  %2305 = vmatpush.msra.mxu2 %v1934_v41  ;;  %v5770_v60 = vpop.f32.mrf.mxu1  ;;  %v305_v41 = vld [vmem:[%s7692_s0 + $0x7d0] sm:$0xff] }
 0x31c   :  { %4280 = vmatmul.msk.f32.gmra.mxu3 %vm312_vm1, %v304_v47  ;;  %7766 = vst [vmem:[#allocation55_spill] sm:$0xff] %v5770_v60  ;;  %v5907_v60 = vld [vmem:[%s7695_s3 + $0x10] sm:$0xff] }
 0x31d   :  { %2413 = vmatpush.msrb.mxu2 %v1997_v39 }
 0x31e   :  { %4200 = vmatmul.msk.f32.gmra.mxu1 %vm312_vm1, %v224_v36  ;;  %v307_v36 = vld [vmem:[%s7692_s0 + $0x7e0] sm:$0xff] }
 0x31f   :  { %2414 = vmatpush.msrb.mxu2 %v1996_v25 }
 0x320   :  { %v5760_v18 = vpop.f32.mrf.mxu0 }
 0x321   :  { %2415 = vmatpush.msrb.mxu2 %v1995_v29  ;;  %v5772_v4 = vpop.f32.mrf.mxu3 }
 0x322   :  { %7767 = vst [vmem:[#allocation56_spill] sm:$0xff] %v5772_v4 }
 0x323   :  { %2416 = vmatpush.msrb.mxu2 %v1994_v37  ;;  %4131 = vmatmul.msk.f32.gmra.mxu0 %vm312_vm1, %v155_v6  ;;  %v5788_v30 = vpop.f32.mrf.mxu1  ;;  %v226_v6 = vld [vmem:[%s7692_s0 + $0x558] sm:$0xff] }
 0x324   :  { %4281 = vmatmul.msk.f32.gmra.mxu3 %vm312_vm1, %v305_v41  ;;  %7768 = vst [vmem:[#allocation57_spill] sm:$0xff] %v5788_v30 }
 0x325   :  { %2417 = vmatpush.msrb.mxu2 %v1993_v12  ;;  %v158_v12 = vld [vmem:[%s7692_s0 + $0x338] sm:$0xff] }
 0x326   :  { %4201 = vmatmul.msk.f32.gmra.mxu1 %vm312_vm1, %v225_v1  ;;  %v227_v1 = vld [vmem:[%s7692_s0 + $0x560] sm:$0xff] }
 0x328   :  { %v5778_v44 = vpop.f32.mrf.mxu0 }
 0x329   :  { %v5790_v39 = vpop.f32.mrf.mxu3 }
 0x32b   :  { %4132 = vmatmul.msk.f32.gmra.mxu0 %vm312_vm1, %v156_v53  ;;  %v5806_v29 = vpop.f32.mrf.mxu1 }
 0x32c   :  { %4282 = vmatmul.msk.f32.gmra.mxu3 %vm312_vm1, %v306_v13  ;;  %7769 = vst [vmem:[#allocation58_spill] sm:$0xff] %v5806_v29  ;;  %v159_v13 = vld [vmem:[%s7692_s0 + $0x340] sm:$0xff]  ;;  %v164_v29 = vld [vmem:[%s7692_s0 + $0x368] sm:$0xff] }
 0x32e   :  { %4202 = vmatmul.msk.f32.gmra.mxu1 %vm312_vm1, %v226_v6  ;;  %v308_v6 = vld [vmem:[%s7692_s0 + $0x7e8] sm:$0xff] }
 0x330   :  { %v5796_v25 = vpop.f32.mrf.mxu0 }
 0x331   :  { %v5808_v37 = vpop.f32.mrf.mxu3 }
 0x333   :  { %4133 = vmatmul.msk.f32.gmra.mxu0 %vm312_vm1, %v157_v2  ;;  %v5824_v53 = vpop.f32.mrf.mxu1 }
 0x334   :  { %4283 = vmatmul.msk.f32.gmra.mxu3 %vm312_vm1, %v307_v36  ;;  %7770 = vst [vmem:[#allocation59_spill] sm:$0xff] %v5824_v53  ;;  %v5928_v53 = vld [vmem:[%s7695_s3 + $0x20] sm:$0xff] }
 0x336   :  { %4203 = vmatmul.msk.f32.gmra.mxu1 %vm312_vm1, %v227_v1  ;;  %v228_v1 = vld [vmem:[%s7692_s0 + $0x568] sm:$0xff] }
 0x338   :  { %v5814_v47 = vpop.f32.mrf.mxu0 }
 0x339   :  { %v5826_v41 = vpop.f32.mrf.mxu3 }
 0x33b   :  { %4134 = vmatmul.msk.f32.gmra.mxu0 %vm312_vm1, %v158_v12  ;;  %v5842_v12 = vpop.f32.mrf.mxu1 }
 0x33c   :  { %4284 = vmatmul.msk.f32.gmra.mxu3 %vm312_vm1, %v308_v6  ;;  %7771 = vst [vmem:[#allocation60_spill] sm:$0xff] %v5842_v12 }
 0x33e   :  { %4204 = vmatmul.msk.f32.gmra.mxu1 %vm312_vm1, %v228_v1  ;;  %v229_v1 = vld [vmem:[%s7692_s0 + $0x570] sm:$0xff] }
 0x340   :  { %v5832_v2 = vpop.f32.mrf.mxu0 }
 0x341   :  { %v5844_v36 = vpop.f32.mrf.mxu3 }
 0x343   :  { %4135 = vmatmul.msk.f32.gmra.mxu0 %vm312_vm1, %v159_v13  ;;  %v309_v13 = vld [vmem:[%s7692_s0 + $0x7f0] sm:$0xff]  ;;  %v5860_v6 = vpop.f32.mrf.mxu1 }
 0x344   :  { %4285 = vmatmul.msk.f32.gmra.mxu3 %vm312_vm1, %v309_v13  ;;  %7772 = vst [vmem:[#allocation61_spill] sm:$0xff] %v5860_v6  ;;  %v165_v6 = vld [vmem:[%s7692_s0 + $0x370] sm:$0xff] }
 0x346   :  { %4205 = vmatmul.msk.f32.gmra.mxu1 %vm312_vm1, %v229_v1  ;;  %v230_v1 = vld [vmem:[%s7692_s0 + $0x578] sm:$0xff] }
 0x348   :  { %v5850_v20 = vpop.f32.mrf.mxu0 }
 0x349   :  { %v5862_v27 = vpop.f32.mrf.mxu3 }
 0x34b   :  { %4136 = vmatmul.msk.f32.gmra.mxu0 %vm312_vm1, %v160_v28  ;;  %v310_v28 = vld [vmem:[%s7692_s0 + $0x7f8] sm:$0xff]  ;;  %v5878_v13 = vpop.f32.mrf.mxu1 }
 0x34c   :  { %4286 = vmatmul.msk.f32.gmra.mxu3 %vm312_vm1, %v310_v28  ;;  %7773 = vst [vmem:[#allocation62_spill] sm:$0xff] %v5878_v13  ;;  %v5892_v28 = vld [vmem:[%s7695_s3] sm:$0xff]  ;;  %v5949_v13 = vld [vmem:[%s7695_s3 + $0x30] sm:$0xff] }
 0x34e   :  { %4206 = vmatmul.msk.f32.gmra.mxu1 %vm312_vm1, %v230_v1 }
 0x350   :  { %v5868_v19 = vpop.f32.mrf.mxu0 }
 0x351   :  { %v5880_v49 = vpop.f32.mrf.mxu3 }
 0x353   :  { %4137 = vmatmul.msk.f32.gmra.mxu0 %vm312_vm1, %v161_v63  ;;  %v5896_v63 = vpop.f32.mrf.mxu1 }
 0x354   :  { %2224 = vmatmul.f32.vlgmr.msrb.gmra.mxu3 %v5892_v28  ;;  %7774 = vst [vmem:[#allocation63_spill] sm:$0xff] %v5896_v63 }
 0x356   :  { %2142 = vmatmul.f32.vlgmr.msrb.gmra.mxu1 %v5892_v28 }
 0x358   :  { %v1375_v50 = vpop.f32.mrf.mxu0 }
 0x359   :  { %v5898_v38 = vpop.f32.mrf.mxu3 }
 0x35a   :  { %7775 = vst [vmem:[#allocation64_spill] sm:$0xff] %v5898_v38 }
 0x35b   :  { %4138 = vmatmul.msk.f32.gmra.mxu0 %vm312_vm1, %v162_v32  ;;  %v5912_v32 = vld [vmem:[%s7695_s3 + $0x18] sm:$0xff]  ;;  %v5917_v63 = vpop.f32.mrf.mxu1 }
 0x35c   :  { %2186 = vmatmul.f32.gmra.mxu2 %v5912_v32  ;;  %2227 = vmatmul.f32.gmra.mxu3 %v5907_v60  ;;  %7776 = vst [vmem:[#allocation65_spill] sm:$0xff] %v5917_v63 }
 0x35e   :  { %2145 = vmatmul.f32.gmra.mxu1 %v5907_v60 }
 0x360   :  { %v1378_v1 = vpop.f32.mrf.mxu0 }
 0x361   :  { %v5919_v38 = vpop.f32.mrf.mxu3  ;;  %v1379_v61 = vadd.f32 %v5349_v43, %v1378_v1  ;;  %v6014_v1 = vpop.f32.mrf.mxu2 }
 0x362   :  { %7777 = vst [vmem:[#allocation66_spill] sm:$0xff] %v5919_v38 }
 0x363   :  { %4139 = vmatmul.msk.f32.gmra.mxu0 %vm312_vm1, %v163_v21  ;;  %v5933_v21 = vld [vmem:[%s7695_s3 + $0x28] sm:$0xff]  ;;  %v5938_v63 = vpop.f32.mrf.mxu1 }
 0x364   :  { %2189 = vmatmul.f32.gmra.mxu2 %v5933_v21  ;;  %2230 = vmatmul.f32.gmra.mxu3 %v5928_v53  ;;  %7778 = vst [vmem:[#allocation67_spill] sm:$0xff] %v5938_v63 }
 0x366   :  { %2148 = vmatmul.f32.gmra.mxu1 %v5928_v53 }
 0x368   :  { %v1381_v30 = vpop.f32.mrf.mxu0 }
 0x369   :  { %v5940_v38 = vpop.f32.mrf.mxu3  ;;  %v1382_v31 = vadd.f32 %v5349_v43, %v1381_v30 }
 0x36a   :  { %7779 = vst [vmem:[#allocation68_spill] sm:$0xff] %v5940_v38 }
 0x36b   :  { %4140 = vmatmul.msk.f32.gmra.mxu0 %vm312_vm1, %v164_v29  ;;  %v5954_v29 = vld [vmem:[%s7695_s3 + $0x38] sm:$0xff]  ;;  %v5959_v63 = vpop.f32.mrf.mxu1 }
 0x36c   :  { %2192 = vmatmul.f32.gmra.mxu2 %v5954_v29  ;;  %2233 = vmatmul.f32.gmra.mxu3 %v5949_v13  ;;  %7780 = vst [vmem:[#allocation69_spill] sm:$0xff] %v5959_v63 }
 0x36e   :  { %2151 = vmatmul.f32.gmra.mxu1 %v5949_v13 }
 0x370   :  { %v1384_v12 = vpop.f32.mrf.mxu0 }
 0x371   :  { %v5961_v38 = vpop.f32.mrf.mxu3  ;;  %v1385_v63 = vadd.f32 %v5349_v43, %v1384_v12  ;;  %v1963_v12 = vmax.f32 %v1382_v31, 0.0  ;;  %v1373_v31 = vadd.f32 %v5349_v43, %v5868_v19  ;;  %v1367_v19 = vadd.f32 %v5349_v43, %v5832_v2  ;;  %v6031_v2 = vld [vmem:[%s7695_s3 + $0x60] sm:$0xff] }
 0x372   :  { %7781 = vst [vmem:[#allocation70_spill] sm:$0xff] %v5961_v38 }
 0x373   :  { %4141 = vmatmul.msk.f32.gmra.mxu0 %vm312_vm1, %v165_v6  ;;  %v5975_v6 = vld [vmem:[%s7695_s3 + $0x48] sm:$0xff]  ;;  %v5983_v58 = vpop.f32.mrf.mxu1  ;;  %v1964_v8 = vmax.f32 %v1385_v63, 0.0 }
 0x374   :  { %2195 = vmatmul.f32.gmra.mxu2 %v5975_v6  ;;  %2236 = vmatmul.f32.gmra.mxu3 %v5970_v34  ;;  %7782 = vst [vmem:[#allocation71_spill] sm:$0xff] %v5983_v58 }
 0x376   :  { %2154 = vmatmul.f32.gmra.mxu1 %v5970_v34 }
 0x378   :  { %v1387_v22 = vpop.f32.mrf.mxu0 }
 0x379   :  { %v1388_v38 = vadd.f32 %v5349_v43, %v1387_v22  ;;  %v5986_v52 = vpop.f32.mrf.mxu3  ;;  %v1376_v22 = vadd.f32 %v5349_v43, %v1375_v50  ;;  %v1962_v50 = vmax.f32 %v1379_v61, 0.0  ;;  %v1960_v61 = vmax.f32 %v1373_v31, 0.0  ;;  %v6036_v31 = vld [vmem:[%s7695_s3 + $0x68] sm:$0xff] }
 0x37a   :  { %7783 = vst [vmem:[#allocation72_spill] sm:$0xff] %v5986_v52 }
 0x37b   :  { %v1965_v15 = vmax.f32 %v1388_v38, 0.0  ;;  %4142 = vmatmul.msk.f32.gmra.mxu0 %vm312_vm1, %v166_v24  ;;  %v167_v24 = vld [vmem:[%s7692_s0 + $0x380] sm:$0xff]  ;;  %v5998_v38 = vld [vmem:[%s7695_s3 + $0x50] sm:$0xff]  ;;  %v1961_v30 = vmax.f32 %v1376_v22, 0.0  ;;  %v6012_v63 = vpop.f32.mrf.mxu1 }
 0x37c   :  { %2239 = vmatmul.f32.gmra.mxu3 %v5998_v38  ;;  %7784 = vst [vmem:[#allocation73_spill] sm:$0xff] %v6012_v63  ;;  %v6047_v63 = vpop.f32.mrf.mxu2 }
 0x37d   :  { %2331 = vmatpush.msra.mxu3 %v1965_v15  ;;  %v6003_v15 = vld [vmem:[%s7695_s3 + $0x58] sm:$0xff] }
 0x37e   :  { %2198 = vmatmul.f32.gmra.mxu2 %v6003_v15  ;;  %2157 = vmatmul.f32.gmra.mxu1 %v5998_v38 }
 0x37f   :  { %2332 = vmatpush.msra.mxu3 %v1964_v8  ;;  %v1370_v8 = vadd.f32 %v5349_v43, %v5850_v20  ;;  %v1364_v20 = vadd.f32 %v5349_v43, %v5814_v47  ;;  %v1361_v47 = vadd.f32 %v5349_v43, %v5796_v25  ;;  %v1355_v25 = vadd.f32 %v5349_v43, %v5760_v18  ;;  %v6064_v18 = vld [vmem:[%s7695_s3 + $0x70] sm:$0xff] }
 0x380   :  { %v5990_v4 = vpop.f32.mrf.mxu0 }
 0x381   :  { %2333 = vmatpush.msra.mxu3 %v1963_v12  ;;  %v6018_v12 = vpop.f32.mrf.mxu3  ;;  %v1959_v22 = vmax.f32 %v1370_v8, 0.0  ;;  %v1958_v8 = vmax.f32 %v1367_v19, 0.0  ;;  %v1956_v19 = vmax.f32 %v1361_v47, 0.0  ;;  %v6069_v47 = vld [vmem:[%s7695_s3 + $0x78] sm:$0xff] }
 0x382   :  { %7785 = vst [vmem:[#allocation74_spill] sm:$0xff] %v6018_v12  ;;  %v1532_v12 = vadd.f32 %v5349_v43, %v5540_v54  ;;  %v1526_v54 = vadd.f32 %v5349_v43, %v5496_v59  ;;  %v1520_v59 = vadd.f32 %v5349_v43, %v5452_v5  ;;  %v1514_v5 = vadd.f32 %v5349_v43, %v5408_v48 }
 0x383   :  { %4143 = vmatmul.msk.f32.gmra.mxu0 %vm312_vm1, %v167_v24  ;;  %2334 = vmatpush.msra.mxu3 %v1962_v50  ;;  %v168_v50 = vld [vmem:[%s7692_s0 + $0x388] sm:$0xff]  ;;  %v6045_v58 = vpop.f32.mrf.mxu1  ;;  %v1508_v48 = vadd.f32 %v5349_v43, %v5367_v11  ;;  %v1502_v11 = vadd.f32 %v5349_v43, %v5310_v7  ;;  %v6158_v7 = vld [vmem:[%s7694_s2] ss:$0 sm:$0xff] }
 0x384   :  { %2242 = vmatmul.f32.gmra.mxu3 %v6031_v2  ;;  %7786 = vst [vmem:[#allocation75_spill] sm:$0xff] %v6045_v58  ;;  %v6080_v52 = vpop.f32.mrf.mxu2 }
 0x385   :  { %2335 = vmatpush.msra.mxu3 %v1961_v30  ;;  %v1358_v30 = vadd.f32 %v5349_v43, %v5778_v44  ;;  %v1352_v44 = vadd.f32 %v5349_v43, %v5736_v35  ;;  %v1349_v35 = vadd.f32 %v5349_v43, %v5708_v57  ;;  %v1343_v57 = vadd.f32 %v5349_v43, %v5656_v42  ;;  %v170_v42 = vld [vmem:[%s7692_s0 + $0x398] sm:$0xff] }
 0x386   :  { %2201 = vmatmul.f32.gmra.mxu2 %v6036_v31  ;;  %2160 = vmatmul.f32.gmra.mxu1 %v6031_v2 }
 0x387   :  { %2336 = vmatpush.msra.mxu3 %v1960_v61  ;;  %v1957_v61 = vmax.f32 %v1364_v20, 0.0  ;;  %v1955_v20 = vmax.f32 %v1358_v30, 0.0  ;;  %v1954_v30 = vmax.f32 %v1355_v25, 0.0  ;;  %v1952_v25 = vmax.f32 %v1349_v35, 0.0 }
 0x388   :  { %v6023_v24 = vpop.f32.mrf.mxu0  ;;  %v1950_v35 = vmax.f32 %v1343_v57, 0.0 }
 0x389   :  { %2337 = vmatpush.msra.mxu3 %v1959_v22  ;;  %v6051_v22 = vpop.f32.mrf.mxu3 }
 0x38a   :  { %7787 = vst [vmem:[#allocation76_spill] sm:$0xff] %v6051_v22 }
 0x38b   :  { %4144 = vmatmul.msk.f32.gmra.mxu0 %vm312_vm1, %v168_v50  ;;  %2338 = vmatpush.msra.mxu3 %v1958_v8  ;;  %v169_v8 = vld [vmem:[%s7692_s0 + $0x390] sm:$0xff]  ;;  %v6078_v58 = vpop.f32.mrf.mxu1 }
 0x38c   :  { %2245 = vmatmul.f32.gmra.mxu3 %v6064_v18  ;;  %7788 = vst [vmem:[#allocation77_spill] sm:$0xff] %v6078_v58 }
 0x38d   :  { %2339 = vmatpush.msra.mxu3 %v1957_v61  ;;  %v1346_v61 = vadd.f32 %v5349_v43, %v5682_v9 }
 0x38e   :  { %2204 = vmatmul.f32.gmra.mxu2 %v6069_v47  ;;  %2163 = vmatmul.f32.gmra.mxu1 %v6064_v18 }
 0x38f   :  { %2340 = vmatpush.msra.mxu3 %v1956_v19  ;;  %v1953_v19 = vmax.f32 %v1352_v44, 0.0  ;;  %v1951_v9 = vmax.f32 %v1346_v61, 0.0  ;;  %v1529_v44 = vadd.f32 %v5349_v43, %v5518_v45  ;;  %v1523_v45 = vadd.f32 %v5349_v43, %v5474_v17 }
 0x390   :  { %v6056_v50 = vpop.f32.mrf.mxu0 }
 0x391   :  { %2341 = vmatpush.msra.mxu3 %v1955_v20  ;;  %v6084_v20 = vpop.f32.mrf.mxu3 }
 0x392   :  { %7789 = vst [vmem:[#allocation78_spill] sm:$0xff] %v6084_v20 }
 0x393   :  { %4145 = vmatmul.msk.f32.gmra.mxu0 %vm312_vm1, %v169_v8  ;;  %2342 = vmatpush.msra.mxu3 %v1954_v30  ;;  %v2013_v30 = vmax.f32 %v1532_v12, 0.0  ;;  %v6100_v61 = vpop.f32.mrf.mxu1  ;;  %v2011_v12 = vmax.f32 %v1526_v54, 0.0 }
 0x394   :  { %7790 = vst [vmem:[#allocation79_spill] sm:$0xff] %v6100_v61 }
 0x395   :  { %2343 = vmatpush.msra.mxu3 %v1953_v19  ;;  %v2012_v19 = vmax.f32 %v1529_v44, 0.0  ;;  %v171_v44 = vld [vmem:[%s7692_s0 + $0x3a0] sm:$0xff] }
 0x396   :  { %2306 = vmatmul.f32.vlgmr.msra.gmra.mxu2 %v5892_v28  ;;  %2265 = vmatmul.f32.vlgmr.msra.gmra.mxu1 %v5643_v16 }
 0x397   :  { %2344 = vmatpush.msra.mxu3 %v1952_v25  ;;  %v6104_v25 = vpop.f32.mrf.mxu2 }
 0x398   :  { %v6091_v8 = vpop.f32.mrf.mxu0 }
 0x399   :  { %2345 = vmatpush.msra.mxu3 %v1951_v9  ;;  %v6107_v57 = vpop.f32.mrf.mxu3  ;;  %v1517_v9 = vadd.f32 %v5349_v43, %v5430_v40  ;;  %v1511_v40 = vadd.f32 %v5349_v43, %v5387_v33 }
 0x39a   :  { %7791 = vst [vmem:[#allocation80_spill] sm:$0xff] %v6107_v57 }
 0x39b   :  { %4146 = vmatmul.msk.f32.gmra.mxu0 %vm312_vm1, %v170_v42  ;;  %2346 = vmatpush.msra.mxu3 %v1950_v35  ;;  %v2010_v42 = vmax.f32 %v1523_v45, 0.0  ;;  %v2009_v35 = vmax.f32 %v1520_v59, 0.0  ;;  %v2008_v54 = vmax.f32 %v1517_v9, 0.0  ;;  %v1505_v59 = vadd.f32 %v5349_v43, %v5336_v14  ;;  %v172_v9 = vld [vmem:[%s7692_s0 + $0x3a8] sm:$0xff] }
 0x39c   :  { %2347 = vmatmul.f32.vlgmr.msra.gmra.mxu3 %v5643_v16  ;;  %v6123_v16 = vpop.f32.mrf.mxu1  ;;  %v1499_v14 = vadd.f32 %v5349_v43, %v5286_v55  ;;  %v1493_v55 = vadd.f32 %v6158_v7, %v5251_v0  ;;  %v1487_v0 = vadd.f32 %v6158_v7, %v5219_v26 }
 0x39d   :  { %2454 = vmatpush.msrb.mxu3 %v2013_v30  ;;  %7792 = vst [vmem:[#allocation81_spill] sm:$0xff] %v6123_v16 }
 0x39e   :  { %2309 = vmatmul.f32.gmra.mxu2 %v5907_v60  ;;  %2268 = vmatmul.f32.gmra.mxu1 %v5912_v32  ;;  %v2002_v43 = vmax.f32 %v1499_v14, 0.0  ;;  %v1676_v14 = vadd.f32 %v6158_v7, %v4923_v10  ;;  %v1670_v10 = vadd.f32 %v6158_v7, %v4893_v62 }
 0x39f   :  { %2455 = vmatpush.msrb.mxu3 %v2012_v19  ;;  %v6127_v30 = vpop.f32.mrf.mxu2  ;;  %v2007_v19 = vmax.f32 %v1514_v5, 0.0  ;;  %v2004_v5 = vmax.f32 %v1505_v59, 0.0  ;;  %v173_v59 = vld [vmem:[%s7692_s0 + $0x3b0] sm:$0xff] }
 0x3a0   :  { %v6114_v17 = vpop.f32.mrf.mxu0 }
 0x3a1   :  { %2456 = vmatpush.msrb.mxu3 %v2011_v12  ;;  %v6130_v45 = vpop.f32.mrf.mxu3  ;;  %v2006_v12 = vmax.f32 %v1511_v40, 0.0 }
 0x3a3   :  { %2457 = vmatpush.msrb.mxu3 %v2010_v42  ;;  %4147 = vmatmul.msk.f32.gmra.mxu0 %vm312_vm1, %v171_v44  ;;  %v2005_v42 = vmax.f32 %v1508_v48, 0.0  ;;  %v2003_v48 = vmax.f32 %v1502_v11, 0.0  ;;  %v2000_v11 = vmax.f32 %v1493_v55, 0.0  ;;  %v174_v55 = vld [vmem:[%s7692_s0 + $0x3b8] sm:$0xff] }
 0x3a4   :  { %2350 = vmatmul.f32.gmra.mxu3 %v5912_v32  ;;  %v6146_v44 = vpop.f32.mrf.mxu1 }
 0x3a5   :  { %2458 = vmatpush.msrb.mxu3 %v2009_v35  ;;  %7793 = vst [vmem:[#allocation82_spill] sm:$0xff] %v6146_v44 }
 0x3a6   :  { %2312 = vmatmul.f32.gmra.mxu2 %v5928_v53  ;;  %2271 = vmatmul.f32.gmra.mxu1 %v5933_v21 }
 0x3a7   :  { %2459 = vmatpush.msrb.mxu3 %v2008_v54  ;;  %v6150_v35 = vpop.f32.mrf.mxu2  ;;  %v1496_v54 = vadd.f32 %v6158_v7, %v5267_v23  ;;  %v1490_v23 = vadd.f32 %v6158_v7, %v5235_v46 }
 0x3a8   :  { %v6137_v33 = vpop.f32.mrf.mxu0 }
 0x3a9   :  { %2460 = vmatpush.msrb.mxu3 %v2007_v19  ;;  %v6153_v40 = vpop.f32.mrf.mxu3  ;;  %v1999_v46 = vmax.f32 %v1490_v23, 0.0 }
 0x3aa   :  { %7794 = vst [vmem:[#allocation83_spill] sm:$0xff] %v6153_v40 }
 0x3ab   :  { %2461 = vmatpush.msrb.mxu3 %v2006_v12  ;;  %4148 = vmatmul.msk.f32.gmra.mxu0 %vm312_vm1, %v172_v9  ;;  %v2001_v12 = vmax.f32 %v1496_v54, 0.0  ;;  %v1673_v54 = vadd.f32 %v6158_v7, %v4909_v3 }
 0x3ac   :  { %2353 = vmatmul.f32.gmra.mxu3 %v5933_v21  ;;  %v6174_v9 = vpop.f32.mrf.mxu1 }
 0x3ad   :  { %2462 = vmatpush.msrb.mxu3 %v2005_v42  ;;  %7795 = vst [vmem:[#allocation84_spill] sm:$0xff] %v6174_v9  ;;  %v2060_v23 = vmax.f32 %v1673_v54, 0.0 }
 0x3ae   :  { %2315 = vmatmul.f32.gmra.mxu2 %v5949_v13  ;;  %2274 = vmatmul.f32.gmra.mxu1 %v5954_v29 }
 0x3af   :  { %2463 = vmatpush.msrb.mxu3 %v2004_v5  ;;  %v6178_v42 = vpop.f32.mrf.mxu2 }
 0x3b0   :  { %v6165_v19 = vpop.f32.mrf.mxu0  ;;  %v1649_v20 = vadd.f32 %v6158_v7, %v6178_v42  ;;  %v1640_v42 = vadd.f32 %v6158_v7, %v6104_v25  ;;  %v1631_v25 = vadd.f32 %v6158_v7, %v6014_v1  ;;  %v1814_v1 = vadd.f32 %v6158_v7, %v5844_v36 }
 0x3b1   :  { %2464 = vmatpush.msrb.mxu3 %v2003_v48  ;;  %v6183_v5 = vpop.f32.mrf.mxu3  ;;  %v1998_v48 = vmax.f32 %v1487_v0, 0.0  ;;  %v1664_v0 = vadd.f32 %v6158_v7, %v4861_v51 }
 0x3b3   :  { %2465 = vmatpush.msrb.mxu3 %v2002_v43  ;;  %4149 = vmatmul.msk.f32.gmra.mxu0 %vm312_vm1, %v173_v59  ;;  %v2061_v43 = vmax.f32 %v1676_v14, 0.0  ;;  %v1667_v59 = vadd.f32 %v6158_v7, %v4877_v56  ;;  %v2057_v54 = vmax.f32 %v1664_v0, 0.0 }
 0x3b4   :  { %2356 = vmatmul.f32.gmra.mxu3 %v5954_v29  ;;  %v6199_v3 = vpop.f32.mrf.mxu1 }
 0x3b5   :  { %2466 = vmatpush.msrb.mxu3 %v2001_v12  ;;  %7796 = vst [vmem:[#allocation85_spill] sm:$0xff] %v6199_v3  ;;  %v2058_v14 = vmax.f32 %v1667_v59, 0.0 }
 0x3b6   :  { %2318 = vmatmul.f32.gmra.mxu2 %v5970_v34  ;;  %2277 = vmatmul.f32.gmra.mxu1 %v5975_v6 }
 0x3b7   :  { %2467 = vmatpush.msrb.mxu3 %v2000_v11  ;;  %v1651_v12 = vpop.f32.mrf.mxu2  ;;  %v2059_v11 = vmax.f32 %v1670_v10, 0.0 }
 0x3b8   :  { %v6188_v26 = vpop.f32.mrf.mxu0 }
 0x3b9   :  { %2468 = vmatpush.msrb.mxu3 %v1999_v46  ;;  %v6203_v62 = vpop.f32.mrf.mxu3  ;;  %v175_v46 = vld [vmem:[%s7692_s0 + $0x3c0] sm:$0xff] }
 0x3bb   :  { %2469 = vmatpush.msrb.mxu3 %v1998_v48  ;;  %4150 = vmatmul.msk.f32.gmra.mxu0 %vm312_vm1, %v174_v55 }
 0x3bc   :  { %2359 = vmatmul.f32.gmra.mxu3 %v5975_v6  ;;  %v6214_v51 = vpop.f32.mrf.mxu1 }
 0x3bd   :  { %2577 = vmatpush.msra.mxu3 %v2061_v43  ;;  %7797 = vst [vmem:[#allocation86_spill] sm:$0xff] %v6214_v51  ;;  %v176_v43 = vld [vmem:[%s7692_s0 + $0x3c8] sm:$0xff] }
 0x3be   :  { %2321 = vmatmul.f32.gmra.mxu2 %v5998_v38  ;;  %2280 = vmatmul.f32.gmra.mxu1 %v6003_v15 }
 0x3bf   :  { %2578 = vmatpush.msra.mxu3 %v2060_v23  ;;  %v1654_v48 = vpop.f32.mrf.mxu2 }
 0x3c0   :  { %v6207_v56 = vpop.f32.mrf.mxu0  ;;  %v1655_v16 = vadd.f32 %v6158_v7, %v1654_v48  ;;  %v1646_v48 = vadd.f32 %v6158_v7, %v6150_v35  ;;  %v1637_v35 = vadd.f32 %v6158_v7, %v6080_v52 }
 0x3c1   :  { %2579 = vmatpush.msra.mxu3 %v2059_v11  ;;  %v6216_v55 = vpop.f32.mrf.mxu3  ;;  %v177_v11 = vld [vmem:[%s7692_s0 + $0x3d0] sm:$0xff]  ;;  %s4449_s0 = smov 26  }
 0x3c3   :  { %2580 = vmatpush.msra.mxu3 %v2058_v14  ;;  %4151 = vmatmul.msk.f32.gmra.mxu0 %vm312_vm1, %v175_v46 }
 0x3c4   :  { %2362 = vmatmul.f32.gmra.mxu3 %v6003_v15  ;;  %v6227_v59 = vpop.f32.mrf.mxu1 }
 0x3c5   :  { %2581 = vmatpush.msra.mxu3 %v2057_v54  ;;  %7798 = vst [vmem:[#allocation87_spill] sm:$0xff] %v6227_v59 }
 0x3c6   :  { %2324 = vmatmul.f32.gmra.mxu2 %v6031_v2  ;;  %2283 = vmatmul.f32.gmra.mxu1 %v6036_v31 }
 0x3c7   :  { %v1657_v23 = vpop.f32.mrf.mxu2 }
 0x3c8   :  { %v6220_v10 = vpop.f32.mrf.mxu0  ;;  %v1658_v9 = vadd.f32 %v6158_v7, %v1657_v23 }
 0x3c9   :  { %v6229_v0 = vpop.f32.mrf.mxu3 }
 0x3ca   :  { %v2055_v59 = vmax.f32 %v1658_v9, 0.0 }
 0x3cb   :  { %4152 = vmatmul.msk.f32.gmra.mxu0 %vm312_vm1, %v176_v43 }
 0x3cc   :  { %2365 = vmatmul.f32.gmra.mxu3 %v6036_v31  ;;  %v6240_v14 = vpop.f32.mrf.mxu1 }
 0x3cd   :  { %7799 = vst [vmem:[#allocation88_spill] sm:$0xff] %v6240_v14  ;;  %v2054_v14 = vmax.f32 %v1655_v16, 0.0  ;;  %v2051_v16 = vmax.f32 %v1646_v48, 0.0  ;;  %v1820_v48 = vadd.f32 %v6158_v7, %v5880_v49 }
 0x3ce   :  { %2327 = vmatmul.f32.gmra.mxu2 %v6064_v18  ;;  %2286 = vmatmul.f32.gmra.mxu1 %v6069_v47 }
 0x3cf   :  { %v1660_v46 = vpop.f32.mrf.mxu2 }
 0x3d0   :  { %v6233_v15 = vpop.f32.mrf.mxu0  ;;  %v1661_v44 = vadd.f32 %v6158_v7, %v1660_v46 }
 0x3d1   :  { %v6242_v54 = vpop.f32.mrf.mxu3 }
 0x3d2   :  { %v2056_v22 = vmax.f32 %v1661_v44, 0.0  ;;  %v1643_v44 = vadd.f32 %v6158_v7, %v6127_v30  ;;  %v2049_v30 = vmax.f32 %v1640_v42, 0.0  ;;  %v2046_v42 = vmax.f32 %v1631_v25, 0.0 }
 0x3d3   :  { %4153 = vmatmul.msk.f32.gmra.mxu0 %vm312_vm1, %v177_v11  ;;  %v2107_v25 = vmax.f32 %v1814_v1, 0.0  ;;  %vm4011_vm1 = vcmask 998400  }
 0x3d4   :  { %2368 = vmatmul.f32.gmra.mxu3 %v6069_v47  ;;  %v6248_v43 = vpop.f32.mrf.mxu1  ;;  %v1652_v47 = vadd.f32 %v6158_v7, %v1651_v12  ;;  %v2052_v12 = vmax.f32 %v1649_v20, 0.0  ;;  %v1634_v20 = vadd.f32 %v6158_v7, %v6047_v63  ;;  %v1817_v63 = vadd.f32 %v6158_v7, %v5862_v27 }
 0x3d5   :  { %2582 = vmatpush.msra.mxu3 %v2056_v22 }
 0x3d6   :  { %v2053_v46 = vmax.f32 %v1652_v47, 0.0  ;;  %v2048_v47 = vmax.f32 %v1637_v35, 0.0  ;;  %v2047_v52 = vmax.f32 %v1634_v20, 0.0  ;;  %v1811_v35 = vadd.f32 %v6158_v7, %v5826_v41 }
 0x3d7   :  { %v6250_v58 = vpop.f32.mrf.mxu2  ;;  %2583 = vmatpush.msra.mxu3 %v2055_v59  ;;  %v2050_v59 = vmax.f32 %v1643_v44, 0.0  ;;  %v1805_v41 = vadd.f32 %v6158_v7, %v5790_v39 }
 0x3d8   :  { %v6246_v31 = vpop.f32.mrf.mxu0 }
 0x3d9   :  { %v6252_v61 = vpop.f32.mrf.mxu3  ;;  %2584 = vmatpush.msra.mxu3 %v2054_v14 }
 0x3db   :  { %2585 = vmatpush.msra.mxu3 %v2053_v46 }
 0x3dc   :  { %2470 = vmatmul.f32.vlgmr.msrb.gmra.mxu3 %v5892_v28  ;;  %v6260_v3 = vpop.f32.mrf.mxu1 }
 0x3dd   :  { %2586 = vmatpush.msra.mxu3 %v2052_v12 }
 0x3df   :  { %v6263_v51 = vpop.f32.mrf.mxu2  ;;  %2587 = vmatpush.msra.mxu3 %v2051_v16  ;;  %v2109_v16 = vmax.f32 %v1820_v48, 0.0 }
 0x3e0   :  { %v6255_v11 = vpop.f32.mrf.mxu0 }
 0x3e1   :  { %v6265_v57 = vpop.f32.mrf.mxu3  ;;  %2588 = vmatpush.msra.mxu3 %v2050_v59  ;;  %v2108_v59 = vmax.f32 %v1817_v63, 0.0  ;;  %v2106_v63 = vmax.f32 %v1811_v35, 0.0 }
 0x3e3   :  { %2589 = vmatpush.msra.mxu3 %v2049_v30  ;;  %v1808_v30 = vadd.f32 %v6158_v7, %v5808_v37  ;;  %v7800_v37 = vld [vmem:[#allocation56_spill] sm:$0xff] }
 0x3e4   :  { %2473 = vmatmul.f32.gmra.mxu3 %v5907_v60  ;;  %v6274_v9 = vpop.f32.mrf.mxu1 }
 0x3e5   :  { %2590 = vmatpush.msra.mxu3 %v2048_v47  ;;  %v2105_v1 = vmax.f32 %v1808_v30, 0.0  ;;  %v7802_v30 = vld [vmem:[#allocation52_spill] sm:$0xff] }
 0x3e7   :  { %v6278_v22 = vpop.f32.mrf.mxu2  ;;  %2591 = vmatpush.msra.mxu3 %v2047_v52 }
 0x3e8   :  { %v1429_v23 = vpop.f32.mrf.mxu0 }
 0x3e9   :  { %v6280_v40 = vpop.f32.mrf.mxu3  ;;  %2592 = vmatpush.msra.mxu3 %v2046_v42  ;;  %v1430_v36 = vadd.f32 %v6158_v7, %v1429_v23  ;;  %v1802_v23 = vadd.f32 %v6158_v7, %v7800_v37 }
 0x3eb   :  { %2700 = vmatpush.msrb.mxu3 %v2109_v16  ;;  %v1424_v16 = vadd.f32 %v6158_v7, %v6246_v31  ;;  %v1796_v31 = vadd.f32 %v6158_v7, %v7802_v30 }
 0x3ec   :  { %2476 = vmatmul.f32.gmra.mxu3 %v5928_v53  ;;  %v6291_v46 = vpop.f32.mrf.mxu1 }
 0x3ed   :  { %2701 = vmatpush.msrb.mxu3 %v2108_v59  ;;  %v1421_v59 = vadd.f32 %v6158_v7, %v6233_v15 }
 0x3ef   :  { %v6293_v44 = vpop.f32.mrf.mxu2  ;;  %2702 = vmatpush.msrb.mxu3 %v2107_v25  ;;  %v1418_v25 = vadd.f32 %v6158_v7, %v6220_v10  ;;  %v7804_v10 = vld [vmem:[#allocation48_spill] sm:$0xff] }
 0x3f0   :  { %v1432_v14 = vpop.f32.mrf.mxu0 }
 0x3f1   :  { %v6297_v12 = vpop.f32.mrf.mxu3  ;;  %v1433_v20 = vadd.f32 %v6158_v7, %v1432_v14  ;;  %v1427_v14 = vadd.f32 %v6158_v7, %v6255_v11  ;;  %v7801_v11 = vld [vmem:[#allocation54_spill] sm:$0xff]  ;;  %2703 = vmatpush.msrb.mxu3 %v2106_v63  ;;  %v1415_v63 = vadd.f32 %v6158_v7, %v6207_v56  ;;  %v1975_v30 = vmax.f32 %v1418_v25, 0.0 }
 0x3f2   :  { %v1799_v35 = vadd.f32 %v6158_v7, %v7801_v11  ;;  %v7805_v56 = vld [vmem:[#allocation46_spill] sm:$0xff] }
 0x3f3   :  { %v1980_v42 = vmax.f32 %v1433_v20, 0.0  ;;  %v2104_v20 = vmax.f32 %v1805_v41, 0.0  ;;  %2704 = vmatpush.msrb.mxu3 %v2105_v1  ;;  %v7803_v41 = vld [vmem:[#allocation50_spill] sm:$0xff]  ;;  %v1412_v1 = vadd.f32 %v6158_v7, %v6188_v26 }
 0x3f4   :  { %2479 = vmatmul.f32.gmra.mxu3 %v5949_v13  ;;  %v6309_v48 = vpop.f32.mrf.mxu1  ;;  %v1793_v15 = vadd.f32 %v6158_v7, %v7803_v41 }
 0x3f5   :  { %2705 = vmatpush.msrb.mxu3 %v2104_v20  ;;  %v1409_v20 = vadd.f32 %v6158_v7, %v6165_v19 }
 0x3f7   :  { %v6311_v52 = vpop.f32.mrf.mxu2 }
 0x3f8   :  { %v1435_v49 = vpop.f32.mrf.mxu0 }
 0x3f9   :  { %v1436_v27 = vadd.f32 %v6158_v7, %v1435_v49  ;;  %v6317_v49 = vpop.f32.mrf.mxu3 }
 0x3fb   :  { %v1981_v47 = vmax.f32 %v1436_v27, 0.0  ;;  %v1979_v27 = vmax.f32 %v1430_v36, 0.0  ;;  %v2103_v36 = vmax.f32 %v1802_v23, 0.0 }
 0x3fc   :  { %2482 = vmatmul.f32.gmra.mxu3 %v5970_v34  ;;  %v6334_v37 = vpop.f32.mrf.mxu1 }
 0x3fd   :  { %2372 = vmatpush.msrb.mxu1 %v1981_v47  ;;  %v1978_v47 = vmax.f32 %v1427_v14, 0.0  ;;  %v2102_v14 = vmax.f32 %v1799_v35, 0.0  ;;  %2706 = vmatpush.msrb.mxu3 %v2103_v36  ;;  %v1787_v35 = vadd.f32 %v6158_v7, %v7805_v56  ;;  %v1406_v36 = vadd.f32 %v6158_v7, %v6137_v33  ;;  %v7808_v33 = vld [vmem:[#allocation40_spill] sm:$0xff] }
 0x3ff   :  { %2373 = vmatpush.msrb.mxu1 %v1980_v42  ;;  %v1977_v42 = vmax.f32 %v1424_v16, 0.0  ;;  %v1790_v16 = vadd.f32 %v6158_v7, %v7804_v10  ;;  %2707 = vmatpush.msrb.mxu3 %v2102_v14  ;;  %v1403_v14 = vadd.f32 %v6158_v7, %v6114_v17  ;;  %v7809_v17 = vld [vmem:[#allocation38_spill] sm:$0xff] }
 0x400   :  { %v6323_v39 = vpop.f32.mrf.mxu0 }
 0x401   :  { %2374 = vmatpush.msrb.mxu1 %v1979_v27  ;;  %v6336_v11 = vpop.f32.mrf.mxu2  ;;  %v1976_v27 = vmax.f32 %v1421_v59, 0.0  ;;  %v6342_v23 = vpop.f32.mrf.mxu3  ;;  %v2100_v59 = vmax.f32 %v1793_v15, 0.0  ;;  %v2099_v25 = vmax.f32 %v1790_v16, 0.0  ;;  %v7807_v15 = vld [vmem:[#allocation42_spill] sm:$0xff] }
 0x402   :  { %v1781_v19 = vadd.f32 %v6158_v7, %v7807_v15 }
 0x403   :  { %2375 = vmatpush.msrb.mxu1 %v1978_v47  ;;  %v2101_v47 = vmax.f32 %v1796_v31, 0.0  ;;  %v7806_v31 = vld [vmem:[#allocation44_spill] sm:$0xff] }
 0x404   :  { %2485 = vmatmul.f32.gmra.mxu3 %v5998_v38  ;;  %v1784_v26 = vadd.f32 %v6158_v7, %v7806_v31  ;;  %v6359_v38 = vpop.f32.mrf.mxu1 }
 0x405   :  { %2376 = vmatpush.msrb.mxu1 %v1977_v42  ;;  %v1974_v42 = vmax.f32 %v1415_v63, 0.0  ;;  %2708 = vmatpush.msrb.mxu3 %v2101_v47  ;;  %v2098_v63 = vmax.f32 %v1787_v35, 0.0  ;;  %v1400_v47 = vadd.f32 %v6158_v7, %v6091_v8  ;;  %v1775_v35 = vadd.f32 %v6158_v7, %v7809_v17 }
 0x406   :  { %v2097_v56 = vmax.f32 %v1784_v26, 0.0  ;;  %v1394_v8 = vadd.f32 %v6158_v7, %v6023_v24 }
 0x407   :  { %2377 = vmatpush.msrb.mxu1 %v1976_v27  ;;  %v1973_v27 = vmax.f32 %v1412_v1, 0.0  ;;  %2709 = vmatpush.msrb.mxu3 %v2100_v59  ;;  %v1778_v1 = vadd.f32 %v6158_v7, %v7808_v33  ;;  %v1397_v59 = vadd.f32 %v6158_v7, %v6056_v50  ;;  %v2094_v15 = vmax.f32 %v1775_v35, 0.0  ;;  %v7810_v50 = vld [vmem:[#allocation62_spill] sm:$0xff]  ;;  %v7811_v33 = vld [vmem:[#allocation61_spill] sm:$0xff] }
 0x408   :  { %v6348_v41 = vpop.f32.mrf.mxu0  ;;  %v1967_v24 = vmax.f32 %v1394_v8, 0.0 }
 0x409   :  { %2378 = vmatpush.msrb.mxu1 %v1975_v30  ;;  %v6361_v10 = vpop.f32.mrf.mxu2  ;;  %v1972_v30 = vmax.f32 %v1409_v20, 0.0  ;;  %v6367_v16 = vpop.f32.mrf.mxu3  ;;  %2710 = vmatpush.msrb.mxu3 %v2099_v25  ;;  %v2096_v20 = vmax.f32 %v1781_v19, 0.0  ;;  %v2095_v26 = vmax.f32 %v1778_v1, 0.0  ;;  %v1391_v19 = vadd.f32 %v6158_v7, %v5990_v4  ;;  %v7812_v4 = vld [vmem:[#allocation60_spill] sm:$0xff] }
 0x40a   :  { %v1577_v1 = vadd.f32 %v6158_v7, %v7811_v33 }
 0x40b   :  { %2379 = vmatpush.msrb.mxu1 %v1974_v42  ;;  %v1971_v42 = vmax.f32 %v1406_v36, 0.0  ;;  %2711 = vmatpush.msrb.mxu3 %v2098_v63  ;;  %v1969_v36 = vmax.f32 %v1400_v47, 0.0  ;;  %v1580_v63 = vadd.f32 %v6158_v7, %v7810_v50  ;;  %v1966_v47 = vmax.f32 %v1391_v19, 0.0 }
 0x40c   :  { %2488 = vmatmul.f32.gmra.mxu3 %v6031_v2  ;;  %v6382_v25 = vpop.f32.mrf.mxu1 }
 0x40d   :  { %2380 = vmatpush.msrb.mxu1 %v1973_v27  ;;  %v1970_v27 = vmax.f32 %v1403_v14, 0.0  ;;  %2712 = vmatpush.msrb.mxu3 %v2097_v56  ;;  %v2029_v17 = vmax.f32 %v1580_v63, 0.0 }
 0x40f   :  { %2381 = vmatpush.msrb.mxu1 %v1972_v30  ;;  %v1968_v30 = vmax.f32 %v1397_v59, 0.0  ;;  %2713 = vmatpush.msrb.mxu3 %v2096_v20  ;;  %v7813_v20 = vld [vmem:[#allocation59_spill] sm:$0xff] }
 0x410   :  { %v6373_v31 = vpop.f32.mrf.mxu0  ;;  %v1571_v59 = vadd.f32 %v6158_v7, %v7813_v20 }
 0x411   :  { %2382 = vmatpush.msrb.mxu1 %v1971_v42  ;;  %v6384_v2 = vpop.f32.mrf.mxu2  ;;  %v6390_v14 = vpop.f32.mrf.mxu3  ;;  %2714 = vmatpush.msrb.mxu3 %v2095_v26  ;;  %v1574_v42 = vadd.f32 %v6158_v7, %v7812_v4  ;;  %v7817_v4 = vld [vmem:[#allocation53_spill] sm:$0xff] }
 0x413   :  { %2383 = vmatpush.msrb.mxu1 %v1970_v27  ;;  %2715 = vmatpush.msrb.mxu3 %v2094_v15  ;;  %v2028_v27 = vmax.f32 %v1577_v1, 0.0  ;;  %v7815_v15 = vld [vmem:[#allocation57_spill] sm:$0xff] }
 0x414   :  { %2491 = vmatmul.f32.gmra.mxu3 %v6064_v18  ;;  %v6399_v35 = vpop.f32.mrf.mxu1  ;;  %v7814_v18 = vld [vmem:[#allocation58_spill] sm:$0xff]  ;;  %v1565_v19 = vadd.f32 %v6158_v7, %v7815_v15 }
 0x415   :  { %2384 = vmatpush.msrb.mxu1 %v1969_v36  ;;  %v1568_v8 = vadd.f32 %v6158_v7, %v7814_v18  ;;  %v2027_v36 = vmax.f32 %v1574_v42, 0.0  ;;  %v1559_v42 = vadd.f32 %v6158_v7, %v7817_v4 }
 0x417   :  { %2385 = vmatpush.msrb.mxu1 %v1968_v30  ;;  %v2026_v30 = vmax.f32 %v1571_v59, 0.0  ;;  %v2025_v1 = vmax.f32 %v1568_v8, 0.0  ;;  %v7818_v59 = vld [vmem:[#allocation51_spill] sm:$0xff]  ;;  %v2022_v15 = vmax.f32 %v1559_v42, 0.0 }
 0x418   :  { %v6394_v56 = vpop.f32.mrf.mxu0 }
 0x419   :  { %2386 = vmatpush.msrb.mxu1 %v1967_v24  ;;  %v6403_v26 = vpop.f32.mrf.mxu2  ;;  %v6415_v24 = vld [vmem:[%s7695_s3 + $0x8] sm:$0xff] }
 0x41b   :  { %2387 = vmatpush.msrb.mxu1 %v1966_v47 }
 0x41c   :  { %2388 = vmatmul.f32.vlgmr.msrb.gmra.mxu1 %v5892_v28  ;;  %2593 = vmatmul.f32.vlgmr.msra.gmra.mxu3 %v6415_v24  ;;  %v7816_v28 = vld [vmem:[#allocation55_spill] sm:$0xff]  ;;  %v6420_v47 = vpop.f32.mrf.mxu1 }
 0x41d   :  { %2495 = vmatpush.msra.mxu1 %v2029_v17  ;;  %v1562_v33 = vadd.f32 %v6158_v7, %v7816_v28  ;;  %v2024_v17 = vmax.f32 %v1565_v19, 0.0  ;;  %v6436_v19 = vadd.f32 %v6250_v58, %v6248_v43  ;;  %v7824_v43 = vld [vmem:[#allocation43_spill] sm:$0xff] }
 0x41f   :  { %2496 = vmatpush.msra.mxu1 %v2028_v27  ;;  %v2348_v63 = vpop.f32.mrf.mxu3  ;;  %v1556_v27 = vadd.f32 %v6158_v7, %v7818_v59  ;;  %v2023_v18 = vmax.f32 %v1562_v33, 0.0  ;;  %v7821_v33 = vld [vmem:[#allocation47_spill] sm:$0xff]  ;;  %v2783_v58 = vsel %vm2782_vm2, %v6436_v19, 0.0 }
 0x420   :  { %v6410_v50 = vpop.f32.mrf.mxu0 }
 0x421   :  { %2497 = vmatpush.msra.mxu1 %v2027_v36  ;;  %v6424_v20 = vpop.f32.mrf.mxu2  ;;  %v7819_v36 = vld [vmem:[#allocation49_spill] sm:$0xff]  ;;  %v2021_v4 = vmax.f32 %v1556_v27, 0.0  ;;  %v1544_v27 = vadd.f32 %v6158_v7, %v7824_v43 }
 0x422   :  { %v1553_v8 = vadd.f32 %v6158_v7, %v7819_v36  ;;  %v7829_v43 = vld [vmem:[#allocation37_spill] sm:$0xff] }
 0x423   :  { %2498 = vmatpush.msra.mxu1 %v2026_v30 }
 0x424   :  { %2391 = vmatmul.f32.gmra.mxu1 %v5907_v60  ;;  %2596 = vmatmul.f32.gmra.mxu3 %v5912_v32  ;;  %v6440_v60 = vadd.f32 %v6263_v51, %v6260_v3  ;;  %v6444_v42 = vpop.f32.mrf.mxu1  ;;  %v2020_v32 = vmax.f32 %v1553_v8, 0.0  ;;  %v6456_v51 = vadd.f32 %v6278_v22, %v6274_v9  ;;  %v7825_v8 = vld [vmem:[#allocation41_spill] sm:$0xff]  ;;  %v7827_v22 = vld [vmem:[#allocation39_spill] sm:$0xff] }
 0x425   :  { %2499 = vmatpush.msra.mxu1 %v2025_v1  ;;  %v1550_v1 = vadd.f32 %v6158_v7, %v7821_v33 }
 0x426   :  { %7820 = vst [vmem:[#allocation56_spill] sm:$0xff] %v6440_v60  ;;  %v2784_v3 = vsel %vm2782_vm2, %v6440_v60, 0.0  ;;  %v2786_v9 = vsel %vm2782_vm2, %v6456_v51, 0.0 }
 0x427   :  { %2500 = vmatpush.msra.mxu1 %v2024_v17  ;;  %v2351_v28 = vpop.f32.mrf.mxu3  ;;  %v7822_v17 = vld [vmem:[#allocation45_spill] sm:$0xff]  ;;  %7823 = vst [vmem:[#allocation54_spill] sm:$0xff] %v6456_v51  ;;  %v2019_v36 = vmax.f32 %v1550_v1, 0.0  ;;  %v1538_v1 = vadd.f32 %v6158_v7, %v7827_v22  ;;  %v7831_v22 = vld [vmem:[#allocation19_spill] sm:$0xff] }
 0x428   :  { %v6431_v30 = vpop.f32.mrf.mxu0  ;;  %v1547_v59 = vadd.f32 %v6158_v7, %v7822_v17 }
 0x429   :  { %2501 = vmatpush.msra.mxu1 %v2023_v18  ;;  %v6448_v18 = vpop.f32.mrf.mxu2 }
 0x42a   :  { %v2018_v33 = vmax.f32 %v1547_v59, 0.0 }
 0x42b   :  { %2502 = vmatpush.msra.mxu1 %v2022_v15  ;;  %v1541_v15 = vadd.f32 %v6158_v7, %v7825_v8 }
 0x42c   :  { %2394 = vmatmul.f32.gmra.mxu1 %v5928_v53  ;;  %2599 = vmatmul.f32.gmra.mxu3 %v5933_v21  ;;  %v6470_v53 = vadd.f32 %v6293_v44, %v6291_v46  ;;  %v6474_v59 = vpop.f32.mrf.mxu1  ;;  %v1535_v21 = vadd.f32 %v6158_v7, %v7829_v43  ;;  %v6486_v44 = vadd.f32 %v6311_v52, %v6309_v48 }
 0x42d   :  { %2503 = vmatpush.msra.mxu1 %v2021_v4  ;;  %v2785_v4 = vadd.f32 %v2784_v3, %v2783_v58  ;;  %v7828_v58 = vld [vmem:[#allocation20_spill] sm:$0xff]  ;;  %v6505_v52 = vadd.f32 %v6336_v11, %v6334_v37 }
 0x42e   :  { %7826 = vst [vmem:[#allocation52_spill] sm:$0xff] %v6470_v53  ;;  %v1724_v3 = vadd.f32 %v6158_v7, %v7828_v58  ;;  %v2788_v46 = vsel %vm2782_vm2, %v6470_v53, 0.0  ;;  %v2014_v58 = vmax.f32 %v1535_v21, 0.0  ;;  %v7835_v37 = vld [vmem:[#allocation16_spill] sm:$0xff] }
 0x42f   :  { %2504 = vmatpush.msra.mxu1 %v2020_v32  ;;  %v2354_v60 = vpop.f32.mrf.mxu3  ;;  %v2017_v32 = vmax.f32 %v1544_v27, 0.0  ;;  %v2787_v8 = vadd.f32 %v2786_v9, %v2785_v4  ;;  %v6490_v27 = vadd.f32 %v2348_v63, %v6403_v26  ;;  %v7832_v4 = vld [vmem:[#allocation18_spill] sm:$0xff]  ;;  %v6510_v63 = vadd.f32 %v2351_v28, %v6424_v20 }
 0x430   :  { %v6463_v17 = vpop.f32.mrf.mxu0  ;;  %v1718_v9 = vadd.f32 %v6158_v7, %v7832_v4  ;;  %v1712_v11 = vadd.f32 %v6158_v7, %v7835_v37  ;;  %v2792_v20 = vsel %vm2782_vm2, %v6505_v52, 0.0  ;;  %v6524_v28 = vadd.f32 %v6361_v10, %v6359_v38 }
 0x431   :  { %2505 = vmatpush.msra.mxu1 %v2019_v36  ;;  %v2016_v36 = vmax.f32 %v1541_v15, 0.0  ;;  %v6480_v51 = vpop.f32.mrf.mxu2  ;;  %7830 = vst [vmem:[#allocation50_spill] sm:$0xff] %v6490_v27  ;;  %v1721_v15 = vadd.f32 %v6158_v7, %v7831_v22  ;;  %v2789_v43 = vadd.f32 %v2788_v46, %v2787_v8  ;;  %v2825_v26 = vsel %vm2782_vm2, %v6490_v27, 0.0 }
 0x432   :  { %7833 = vst [vmem:[#allocation48_spill] sm:$0xff] %v6510_v63 }
 0x433   :  { %2506 = vmatpush.msra.mxu1 %v2018_v33  ;;  %v2015_v33 = vmax.f32 %v1538_v1, 0.0  ;;  %v7834_v1 = vld [vmem:[#allocation17_spill] sm:$0xff]  ;;  %v2076_v21 = vmax.f32 %v1721_v15, 0.0  ;;  %v7836_v15 = vld [vmem:[#allocation15_spill] sm:$0xff] }
 0x434   :  { %2397 = vmatmul.f32.gmra.mxu1 %v5949_v13  ;;  %2602 = vmatmul.f32.gmra.mxu3 %v5954_v29  ;;  %v2790_v13 = vsel %vm2782_vm2, %v6486_v44, 0.0  ;;  %v2826_v29 = vsel %vm2782_vm2, %v6510_v63, 0.0  ;;  %v6516_v46 = vpop.f32.mrf.mxu1  ;;  %v1709_v4 = vadd.f32 %v6158_v7, %v7836_v15  ;;  %v7841_v15 = vld [vmem:[#allocation11_spill] sm:$0xff] }
 0x435   :  { %2507 = vmatpush.msra.mxu1 %v2017_v32  ;;  %v2077_v32 = vmax.f32 %v1724_v3, 0.0  ;;  %v1715_v3 = vadd.f32 %v6158_v7, %v7834_v1  ;;  %v2827_v8 = vadd.f32 %v2826_v29, %v2825_v26  ;;  %v2073_v26 = vmax.f32 %v1712_v11, 0.0 }
 0x437   :  { %2508 = vmatpush.msra.mxu1 %v2016_v36  ;;  %v6498_v48 = vpop.f32.mrf.mxu3  ;;  %v2791_v36 = vadd.f32 %v2790_v13, %v2789_v43  ;;  %v7837_v43 = vld [vmem:[#allocation14_spill] sm:$0xff] }
 0x438   :  { %v6496_v53 = vpop.f32.mrf.mxu0  ;;  %v1706_v38 = vadd.f32 %v6158_v7, %v7837_v43 }
 0x439   :  { %2509 = vmatpush.msra.mxu1 %v2015_v33  ;;  %v2075_v33 = vmax.f32 %v1718_v9, 0.0  ;;  %v6526_v22 = vpop.f32.mrf.mxu2  ;;  %v6533_v9 = vadd.f32 %v6399_v35, %v6252_v61  ;;  %v2793_v10 = vadd.f32 %v2792_v20, %v2791_v36  ;;  %v6548_v61 = vadd.f32 %v6384_v2, %v6382_v25  ;;  %v7840_v36 = vld [vmem:[#allocation12_spill] sm:$0xff] }
 0x43a   :  { %v6563_v25 = vadd.f32 %v6444_v42, %v6280_v40  ;;  %v1700_v37 = vadd.f32 %v6158_v7, %v7840_v36  ;;  %v2071_v11 = vmax.f32 %v1706_v38, 0.0  ;;  %v1697_v40 = vadd.f32 %v6158_v7, %v7841_v15  ;;  %v7846_v36 = vld [vmem:[#allocation7_spill] sm:$0xff] }
 0x43b   :  { %2510 = vmatpush.msra.mxu1 %v2014_v58  ;;  %v6537_v58 = vadd.f32 %v6420_v47, %v6265_v57  ;;  %v6551_v57 = vadd.f32 %v2354_v60, %v6448_v18  ;;  %v7839_v47 = vld [vmem:[#allocation13_spill] sm:$0xff]  ;;  %v6587_v38 = vadd.f32 %v6474_v59, %v6297_v12  ;;  %v6603_v12 = vadd.f32 %v6498_v48, %v6480_v51 }
 0x43c   :  { %2400 = vmatmul.f32.gmra.mxu1 %v5970_v34  ;;  %2605 = vmatmul.f32.gmra.mxu3 %v5975_v6  ;;  %v2794_v34 = vsel %vm2782_vm2, %v6524_v28, 0.0  ;;  %v1703_v1 = vadd.f32 %v6158_v7, %v7839_v47  ;;  %v2804_v6 = vsel %vm2782_vm2, %v6533_v9, 0.0  ;;  %v6567_v29 = vpop.f32.mrf.mxu1  ;;  %v2807_v43 = vsel %vm2782_vm2, %v6563_v25, 0.0  ;;  %v7842_v47 = vld [vmem:[#allocation5_spill] sm:$0xff] }
 0x43d   :  { %2618 = vmatpush.msrb.mxu1 %v2077_v32  ;;  %v2074_v32 = vmax.f32 %v1715_v3, 0.0  ;;  %7838 = vst [vmem:[#allocation46_spill] sm:$0xff] %v6551_v57  ;;  %v2072_v3 = vmax.f32 %v1709_v4, 0.0  ;;  %v2828_v2 = vsel %vm2782_vm2, %v6551_v57, 0.0  ;;  %v2795_v60 = vadd.f32 %v2794_v34, %v2793_v10  ;;  %v6592_v34 = vld [vmem:[%s7695_s3 + $0x58] sm:$0xff] }
 0x43e   :  { %v2829_v18 = vadd.f32 %v2828_v2, %v2827_v8  ;;  %v6580_v8 = vld [vmem:[%s7695_s3 + $0x50] sm:$0xff]  ;;  %v2070_v4 = vmax.f32 %v1703_v1, 0.0  ;;  %v6597_v1 = vadd.f32 %v6158_v7, %v7842_v47  ;;  %7844 = vst [vmem:[#allocation44_spill] sm:$0xff] %v6603_v12  ;;  %v7848_v47 = vld [vmem:[#allocation9_spill] sm:$0xff]  ;;  %v2809_v51 = vsel %vm2782_vm2, %v6587_v38, 0.0 }
 0x43f   :  { %2619 = vmatpush.msrb.mxu1 %v2076_v21  ;;  %v6553_v35 = vpop.f32.mrf.mxu3  ;;  %v2805_v21 = vsel %vm2782_vm2, %v6537_v58, 0.0  ;;  %v7845_v2 = vld [vmem:[#allocation6_spill] sm:$0xff]  ;;  %v2830_v48 = vsel %vm2782_vm2, %v6603_v12, 0.0 }
 0x440   :  { %v6541_v13 = vpop.f32.mrf.mxu0  ;;  %v2806_v42 = vadd.f32 %v2805_v21, %v2804_v6  ;;  %v2069_v21 = vmax.f32 %v1700_v37, 0.0  ;;  %v1691_v37 = vadd.f32 %v6158_v7, %v7848_v47  ;;  %v6640_v27 = vadd.f32 %v6553_v35, %v6526_v22 }
 0x441   :  { %2620 = vmatpush.msrb.mxu1 %v2075_v33  ;;  %v2796_v33 = vsel %vm2782_vm2, %v6548_v61, 0.0  ;;  %v6573_v20 = vpop.f32.mrf.mxu2  ;;  %v1463_v35 = vadd.f32 %v6158_v7, %v6541_v13 }
 0x442   :  { %7849 = vst [vmem:[#allocation42_spill] sm:$0xff] %v6640_v27 }
 0x443   :  { %2621 = vmatpush.msrb.mxu1 %v2074_v32  ;;  %v4446_v32 = vmov 64.0  }
 0x444   :  { %2403 = vmatmul.f32.gmra.mxu1 %v6580_v8  ;;  %4397 = vrcp.f32 %v4446_v32  ;;  %2608 = vmatmul.f32.gmra.mxu3 %v6592_v34  ;;  %v2808_v32 = vadd.f32 %v2807_v43, %v2806_v42  ;;  %v2284_v57 = vpop.f32.mrf.mxu1  ;;  %v2062_v42 = vmax.f32 %v6597_v1, 0.0  ;;  %v6635_v1 = vadd.f32 %v6158_v7, %v6242_v54 }
 0x445   :  { %2622 = vmatpush.msrb.mxu1 %v2073_v26  ;;  %v2797_v26 = vadd.f32 %v2796_v33, %v2795_v60  ;;  %v6607_v60 = vadd.f32 %v6158_v7, %v7845_v2  ;;  %v7847_v33 = vld [vmem:[#allocation8_spill] sm:$0xff]  ;;  %v2831_v2 = vadd.f32 %v2830_v48, %v2829_v18  ;;  %v2066_v48 = vmax.f32 %v1691_v37, 0.0 }
 0x446   :  { %v1688_v15 = vadd.f32 %v6158_v7, %v7847_v33 }
 0x447   :  { %2623 = vmatpush.msrb.mxu1 %v2072_v3  ;;  %v7843_v3 = vld [vmem:[#allocation10_spill] sm:$0xff]  ;;  %v2363_v59 = vpop.f32.mrf.mxu3  ;;  %v2063_v43 = vmax.f32 %v6607_v60, 0.0 }
 0x448   :  { %v1465_v10 = vpop.f32.mrf.mxu0  ;;  %v1694_v6 = vadd.f32 %v6158_v7, %v7843_v3  ;;  %v2798_v3 = vrot.slane %v2797_v26, 4  ;;  %v2065_v18 = vmax.f32 %v1688_v15, 0.0 }
 0x449   :  { %2624 = vmatpush.msrb.mxu1 %v2071_v11  ;;  %v1685_v11 = vadd.f32 %v6158_v7, %v7846_v36  ;;  %v2325_v33 = vpop.f32.mrf.mxu2 }
 0x44a   :  { %v6619_v63 = vpop.eup %4397  ;;  %v2067_v36 = vmax.f32 %v1694_v6, 0.0  ;;  %v6631_v6 = vadd.f32 %v6516_v46, %v6317_v49  ;;  %v2799_v60 = vadd.f32 %v2798_v3, %v2797_v26  ;;  %v1466_v49 = vadd.f32 %v6158_v7, %v1465_v10 }
 0x44b   :  { %2625 = vmatpush.msrb.mxu1 %v2070_v4  ;;  %v2068_v4 = vmax.f32 %v1697_v40, 0.0  ;;  %v6626_v40 = vld [vmem:[%s7695_s3 + $0x60] sm:$0xff]  ;;  %v2064_v47 = vmax.f32 %v1685_v11, 0.0  ;;  %v6645_v11 = vld [vmem:[%s7695_s3 + $0x68] sm:$0xff]  ;;  %v6654_v26 = vadd.f32 %v6567_v29, %v6342_v23  ;;  %v6661_v10 = vadd.f32 %v2363_v59, %v6573_v20 }
 0x44c   :  { %2406 = vmatmul.f32.gmra.mxu1 %v6626_v40  ;;  %2611 = vmatmul.f32.gmra.mxu3 %v6645_v11  ;;  %v2811_v46 = vsel %vm2782_vm2, %v6631_v6, 0.0  ;;  %v6666_v23 = vadd.f32 %v2284_v57, %v6367_v16  ;;  %v1460_v29 = vadd.f32 %v6158_v7, %v6496_v53  ;;  %v2287_v20 = vpop.f32.mrf.mxu1  ;;  %v1991_v59 = vmax.f32 %v1466_v49, 0.0 }
 0x44d   :  { %2626 = vmatpush.msrb.mxu1 %v2069_v21  ;;  %v2810_v21 = vadd.f32 %v2809_v51, %v2808_v32  ;;  %7850 = vst [vmem:[#allocation40_spill] sm:$0xff] %v6654_v26  ;;  %v2832_v32 = vsel %vm2782_vm2, %v6640_v27, 0.0  ;;  %v2813_v51 = vsel %vm2782_vm2, %v6654_v26, 0.0  ;;  %v2834_v3 = vsel %vm2782_vm2, %v6661_v10, 0.0  ;;  %v7907_v27 = vld [vmem:[#allocation52_spill] sm:$0xff] }
 0x44e   :  { %7851 = vst [vmem:[#allocation38_spill] sm:$0xff] %v6661_v10  ;;  %v2833_v37 = vadd.f32 %v2832_v32, %v2831_v2  ;;  %v6677_v16 = vadd.f32 %v2287_v20, %v6390_v14  ;;  %v1457_v53 = vadd.f32 %v6158_v7, %v6463_v17  ;;  %v2800_v57 = vrot.slane %v2799_v60, 2 }
 0x44f   :  { %2627 = vmatpush.msrb.mxu1 %v2068_v4  ;;  %v2952_v4 = vmul.f32 64.0, %v6619_v63  ;;  %v2366_v22 = vpop.f32.mrf.mxu3  ;;  %v2812_v15 = vadd.f32 %v2811_v46, %v2810_v21  ;;  %7852 = vst [vmem:[#allocation62_spill] sm:$0xff] %v6666_v23  ;;  %v2815_v21 = vsel %vm2782_vm2, %v6666_v23, 0.0  ;;  %v1862_v32 = vadd.f32 %v6158_v7, %v6216_v55 }
 0x450   :  { %v1468_v12 = vpop.f32.mrf.mxu0  ;;  %v2835_v2 = vadd.f32 %v2834_v3, %v2833_v37  ;;  %7854 = vst [vmem:[#allocation60_spill] sm:$0xff] %v6677_v16  ;;  %v2817_v17 = vsel %vm2782_vm2, %v6677_v16, 0.0  ;;  %v1451_v3 = vadd.f32 %v6158_v7, %v6410_v50  ;;  %v1856_v50 = vadd.f32 %v6158_v7, %v6183_v5 }
 0x451   :  { %2628 = vmatpush.msrb.mxu1 %v2067_v36  ;;  %v1469_v54 = vadd.f32 %v6158_v7, %v1468_v12  ;;  %v2814_v13 = vadd.f32 %v2813_v51, %v2812_v15  ;;  %v6672_v36 = vadd.f32 %v2366_v22, %v2325_v33  ;;  %v6684_v33 = vld [vmem:[%s7695_s3 + $0x70] sm:$0xff]  ;;  %v2953_v49 = vsub.f32 1.0, %v2952_v4  ;;  %v6694_v22 = vld [vmem:[%s7695_s3 + $0x78] sm:$0xff] }
 0x452   :  { %v1865_v15 = vadd.f32 %v6158_v7, %v6229_v0  ;;  %v1454_v4 = vadd.f32 %v6158_v7, %v6431_v30  ;;  %v1988_v0 = vmax.f32 %v1457_v53, 0.0  ;;  %v1859_v30 = vadd.f32 %v6158_v7, %v6203_v62 }
 0x453   :  { %2629 = vmatpush.msrb.mxu1 %v2066_v48  ;;  %v1992_v12 = vmax.f32 %v1469_v54, 0.0  ;;  %7853 = vst [vmem:[#allocation61_spill] sm:$0xff] %v6672_v36  ;;  %v1990_v48 = vmax.f32 %v1463_v35, 0.0  ;;  %v2328_v54 = vpop.f32.mrf.mxu2  ;;  %v2954_v20 = vmul.f32 %v6619_v63, %v2953_v49  ;;  %v1445_v62 = vadd.f32 %v6158_v7, %v6373_v31 }
 0x454   :  { %2409 = vmatmul.f32.gmra.mxu1 %v6684_v33  ;;  %2614 = vmatmul.f32.gmra.mxu3 %v6694_v22  ;;  %vm2956_vm3 = vweird.f32 %v6619_v63  ;;  %v2122_v31 = vmax.f32 %v1859_v30, 0.0 }
 0x455   :  { %2630 = vmatpush.msrb.mxu1 %v2065_v18  ;;  %2418 = vmatpush.msrb.mxu2 %v1992_v12  ;;  %v2816_v18 = vadd.f32 %v2815_v21, %v2814_v13  ;;  %v2801_v12 = vadd.f32 %v2800_v57, %v2799_v60  ;;  %v2125_v13 = vmax.f32 %v6635_v1, 0.0  ;;  %v2124_v60 = vmax.f32 %v1865_v15, 0.0  ;;  %v7857_v15 = vld [vmem:[#allocation88_spill] sm:$0xff] }
 0x456   :  { %v1986_v57 = vmax.f32 %v1451_v3, 0.0  ;;  %v7859_v3 = vld [vmem:[#allocation78_spill] sm:$0xff] }
 0x457   :  { %2631 = vmatpush.msrb.mxu1 %v2064_v47  ;;  %v2836_v47 = vsel %vm2782_vm2, %v6672_v36, 0.0  ;;  %2419 = vmatpush.msrb.mxu2 %v1991_v59  ;;  %v2818_v46 = vadd.f32 %v2817_v17, %v2816_v18  ;;  %v2369_v35 = vpop.f32.mrf.mxu3  ;;  %v1987_v59 = vmax.f32 %v1454_v4, 0.0  ;;  %v2802_v21 = vrot.slane %v2801_v12, 1  ;;  %v6735_v17 = vld [vmem:[%s7694_s2] ss:$0 sm:$0xff] }
 0x458   :  { %v2837_v14 = vadd.f32 %v2836_v47, %v2835_v2  ;;  %v6703_v51 = vadd.f32 %v2369_v35, %v2328_v54  ;;  %v2123_v2 = vmax.f32 %v1862_v32, 0.0  ;;  %v2955_v18 = vadd.f32 %v6619_v63, %v2954_v20  ;;  %v7860_v20 = vld [vmem:[#allocation80_spill] sm:$0xff] }
 0x459   :  { %2632 = vmatpush.msrb.mxu1 %v2063_v43  ;;  %v1989_v43 = vmax.f32 %v1460_v29, 0.0  ;;  %2420 = vmatpush.msrb.mxu2 %v1990_v48  ;;  %v2819_v37 = vrot.slane %v2818_v46, 4  ;;  %v1448_v29 = vadd.f32 %v6158_v7, %v6394_v56  ;;  %v1850_v56 = vadd.f32 %v6158_v7, %v6130_v45  ;;  %v7856_v48 = vld [vmem:[#allocation83_spill] sm:$0xff] }
 0x45a   :  { %7855 = vst [vmem:[#allocation59_spill] sm:$0xff] %v6703_v51  ;;  %v2838_v55 = vsel %vm2782_vm2, %v6703_v51, 0.0  ;;  %v1853_v5 = vadd.f32 %v6158_v7, %v7856_v48  ;;  %v1442_v45 = vadd.f32 %v6735_v17, %v6348_v41  ;;  %v1628_v4 = vadd.f32 %v6735_v17, %v7857_v15  ;;  %v7905_v51 = vld [vmem:[#allocation54_spill] sm:$0xff] }
 0x45b   :  { %2633 = vmatpush.msrb.mxu1 %v2062_v42  ;;  %2421 = vmatpush.msrb.mxu2 %v1989_v43  ;;  %v2820_v42 = vadd.f32 %v2819_v37, %v2818_v46  ;;  %v2839_v1 = vadd.f32 %v2838_v55, %v2837_v14  ;;  %v6729_v14 = vld [vmem:[%s7695_s3] sm:$0xff]  ;;  %v1985_v7 = vmax.f32 %v1448_v29, 0.0  ;;  %v2121_v46 = vmax.f32 %v1856_v50, 0.0  ;;  %v7861_v55 = vld [vmem:[#allocation87_spill] sm:$0xff] }
 0x45c   :  { %2511 = vmatmul.f32.vlgmr.msra.gmra.mxu1 %v6415_v24  ;;  %2716 = vmatmul.f32.vlgmr.msrb.gmra.mxu3 %v6729_v14  ;;  %v2803_v43 = vadd.f32 %v2802_v21, %v2801_v12  ;;  %v1439_v32 = vadd.f32 %v6735_v17, %v6323_v39  ;;  %v1984_v37 = vmax.f32 %v1445_v62, 0.0  ;;  %v1847_v30 = vadd.f32 %v6735_v17, %v7860_v20 }
 0x45d   :  { %2422 = vmatpush.msrb.mxu2 %v1988_v0  ;;  %v2821_v53 = vrot.slane %v2820_v42, 2  ;;  %v2840_v47 = vrot.slane %v2839_v1, 4  ;;  %2741 = vmatpush.msra.mxu1 %v2125_v13  ;;  %v6746_v13 = vsel %vm2956_vm3, %v6619_v63, %v2955_v18  ;;  %v1844_v0 = vadd.f32 %v6735_v17, %v7859_v3  ;;  %v7863_v18 = vld [vmem:[#allocation76_spill] sm:$0xff] }
 0x45e   :  { %7858 = vst [vmem:[#allocation58_spill] sm:$0xff] %v6746_v13  ;;  %v1625_v39 = vadd.f32 %v6735_v17, %v7861_v55  ;;  %v2119_v63 = vmax.f32 %v1850_v56, 0.0  ;;  %v2958_v50 = vmul.f32 %v6746_v13, %v2803_v43  ;;  %v2045_v62 = vmax.f32 %v1628_v4, 0.0  ;;  %v6769_v56 = vld [vmem:[%s7695_s3 + $0x10] sm:$0xff] }
 0x45f   :  { %2423 = vmatpush.msrb.mxu2 %v1987_v59  ;;  %v2822_v49 = vadd.f32 %v2821_v53, %v2820_v42  ;;  %v2841_v54 = vadd.f32 %v2840_v47, %v2839_v1  ;;  %2742 = vmatpush.msra.mxu1 %v2124_v60  ;;  %v2120_v42 = vmax.f32 %v1853_v5, 0.0  ;;  %v1983_v60 = vmax.f32 %v1442_v45, 0.0  ;;  %v7862_v59 = vld [vmem:[#allocation86_spill] sm:$0xff]  ;;  %v7864_v5 = vld [vmem:[#allocation85_spill] sm:$0xff] }
 0x460   :  { %v1622_v1 = vadd.f32 %v6735_v17, %v7862_v59  ;;  %v1982_v53 = vmax.f32 %v1439_v32, 0.0  ;;  %v1841_v47 = vadd.f32 %v6735_v17, %v7863_v18  ;;  %v2118_v48 = vmax.f32 %v1847_v30, 0.0 }
 0x461   :  { %2424 = vmatpush.msrb.mxu2 %v1986_v57  ;;  %v2823_v35 = vrot.slane %v2822_v49, 1  ;;  %v2842_v41 = vrot.slane %v2841_v54, 2  ;;  %2743 = vmatpush.msra.mxu1 %v2123_v2  ;;  %v6760_v2 = vld [vmem:[%s7695_s3 + $0x18] sm:$0xff]  ;;  %v2117_v15 = vmax.f32 %v1844_v0, 0.0  ;;  %v6789_v0 = vld [vmem:[%s7695_s3 + $0x28] sm:$0xff] }
 0x462   :  { %v2043_v4 = vmax.f32 %v1622_v1, 0.0 }
 0x463   :  { %2425 = vmatpush.msrb.mxu2 %v1985_v7  ;;  %v2824_v12 = vadd.f32 %v2823_v35, %v2822_v49  ;;  %v2843_v29 = vadd.f32 %v2842_v41, %v2841_v54  ;;  %2744 = vmatpush.msra.mxu1 %v2122_v31  ;;  %v1619_v49 = vadd.f32 %v6735_v17, %v7864_v5  ;;  %v2044_v31 = vmax.f32 %v1625_v39, 0.0  ;;  %v7865_v54 = vld [vmem:[#allocation74_spill] sm:$0xff]  ;;  %v7866_v35 = vld [vmem:[#allocation72_spill] sm:$0xff] }
 0x464   :  { %2514 = vmatmul.f32.gmra.mxu1 %v6760_v2  ;;  %2719 = vmatmul.f32.gmra.mxu3 %v6769_v56  ;;  %v1835_v32 = vadd.f32 %v6735_v17, %v7866_v35  ;;  %v7867_v41 = vld [vmem:[#allocation84_spill] sm:$0xff]  ;;  %v7870_v39 = vld [vmem:[#allocation82_spill] sm:$0xff] }
 0x465   :  { %2426 = vmatpush.msrb.mxu2 %v1984_v37  ;;  %v2959_v21 = vmul.f32 %v6746_v13, %v2824_v12  ;;  %v2844_v57 = vrot.slane %v2843_v29, 1  ;;  %2745 = vmatpush.msra.mxu1 %v2121_v46  ;;  %v1838_v46 = vadd.f32 %v6735_v17, %v7865_v54  ;;  %v2116_v37 = vmax.f32 %v1841_v47, 0.0  ;;  %v7869_v12 = vld [vmem:[#allocation70_spill] sm:$0xff]  ;;  %v7874_v47 = vld [vmem:[#allocation79_spill] sm:$0xff] }
 0x466   :  { %v1616_v3 = vadd.f32 %v6735_v17, %v7867_v41  ;;  %v2042_v20 = vmax.f32 %v1619_v49, 0.0  ;;  %v2114_v1 = vmax.f32 %v1835_v32, 0.0  ;;  %v7875_v49 = vld [vmem:[#allocation64_spill] sm:$0xff] }
 0x467   :  { %2427 = vmatpush.msrb.mxu2 %v1983_v60  ;;  %v2845_v45 = vadd.f32 %v2844_v57, %v2843_v29  ;;  %2746 = vmatpush.msra.mxu1 %v2120_v42  ;;  %v3974_v7 = vsel %vm3930_vm4, %v2959_v21, %v2958_v50  ;;  %v1832_v42 = vadd.f32 %v6735_v17, %v7869_v12  ;;  %v2115_v55 = vmax.f32 %v1838_v46, 0.0  ;;  %v6799_v29 = vld [vmem:[%s7695_s3 + $0x20] sm:$0xff]  ;;  %v7872_v50 = vld [vmem:[#allocation81_spill] sm:$0xff] }
 0x468   :  { %v1613_v60 = vadd.f32 %v6735_v17, %v7870_v39  ;;  %v1610_v21 = vadd.f32 %v6735_v17, %v7872_v50  ;;  %v7881_v50 = vld [vmem:[#allocation67_spill] sm:$0xff] }
 0x469   :  { %2428 = vmatpush.msrb.mxu2 %v1982_v53  ;;  %v2960_v43 = vmul.f32 %v6746_v13, %v2845_v45  ;;  %2747 = vmatpush.msra.mxu1 %v2119_v63  ;;  %v7871_v63 = vld [vmem:[#allocation68_spill] sm:$0xff]  ;;  %v2041_v53 = vmax.f32 %v1616_v3, 0.0  ;;  %v2113_v18 = vmax.f32 %v1832_v42, 0.0  ;;  %v7878_v3 = vld [vmem:[#allocation73_spill] sm:$0xff]  ;;  %v7879_v42 = vld [vmem:[#allocation71_spill] sm:$0xff] }
 0x46a   :  { %2429 = vmatmul.f32.vlgmr.msrb.gmra.mxu2 %v6415_v24  ;;  %v1829_v59 = vadd.f32 %v6735_v17, %v7871_v63  ;;  %v2040_v5 = vmax.f32 %v1613_v60, 0.0  ;;  %v2039_v46 = vmax.f32 %v1610_v21, 0.0  ;;  %v7880_v60 = vld [vmem:[#allocation69_spill] sm:$0xff]  ;;  %v1589_v21 = vadd.f32 %v6735_v17, %v7881_v50 }
 0x46b   :  { %2536 = vmatpush.msra.mxu2 %v2045_v62  ;;  %2748 = vmatpush.msra.mxu1 %v2118_v48  ;;  %v6784_v30 = vsel %vm3932_vm5, %v2960_v43, %v3974_v7  ;;  %v7873_v62 = vld [vmem:[#allocation66_spill] sm:$0xff]  ;;  %v1607_v48 = vadd.f32 %v6735_v17, %v7874_v47  ;;  %v7876_v7 = vld [vmem:[#allocation77_spill] sm:$0xff]  ;;  %v7877_v43 = vld [vmem:[#allocation75_spill] sm:$0xff]  ;;  %v1592_v63 = vadd.f32 %v6735_v17, %v7880_v60 }
 0x46c   :  { %7868 = vst [vmem:[#allocation57_spill] sm:$0xff] %v6784_v30  ;;  %2517 = vmatmul.f32.gmra.mxu1 %v6789_v0  ;;  %2722 = vmatmul.f32.gmra.mxu3 %v6799_v29  ;;  %v1826_v57 = vadd.f32 %v6735_v17, %v7873_v62  ;;  %v2112_v45 = vmax.f32 %v1829_v59, 0.0  ;;  %v1604_v54 = vadd.f32 %v6735_v17, %v7876_v7  ;;  %v6847_v62 = vld [vmem:[%s7695_s3 + $0x40] sm:$0xff] }
 0x46d   :  { %2537 = vmatpush.msra.mxu2 %v2044_v31  ;;  %2749 = vmatpush.msra.mxu1 %v2117_v15  ;;  %v1823_v31 = vadd.f32 %v6735_v17, %v7875_v49  ;;  %v6818_v15 = vld [vmem:[%s7695_s3 + $0x38] sm:$0xff]  ;;  %v1601_v35 = vadd.f32 %v6735_v17, %v7877_v43  ;;  %v2038_v32 = vmax.f32 %v1607_v48, 0.0  ;;  %v2033_v47 = vmax.f32 %v1592_v63, 0.0  ;;  %v7886_v43 = vld [vmem:[#allocation34_spill] sm:$0xff] }
 0x46e   :  { %v2037_v12 = vmax.f32 %v1604_v54, 0.0  ;;  %v7883_v48 = vld [vmem:[#allocation63_spill] sm:$0xff]  ;;  %v2032_v49 = vmax.f32 %v1589_v21, 0.0 }
 0x46f   :  { %2538 = vmatpush.msra.mxu2 %v2043_v4  ;;  %2750 = vmatpush.msra.mxu1 %v2116_v37  ;;  %v2111_v4 = vmax.f32 %v1826_v57, 0.0  ;;  %v6826_v37 = vld [vmem:[%s7695_s3 + $0x30] sm:$0xff]  ;;  %v2110_v41 = vmax.f32 %v1823_v31, 0.0  ;;  %v2036_v39 = vmax.f32 %v1601_v35, 0.0  ;;  %v7882_v57 = vld [vmem:[#allocation65_spill] sm:$0xff]  ;;  %v7884_v31 = vld [vmem:[#allocation36_spill] sm:$0xff]  ;;  %v1766_v35 = vadd.f32 %v6735_v17, %v7886_v43 }
 0x470   :  { %v7885_v54 = vld [vmem:[#allocation35_spill] sm:$0xff] }
 0x471   :  { %2539 = vmatpush.msra.mxu2 %v2042_v20  ;;  %2751 = vmatpush.msra.mxu1 %v2115_v55  ;;  %v1598_v20 = vadd.f32 %v6735_v17, %v7878_v3  ;;  %v1595_v55 = vadd.f32 %v6735_v17, %v7879_v42 }
 0x472   :  { %2432 = vmatmul.f32.gmra.mxu2 %v6760_v2 }
 0x473   :  { %2540 = vmatpush.msra.mxu2 %v2041_v53  ;;  %2752 = vmatpush.msra.mxu1 %v2114_v1  ;;  %v2035_v59 = vmax.f32 %v1598_v20, 0.0  ;;  %v6839_v1 = vld [vmem:[%s7695_s3 + $0x48] sm:$0xff]  ;;  %v2034_v53 = vmax.f32 %v1595_v55, 0.0  ;;  %v2091_v55 = vmax.f32 %v1766_v35, 0.0 }
 0x474   :  { %2520 = vmatmul.f32.gmra.mxu1 %v6818_v15  ;;  %2725 = vmatmul.f32.gmra.mxu3 %v6826_v37 }
 0x475   :  { %2541 = vmatpush.msra.mxu2 %v2040_v5  ;;  %2753 = vmatpush.msra.mxu1 %v2113_v18  ;;  %v1586_v18 = vadd.f32 %v6735_v17, %v7882_v57  ;;  %v1583_v5 = vadd.f32 %v6735_v17, %v7883_v48 }
 0x477   :  { %2542 = vmatpush.msra.mxu2 %v2039_v46  ;;  %2754 = vmatpush.msra.mxu1 %v2112_v45  ;;  %v1772_v45 = vadd.f32 %v6735_v17, %v7884_v31  ;;  %v2031_v7 = vmax.f32 %v1586_v18, 0.0  ;;  %v1769_v46 = vadd.f32 %v6735_v17, %v7885_v54 }
 0x479   :  { %2543 = vmatpush.msra.mxu2 %v2038_v32  ;;  %2755 = vmatpush.msra.mxu1 %v2111_v4  ;;  %v2030_v4 = vmax.f32 %v1583_v5, 0.0  ;;  %v2093_v32 = vmax.f32 %v1772_v45, 0.0  ;;  %v2092_v20 = vmax.f32 %v1769_v46, 0.0 }
 0x47a   :  { %2435 = vmatmul.f32.gmra.mxu2 %v6789_v0 }
 0x47b   :  { %2544 = vmatpush.msra.mxu2 %v2037_v12  ;;  %2756 = vmatpush.msra.mxu1 %v2110_v41  ;;  %v7887_v41 = vld [vmem:[#allocation33_spill] sm:$0xff]  ;;  %v7888_v12 = vld [vmem:[#allocation32_spill] sm:$0xff] }
 0x47c   :  { %2523 = vmatmul.f32.gmra.mxu1 %v6839_v1  ;;  %2728 = vmatmul.f32.gmra.mxu3 %v6847_v62  ;;  %v1763_v3 = vadd.f32 %v6735_v17, %v7887_v41  ;;  %v1760_v42 = vadd.f32 %v6735_v17, %v7888_v12  ;;  %v7896_v41 = vld [vmem:[#allocation24_spill] sm:$0xff]  ;;  %v7897_v12 = vld [vmem:[#allocation23_spill] sm:$0xff] }
 0x47d   :  { %2545 = vmatpush.msra.mxu2 %v2036_v39  ;;  %v7889_v39 = vld [vmem:[#allocation31_spill] sm:$0xff] }
 0x47e   :  { %v1757_v60 = vadd.f32 %v6735_v17, %v7889_v39  ;;  %v2090_v63 = vmax.f32 %v1763_v3, 0.0  ;;  %v2089_v21 = vmax.f32 %v1760_v42, 0.0  ;;  %v1736_v3 = vadd.f32 %v6735_v17, %v7896_v41  ;;  %v7898_v39 = vld [vmem:[#allocation22_spill] sm:$0xff] }
 0x47f   :  { %2546 = vmatpush.msra.mxu2 %v2035_v59  ;;  %v7890_v59 = vld [vmem:[#allocation30_spill] sm:$0xff]  ;;  %v1733_v42 = vadd.f32 %v6735_v17, %v7897_v12 }
 0x480   :  { %v1754_v50 = vadd.f32 %v6735_v17, %v7890_v59  ;;  %v2088_v18 = vmax.f32 %v1757_v60, 0.0  ;;  %v1730_v60 = vadd.f32 %v6735_v17, %v7898_v39  ;;  %v7899_v59 = vld [vmem:[#allocation21_spill] sm:$0xff] }
 0x481   :  { %2547 = vmatpush.msra.mxu2 %v2034_v53  ;;  %v7891_v53 = vld [vmem:[#allocation29_spill] sm:$0xff] }
 0x482   :  { %2438 = vmatmul.f32.gmra.mxu2 %v6818_v15  ;;  %v1751_v57 = vadd.f32 %v6735_v17, %v7891_v53  ;;  %v2087_v5 = vmax.f32 %v1754_v50, 0.0  ;;  %v1727_v50 = vadd.f32 %v6735_v17, %v7899_v59 }
 0x483   :  { %2548 = vmatpush.msra.mxu2 %v2033_v47  ;;  %v7892_v47 = vld [vmem:[#allocation28_spill] sm:$0xff] }
 0x484   :  { %2526 = vmatmul.f32.gmra.mxu1 %v6592_v34  ;;  %2731 = vmatmul.f32.gmra.mxu3 %v6580_v8  ;;  %v1748_v48 = vadd.f32 %v6735_v17, %v7892_v47  ;;  %v2086_v45 = vmax.f32 %v1751_v57, 0.0  ;;  %v2079_v57 = vmax.f32 %v1730_v60, 0.0 }
 0x485   :  { %2549 = vmatpush.msra.mxu2 %v2032_v49  ;;  %v7893_v49 = vld [vmem:[#allocation27_spill] sm:$0xff] }
 0x486   :  { %v1745_v31 = vadd.f32 %v6735_v17, %v7893_v49  ;;  %v2085_v46 = vmax.f32 %v1748_v48, 0.0 }
 0x487   :  { %2550 = vmatpush.msra.mxu2 %v2031_v7  ;;  %v7894_v7 = vld [vmem:[#allocation26_spill] sm:$0xff] }
 0x488   :  { %v1742_v54 = vadd.f32 %v6735_v17, %v7894_v7  ;;  %v2084_v35 = vmax.f32 %v1745_v31, 0.0  ;;  %v20_v31 = vld [vmem:[%s7693_s1 + $0x10] sm:$0xff] }
 0x489   :  { %2551 = vmatpush.msra.mxu2 %v2030_v4  ;;  %v7895_v4 = vld [vmem:[#allocation25_spill] sm:$0xff] }
 0x48a   :  { %2441 = vmatmul.f32.gmra.mxu2 %v6839_v1  ;;  %v1739_v43 = vadd.f32 %v6735_v17, %v7895_v4 }
 0x48b   :  { %2659 = vmatpush.msrb.mxu2 %v2093_v32 }
 0x48c   :  { %2529 = vmatmul.f32.gmra.mxu1 %v6645_v11  ;;  %2734 = vmatmul.f32.gmra.mxu3 %v6626_v40 }
 0x48d   :  { %2660 = vmatpush.msrb.mxu2 %v2092_v20  ;;  %v2083_v20 = vmax.f32 %v1742_v54, 0.0 }
 0x48f   :  { %2661 = vmatpush.msrb.mxu2 %v2091_v55  ;;  %v2082_v55 = vmax.f32 %v1739_v43, 0.0 }
 0x491   :  { %2662 = vmatpush.msrb.mxu2 %v2090_v63  ;;  %v2081_v63 = vmax.f32 %v1736_v3, 0.0 }
 0x492   :  { %2444 = vmatmul.f32.gmra.mxu2 %v6592_v34 }
 0x493   :  { %2663 = vmatpush.msrb.mxu2 %v2089_v21  ;;  %v2080_v21 = vmax.f32 %v1733_v42, 0.0 }
 0x494   :  { %2532 = vmatmul.f32.gmra.mxu1 %v6694_v22  ;;  %2737 = vmatmul.f32.gmra.mxu3 %v6684_v33 }
 0x495   :  { %2664 = vmatpush.msrb.mxu2 %v2088_v18  ;;  %v2078_v18 = vmax.f32 %v1727_v50, 0.0 }
 0x497   :  { %2665 = vmatpush.msrb.mxu2 %v2087_v5 }
 0x499   :  { %2666 = vmatpush.msrb.mxu2 %v2086_v45  ;;  %v6887_v32 = vpop.f32.mrf.mxu1 }
 0x49a   :  { %2447 = vmatmul.f32.gmra.mxu2 %v6645_v11 }
 0x49b   :  { %2667 = vmatpush.msrb.mxu2 %v2085_v46 }
 0x49c   :  { %2634 = vmatmul.f32.vlgmr.msrb.gmra.mxu1 %v6729_v14 }
 0x49d   :  { %2668 = vmatpush.msrb.mxu2 %v2084_v35 }
 0x49f   :  { %2669 = vmatpush.msrb.mxu2 %v2083_v20 }
 0x4a1   :  { %2670 = vmatpush.msrb.mxu2 %v2082_v55  ;;  %v6899_v53 = vpop.f32.mrf.mxu1 }
 0x4a2   :  { %2450 = vmatmul.f32.gmra.mxu2 %v6694_v22 }
 0x4a3   :  { %2671 = vmatpush.msrb.mxu2 %v2081_v63 }
 0x4a4   :  { %2637 = vmatmul.f32.gmra.mxu1 %v6769_v56 }
 0x4a5   :  { %2672 = vmatpush.msrb.mxu2 %v2080_v21 }
 0x4a7   :  { %2673 = vmatpush.msrb.mxu2 %v2079_v57 }
 0x4a9   :  { %2674 = vmatpush.msrb.mxu2 %v2078_v18  ;;  %v6903_v47 = vpop.f32.mrf.mxu1  ;;  %v7903_v18 = vld [vmem:[#allocation56_spill] sm:$0xff] }
 0x4aa   :  { %2552 = vmatmul.f32.vlgmr.msra.gmra.mxu2 %v6729_v14 }
 0x4ab   :  { %3173 = vmatpush.msra.mxu2 %v20_v31 }
 0x4ac   :  { %2640 = vmatmul.f32.gmra.mxu1 %v6799_v29 }
 0x4b1   :  { %v6907_v17 = vpop.f32.mrf.mxu1 }
 0x4b2   :  { %2555 = vmatmul.f32.gmra.mxu2 %v6769_v56  ;;  %v6923_v56 = vpop.f32.mrf.mxu3 }
 0x4b4   :  { %2643 = vmatmul.f32.gmra.mxu1 %v6826_v37 }
 0x4b9   :  { %v6912_v48 = vpop.f32.mrf.mxu1 }
 0x4ba   :  { %2558 = vmatmul.f32.gmra.mxu2 %v6799_v29  ;;  %v6929_v49 = vpop.f32.mrf.mxu3 }
 0x4bc   :  { %2646 = vmatmul.f32.gmra.mxu1 %v6847_v62 }
 0x4c1   :  { %v6916_v5 = vpop.f32.mrf.mxu1 }
 0x4c2   :  { %2561 = vmatmul.f32.gmra.mxu2 %v6826_v37 }
 0x4c4   :  { %2649 = vmatmul.f32.gmra.mxu1 %v6580_v8 }
 0x4c9   :  { %v6920_v14 = vpop.f32.mrf.mxu1 }
 0x4ca   :  { %2564 = vmatmul.f32.gmra.mxu2 %v6847_v62  ;;  %v6935_v62 = vpop.f32.mrf.mxu3 }
 0x4cc   :  { %2652 = vmatmul.f32.gmra.mxu1 %v6626_v40 }
 0x4d1   :  { %v6926_v29 = vpop.f32.mrf.mxu1 }
 0x4d2   :  { %2567 = vmatmul.f32.gmra.mxu2 %v6580_v8  ;;  %v6944_v45 = vpop.f32.mrf.mxu3 }
 0x4d4   :  { %2655 = vmatmul.f32.gmra.mxu1 %v6684_v33 }
 0x4d9   :  { %v6932_v37 = vpop.f32.mrf.mxu1 }
 0x4da   :  { %2570 = vmatmul.f32.gmra.mxu2 %v6626_v40  ;;  %v6952_v54 = vpop.f32.mrf.mxu3 }
 0x4dc   :  { %2757 = vmatmul.f32.vlgmr.msra.gmra.mxu1 %v6415_v24 }
 0x4e1   :  { %v6941_v8 = vpop.f32.mrf.mxu1 }
 0x4e2   :  { %2573 = vmatmul.f32.gmra.mxu2 %v6684_v33  ;;  %v6960_v4 = vpop.f32.mrf.mxu3 }
 0x4e4   :  { %2760 = vmatmul.f32.gmra.mxu1 %v6760_v2 }
 0x4e9   :  { %v6947_v40 = vpop.f32.mrf.mxu1 }
 0x4ea   :  { %2675 = vmatmul.f32.vlgmr.msrb.gmra.mxu2 %v6415_v24  ;;  %v6968_v35 = vpop.f32.mrf.mxu3 }
 0x4ec   :  { %2763 = vmatmul.f32.gmra.mxu1 %v6789_v0 }
 0x4ed   :  { %v6949_v7 = vpop.f32.mrf.mxu2 }
 0x4f1   :  { %v6955_v46 = vpop.f32.mrf.mxu1 }
 0x4f2   :  { %2678 = vmatmul.f32.gmra.mxu2 %v6760_v2  ;;  %v19_v2 = vld [vmem:[%s7693_s1 + $0x8] sm:$0xff] }
 0x4f3   :  { %3174 = vmatpush.msra.mxu2 %v19_v2 }
 0x4f4   :  { %2766 = vmatmul.f32.gmra.mxu1 %v6818_v15 }
 0x4f5   :  { %v6957_v33 = vpop.f32.mrf.mxu2 }
 0x4f9   :  { %v6963_v24 = vpop.f32.mrf.mxu1 }
 0x4fa   :  { %2681 = vmatmul.f32.gmra.mxu2 %v6789_v0  ;;  %v6979_v0 = vpop.f32.mrf.mxu3 }
 0x4fc   :  { %2769 = vmatmul.f32.gmra.mxu1 %v6839_v1 }
 0x4fd   :  { %v6965_v43 = vpop.f32.mrf.mxu2 }
 0x501   :  { %v6974_v41 = vpop.f32.mrf.mxu1 }
 0x502   :  { %2684 = vmatmul.f32.gmra.mxu2 %v6818_v15  ;;  %v6987_v42 = vpop.f32.mrf.mxu3 }
 0x504   :  { %2772 = vmatmul.f32.gmra.mxu1 %v6592_v34 }
 0x505   :  { %v6976_v3 = vpop.f32.mrf.mxu2 }
 0x509   :  { %v6982_v20 = vpop.f32.mrf.mxu1 }
 0x50a   :  { %2687 = vmatmul.f32.gmra.mxu2 %v6839_v1  ;;  %v6995_v39 = vpop.f32.mrf.mxu3 }
 0x50c   :  { %2775 = vmatmul.f32.gmra.mxu1 %v6645_v11 }
 0x50d   :  { %v6984_v12 = vpop.f32.mrf.mxu2 }
 0x511   :  { %v6990_v15 = vpop.f32.mrf.mxu1 }
 0x512   :  { %2690 = vmatmul.f32.gmra.mxu2 %v6592_v34  ;;  %v7002_v63 = vpop.f32.mrf.mxu3 }
 0x514   :  { %2778 = vmatmul.f32.gmra.mxu1 %v6694_v22 }
 0x515   :  { %v6992_v55 = vpop.f32.mrf.mxu2 }
 0x519   :  { %v6998_v1 = vpop.f32.mrf.mxu1 }
 0x51a   :  { %2693 = vmatmul.f32.gmra.mxu2 %v6645_v11  ;;  %7900 = vst [vmem:[#allocation55_spill] sm:$0xff] %v6998_v1  ;;  %v7009_v50 = vpop.f32.mrf.mxu3 }
 0x51d   :  { %v7000_v60 = vpop.f32.mrf.mxu2 }
 0x521   :  { %v7005_v59 = vpop.f32.mrf.mxu1 }
 0x522   :  { %2696 = vmatmul.f32.gmra.mxu2 %v6694_v22  ;;  %7901 = vst [vmem:[#allocation53_spill] sm:$0xff] %v7005_v59  ;;  %v7017_v57 = vpop.f32.mrf.mxu3 }
 0x525   :  { %v7007_v34 = vpop.f32.mrf.mxu2 }
 0x529   :  { %v7013_v21 = vpop.f32.mrf.mxu1 }
 0x52a   :  { %4287 = vmatmul.msk.f32.vlgmr.msra.gmra.mxu2 %vm2782_vm2, %v6436_v19  ;;  %7902 = vst [vmem:[#allocation51_spill] sm:$0xff] %v7013_v21  ;;  %v2609_v2 = vpop.f32.mrf.mxu3 }
 0x52d   :  { %v7015_v11 = vpop.f32.mrf.mxu2 }
 0x531   :  { %v7021_v31 = vpop.f32.mrf.mxu1 }
 0x532   :  { %4288 = vmatmul.msk.f32.gmra.mxu2 %vm2782_vm2, %v7903_v18  ;;  %7904 = vst [vmem:[#allocation49_spill] sm:$0xff] %v7021_v31  ;;  %v2612_v10 = vpop.f32.mrf.mxu3 }
 0x535   :  { %v7023_v22 = vpop.f32.mrf.mxu2 }
 0x539   :  { %v7027_v36 = vpop.f32.mrf.mxu1 }
 0x53a   :  { %4289 = vmatmul.msk.f32.gmra.mxu2 %vm2782_vm2, %v7905_v51  ;;  %7906 = vst [vmem:[#allocation47_spill] sm:$0xff] %v7027_v36  ;;  %v7037_v18 = vpop.f32.mrf.mxu3 }
 0x53d   :  { %v7029_v19 = vpop.f32.mrf.mxu2 }
 0x541   :  { %v7033_v30 = vpop.f32.mrf.mxu1 }
 0x542   :  { %4290 = vmatmul.msk.f32.gmra.mxu2 %vm2782_vm2, %v7907_v27  ;;  %7908 = vst [vmem:[#allocation45_spill] sm:$0xff] %v7033_v30  ;;  %v2717_v36 = vpop.f32.mrf.mxu3 }
 0x545   :  { %v7035_v13 = vpop.f32.mrf.mxu2 }
 0x549   :  { %v7041_v16 = vpop.f32.mrf.mxu1 }
 0x54a   :  { %4291 = vmatmul.msk.f32.gmra.mxu2 %vm2782_vm2, %v6486_v44  ;;  %7909 = vst [vmem:[#allocation43_spill] sm:$0xff] %v7041_v16  ;;  %v2720_v30 = vpop.f32.mrf.mxu3 }
 0x54d   :  { %v7043_v51 = vpop.f32.mrf.mxu2 }
 0x551   :  { %v7047_v23 = vpop.f32.mrf.mxu1 }
 0x552   :  { %4292 = vmatmul.msk.f32.gmra.mxu2 %vm2782_vm2, %v6505_v52  ;;  %7910 = vst [vmem:[#allocation41_spill] sm:$0xff] %v7047_v23  ;;  %v2723_v16 = vpop.f32.mrf.mxu3 }
 0x555   :  { %v2568_v27 = vpop.f32.mrf.mxu2 }
 0x556   :  { %v7049_v31 = vadd.f32 %v2609_v2, %v2568_v27 }
 0x559   :  { %v2758_v21 = vpop.f32.mrf.mxu1 }
 0x55a   :  { %4293 = vmatmul.msk.f32.gmra.mxu2 %vm2782_vm2, %v6524_v28  ;;  %v2726_v52 = vpop.f32.mrf.mxu3 }
 0x55d   :  { %v2571_v1 = vpop.f32.mrf.mxu2 }
 0x55e   :  { %v7053_v44 = vadd.f32 %v2612_v10, %v2571_v1  ;;  %v7067_v1 = vadd.f32 %v6932_v37, %v6923_v56  ;;  %v7085_v37 = vadd.f32 %v2758_v21, %v2717_v36 }
 0x560   :  { %7911 = vst [vmem:[#allocation39_spill] sm:$0xff] %v7053_v44 }
 0x561   :  { %v2761_v59 = vpop.f32.mrf.mxu1  ;;  %7913 = vst [vmem:[#allocation37_spill] sm:$0xff] %v7067_v1 }
 0x562   :  { %4294 = vmatmul.msk.f32.gmra.mxu2 %vm2782_vm2, %v6548_v61  ;;  %v2729_v10 = vpop.f32.mrf.mxu3  ;;  %v7071_v61 = vadd.f32 %v6941_v8, %v6929_v49  ;;  %v7087_v49 = vadd.f32 %v2761_v59, %v2720_v30  ;;  %v7125_v59 = vadd.f32 %v6976_v3, %v6907_v17  ;;  %v7139_v17 = vadd.f32 %v6974_v41, %v6960_v4 }
 0x563   :  { %v7157_v4 = vadd.f32 %v6987_v42, %v7015_v11  ;;  %v7175_v11 = vadd.f32 %v6982_v20, %v6968_v35 }
 0x564   :  { %7914 = vst [vmem:[#allocation19_spill] sm:$0xff] %v7071_v61  ;;  %v2931_v36 = vsel %vm2782_vm2, %v7087_v49, 0.0 }
 0x565   :  { %v7057_v26 = vpop.f32.mrf.mxu2 }
 0x569   :  { %v2764_v2 = vpop.f32.mrf.mxu1 }
 0x56a   :  { %4295 = vmatmul.msk.f32.gmra.mxu2 %vm2782_vm2, %v6533_v9  ;;  %v2867_v9 = vsel %vm2782_vm2, %v7067_v1, 0.0  ;;  %v7105_v30 = vadd.f32 %v2764_v2, %v2723_v16  ;;  %v7145_v2 = vadd.f32 %v6995_v39, %v7023_v22  ;;  %v7161_v39 = vadd.f32 %v7002_v63, %v7029_v19 }
 0x56b   :  { %v7181_v19 = vadd.f32 %v7009_v50, %v7035_v13  ;;  %v7197_v13 = vadd.f32 %v7017_v57, %v7043_v51 }
 0x56c   :  { %v2889_v63 = vsel %vm2782_vm2, %v7145_v2, 0.0  ;;  %v2891_v20 = vsel %vm2782_vm2, %v7161_v39, 0.0 }
 0x56d   :  { %v7061_v27 = vpop.f32.mrf.mxu2 }
 0x56e   :  { %7912 = vst [vmem:[#allocation20_spill] sm:$0xff] %v7061_v27  ;;  %v2868_v27 = vsel %vm2782_vm2, %v7071_v61, 0.0  ;;  %v7093_v61 = vadd.f32 %v6955_v46, %v6944_v45  ;;  %v7113_v45 = vadd.f32 %v6965_v43, %v6903_v47 }
 0x56f   :  { %v2869_v8 = vadd.f32 %v2868_v27, %v2867_v9  ;;  %v2851_v27 = vsel %vm2782_vm2, %v7125_v59, 0.0 }
 0x571   :  { %v2767_v28 = vpop.f32.mrf.mxu1 }
 0x572   :  { %4296 = vmatmul.msk.f32.gmra.mxu2 %vm2782_vm2, %v6537_v58  ;;  %v7081_v58 = vadd.f32 %v6947_v40, %v6935_v62  ;;  %v7099_v62 = vadd.f32 %v6957_v33, %v6899_v53  ;;  %v7109_v40 = vadd.f32 %v6949_v7, %v6887_v32  ;;  %v2872_v53 = vsel %vm2782_vm2, %v7093_v61, 0.0 }
 0x573   :  { %v7119_v33 = vadd.f32 %v6963_v24, %v6952_v54  ;;  %v2933_v7 = vsel %vm2782_vm2, %v7105_v30, 0.0  ;;  %v7131_v43 = vadd.f32 %v2767_v28, %v2726_v52  ;;  %v2849_v24 = vsel %vm2782_vm2, %v7113_v45, 0.0 }
 0x574   :  { %v2870_v1 = vsel %vm2782_vm2, %v7081_v58, 0.0  ;;  %v2847_v16 = vsel %vm2782_vm2, %v7099_v62, 0.0  ;;  %v2846_v54 = vsel %vm2782_vm2, %v7109_v40, 0.0  ;;  %v7153_v28 = vadd.f32 %v6984_v12, %v6912_v48 }
 0x575   :  { %v7073_v23 = vpop.f32.mrf.mxu2  ;;  %v2871_v46 = vadd.f32 %v2870_v1, %v2869_v8  ;;  %v2848_v3 = vadd.f32 %v2847_v16, %v2846_v54  ;;  %v2935_v22 = vsel %vm2782_vm2, %v7131_v43, 0.0  ;;  %v7169_v48 = vadd.f32 %v6992_v55, %v6916_v5 }
 0x576   :  { %7915 = vst [vmem:[#allocation18_spill] sm:$0xff] %v7073_v23  ;;  %v2732_v23 = vpop.f32.mrf.mxu3  ;;  %v2876_v12 = vsel %vm2782_vm2, %v7139_v17, 0.0  ;;  %v7187_v5 = vadd.f32 %v7000_v60, %v6920_v14  ;;  %v2888_v55 = vsel %vm2782_vm2, %v7157_v4, 0.0  ;;  %v2893_v16 = vsel %vm2782_vm2, %v7181_v19, 0.0 }
 0x577   :  { %v2873_v21 = vadd.f32 %v2872_v53, %v2871_v46  ;;  %v2850_v9 = vadd.f32 %v2849_v24, %v2848_v3  ;;  %v2855_v60 = vsel %vm2782_vm2, %v7169_v48, 0.0 }
 0x578   :  { %v2857_v51 = vsel %vm2782_vm2, %v7187_v5, 0.0 }
 0x579   :  { %v2770_v56 = vpop.f32.mrf.mxu1  ;;  %v2852_v42 = vadd.f32 %v2851_v27, %v2850_v9  ;;  %v7231_v9 = vadd.f32 %v7037_v18, %v7057_v26 }
 0x57a   :  { %4297 = vmatmul.msk.f32.gmra.mxu2 %vm2782_vm2, %v6563_v25  ;;  %v2930_v25 = vsel %vm2782_vm2, %v7085_v37, 0.0  ;;  %v7165_v8 = vadd.f32 %v2770_v56, %v2729_v10  ;;  %v2853_v10 = vsel %vm2782_vm2, %v7153_v28, 0.0 }
 0x57b   :  { %v2932_v32 = vadd.f32 %v2931_v36, %v2930_v25  ;;  %v7207_v36 = vadd.f32 %v7007_v34, %v6926_v29  ;;  %v2854_v46 = vadd.f32 %v2853_v10, %v2852_v42  ;;  %v2895_v29 = vsel %vm2782_vm2, %v7197_v13, 0.0 }
 0x57c   :  { %v2937_v50 = vsel %vm2782_vm2, %v7165_v8, 0.0 }
 0x57d   :  { %v7095_v44 = vpop.f32.mrf.mxu2  ;;  %v2934_v41 = vadd.f32 %v2933_v7, %v2932_v32  ;;  %v2856_v7 = vadd.f32 %v2855_v60, %v2854_v46  ;;  %v2859_v24 = vsel %vm2782_vm2, %v7207_v36, 0.0  ;;  %v7919_v60 = vld [vmem:[#allocation18_spill] sm:$0xff] }
 0x57e   :  { %v2735_v1 = vpop.f32.mrf.mxu3 }
 0x57f   :  { %v2936_v56 = vadd.f32 %v2935_v22, %v2934_v41  ;;  %v2858_v27 = vadd.f32 %v2857_v51, %v2856_v7  ;;  %v2897_v41 = vsel %vm2782_vm2, %v7049_v31, 0.0 }
 0x581   :  { %v2773_v47 = vpop.f32.mrf.mxu1 }
 0x582   :  { %4298 = vmatmul.msk.f32.gmra.mxu2 %vm2782_vm2, %v6587_v38  ;;  %v2874_v38 = vsel %vm2782_vm2, %v7119_v33, 0.0  ;;  %v7201_v14 = vadd.f32 %v2773_v47, %v2732_v23  ;;  %v2878_v23 = vsel %vm2782_vm2, %v7175_v11, 0.0  ;;  %v2938_v47 = vadd.f32 %v2937_v50, %v2936_v56  ;;  %v7918_v50 = vld [vmem:[#allocation53_spill] sm:$0xff] }
 0x583   :  { %v2875_v25 = vadd.f32 %v2874_v38, %v2873_v21  ;;  %v7225_v21 = vadd.f32 %v6990_v15, %v6979_v0  ;;  %v7917_v0 = vld [vmem:[#allocation39_spill] sm:$0xff]  ;;  %v2901_v56 = vsel %vm2782_vm2, %v7231_v9, 0.0 }
 0x584   :  { %v2939_v34 = vsel %vm2782_vm2, %v7201_v14, 0.0  ;;  %v2899_v15 = vsel %vm2782_vm2, %v7917_v0, 0.0 }
 0x585   :  { %v7147_v52 = vpop.f32.mrf.mxu2  ;;  %v2877_v53 = vadd.f32 %v2876_v12, %v2875_v25  ;;  %v7916_v25 = vld [vmem:[#allocation40_spill] sm:$0xff]  ;;  %v2940_v12 = vadd.f32 %v2939_v34, %v2938_v47  ;;  %v2880_v26 = vsel %vm2782_vm2, %v7225_v21, 0.0 }
 0x586   :  { %v2738_v38 = vpop.f32.mrf.mxu3  ;;  %v7921_v47 = vld [vmem:[#allocation20_spill] sm:$0xff] }
 0x587   :  { %v2879_v22 = vadd.f32 %v2878_v23, %v2877_v53 }
 0x589   :  { %v2776_v35 = vpop.f32.mrf.mxu1 }
 0x58a   :  { %4299 = vmatmul.msk.f32.gmra.mxu2 %vm2782_vm2, %v6631_v6  ;;  %v2890_v6 = vadd.f32 %v2889_v63, %v2888_v55  ;;  %v7219_v54 = vadd.f32 %v2776_v35, %v2735_v1  ;;  %v2860_v63 = vadd.f32 %v2859_v24, %v2858_v27  ;;  %v7924_v27 = vld [vmem:[#allocation62_spill] sm:$0xff] }
 0x58c   :  { %v2892_v32 = vadd.f32 %v2891_v20, %v2890_v6  ;;  %v2941_v10 = vsel %vm2782_vm2, %v7219_v54, 0.0  ;;  %v7247_v6 = vadd.f32 %v7919_v60, %v7918_v50  ;;  %v2861_v53 = vrot.slane %v2860_v63, 4 }
 0x58d   :  { %v2688_v57 = vpop.f32.mrf.mxu2  ;;  %v2942_v46 = vadd.f32 %v2941_v10, %v2940_v12 }
 0x58e   :  { %v2894_v3 = vadd.f32 %v2893_v16, %v2892_v32  ;;  %v2881_v16 = vadd.f32 %v2880_v26, %v2879_v22  ;;  %v7920_v32 = vld [vmem:[#allocation55_spill] sm:$0xff]  ;;  %v2910_v24 = vsel %vm2782_vm2, %v7247_v6, 0.0  ;;  %v2862_v22 = vadd.f32 %v2861_v53, %v2860_v63 }
 0x58f   :  { %v7253_v7 = vadd.f32 %v7921_v47, %v7920_v32 }
 0x590   :  { %v2896_v1 = vadd.f32 %v2895_v29, %v2894_v3  ;;  %v7922_v29 = vld [vmem:[#allocation51_spill] sm:$0xff]  ;;  %v7923_v3 = vld [vmem:[#allocation49_spill] sm:$0xff]  ;;  %v2863_v60 = vrot.slane %v2862_v22, 2 }
 0x591   :  { %v2779_v42 = vpop.f32.mrf.mxu1  ;;  %v7257_v34 = vadd.f32 %v7095_v44, %v7922_v29  ;;  %v2909_v12 = vsel %vm2782_vm2, %v7253_v7, 0.0  ;;  %v7928_v29 = vld [vmem:[#allocation60_spill] sm:$0xff] }
 0x592   :  { %4300 = vmatmul.msk.f32.gmra.mxu2 %vm2782_vm2, %v7916_v25  ;;  %v7239_v55 = vadd.f32 %v2779_v42, %v2738_v38  ;;  %v2898_v18 = vadd.f32 %v2897_v41, %v2896_v1  ;;  %v7263_v38 = vadd.f32 %v7147_v52, %v7923_v3  ;;  %v2882_v1 = vrot.slane %v2881_v16, 4  ;;  %v7925_v42 = vld [vmem:[#allocation47_spill] sm:$0xff] }
 0x593   :  { %v2912_v44 = vsel %vm2782_vm2, %v7257_v34, 0.0  ;;  %v2911_v10 = vadd.f32 %v2910_v24, %v2909_v12  ;;  %v7929_v12 = vld [vmem:[#allocation41_spill] sm:$0xff] }
 0x594   :  { %v2900_v20 = vadd.f32 %v2899_v15, %v2898_v18  ;;  %v2943_v51 = vsel %vm2782_vm2, %v7239_v55, 0.0  ;;  %v7272_v15 = vadd.f32 %v2688_v57, %v7925_v42  ;;  %v2914_v52 = vsel %vm2782_vm2, %v7263_v38, 0.0  ;;  %v7926_v18 = vld [vmem:[#allocation45_spill] sm:$0xff] }
 0x595   :  { %v2691_v35 = vpop.f32.mrf.mxu2  ;;  %v2944_v41 = vadd.f32 %v2943_v51, %v2942_v46  ;;  %v2913_v50 = vadd.f32 %v2912_v44, %v2911_v10  ;;  %v7927_v51 = vld [vmem:[#allocation43_spill] sm:$0xff] }
 0x596   :  { %v2902_v23 = vadd.f32 %v2901_v56, %v2900_v20  ;;  %v7277_v56 = vadd.f32 %v2691_v35, %v7926_v18  ;;  %v2883_v20 = vadd.f32 %v2882_v1, %v2881_v16  ;;  %v2916_v53 = vsel %vm2782_vm2, %v7272_v15, 0.0 }
 0x597   :  { %v2945_v63 = vrot.slane %v2944_v41, 4  ;;  %v2915_v57 = vadd.f32 %v2914_v52, %v2913_v50  ;;  %v2864_v16 = vadd.f32 %v2863_v60, %v2862_v22  ;;  %v7930_v22 = vld [vmem:[#allocation50_spill] sm:$0xff] }
 0x598   :  { %v2903_v25 = vrot.slane %v2902_v23, 4  ;;  %v2918_v47 = vsel %vm2782_vm2, %v7277_v56, 0.0  ;;  %v2884_v24 = vrot.slane %v2883_v20, 2 }
 0x599   :  { %v2946_v35 = vadd.f32 %v2945_v63, %v2944_v41  ;;  %v2917_v3 = vadd.f32 %v2916_v53, %v2915_v57  ;;  %v2865_v52 = vrot.slane %v2864_v16, 1 }
 0x59a   :  { %4301 = vmatmul.msk.f32.gmra.mxu2 %vm2782_vm2, %v7924_v27  ;;  %v2904_v46 = vadd.f32 %v2903_v25, %v2902_v23  ;;  %v2885_v10 = vadd.f32 %v2884_v24, %v2883_v20  ;;  %v7931_v24 = vld [vmem:[#allocation58_spill] sm:$0xff] }
 0x59b   :  { %v2919_v1 = vadd.f32 %v2918_v47, %v2917_v3  ;;  %v2947_v42 = vrot.slane %v2946_v35, 2 }
 0x59c   :  { %v2905_v27 = vrot.slane %v2904_v46, 2  ;;  %v2886_v60 = vrot.slane %v2885_v10, 1 }
 0x59d   :  { %v2694_v26 = vpop.f32.mrf.mxu2  ;;  %v2948_v50 = vadd.f32 %v2947_v42, %v2946_v35 }
 0x59e   :  { %v7282_v32 = vadd.f32 %v2694_v26, %v7927_v51  ;;  %v2906_v18 = vadd.f32 %v2905_v27, %v2904_v46  ;;  %v2866_v51 = vadd.f32 %v2865_v52, %v2864_v16 }
 0x59f   :  { %v2949_v3 = vrot.slane %v2948_v50, 1 }
 0x5a0   :  { %v2920_v23 = vsel %vm2782_vm2, %v7282_v32, 0.0  ;;  %v2907_v57 = vrot.slane %v2906_v18, 1 }
 0x5a1   :  { %v2921_v26 = vadd.f32 %v2920_v23, %v2919_v1  ;;  %v2961_v23 = vmul.f32 %v7931_v24, %v2866_v51  ;;  %v7932_v1 = vld [vmem:[#allocation48_spill] sm:$0xff]  ;;  %v2950_v35 = vadd.f32 %v2949_v3, %v2948_v50 }
 0x5a2   :  { %4302 = vmatmul.msk.f32.gmra.mxu2 %vm2782_vm2, %v7928_v29  ;;  %v2908_v46 = vadd.f32 %v2907_v57, %v2906_v18 }
 0x5a3   :  { %v2965_v18 = vmul.f32 %v7931_v24, %v2950_v35  ;;  %v7325_v35 = vld [vmem:[%s7694_s2 + $0x1] ss:$0 sm:$0xff] }
 0x5a4   :  { %v2963_v16 = vmul.f32 %v7931_v24, %v2908_v46  ;;  %v7938_v46 = vld [vmem:[#allocation61_spill] sm:$0xff] }
 0x5a5   :  { %v2697_v25 = vpop.f32.mrf.mxu2 }
 0x5a6   :  { %v7291_v44 = vadd.f32 %v2697_v25, %v7929_v12  ;;  %v2887_v25 = vadd.f32 %v2886_v60, %v2885_v10 }
 0x5a8   :  { %v2922_v41 = vsel %vm2782_vm2, %v7291_v44, 0.0  ;;  %v2962_v42 = vmul.f32 %v7931_v24, %v2887_v25  ;;  %v7936_v25 = vld [vmem:[#allocation42_spill] sm:$0xff] }
 0x5a9   :  { %v2923_v63 = vadd.f32 %v2922_v41, %v2921_v26  ;;  %v7933_v26 = vld [vmem:[#allocation57_spill] sm:$0xff] }
 0x5aa   :  { %4303 = vmatmul.msk.f32.gmra.mxu2 %vm2782_vm2, %v7930_v22  ;;  %v3976_v52 = vsel %vm3934_vm6, %v2961_v23, %v7933_v26 }
 0x5ab   :  { %v2924_v53 = vrot.slane %v2923_v63, 4  ;;  %v3977_v50 = vsel %vm3936_vm7, %v2962_v42, %v3976_v52 }
 0x5ac   :  { %v3978_v22 = vsel %vm3938_vm8, %v2963_v16, %v3977_v50 }
 0x5ad   :  { %v2925_v47 = vadd.f32 %v2924_v53, %v2923_v63  ;;  %v3176_v29 = vpop.f32.mrf.mxu2  ;;  %v7934_v53 = vld [vmem:[#allocation46_spill] sm:$0xff] }
 0x5af   :  { %v2926_v20 = vrot.slane %v2925_v47, 2 }
 0x5b1   :  { %v2927_v27 = vadd.f32 %v2926_v20, %v2925_v47  ;;  %v7935_v47 = vld [vmem:[#allocation44_spill] sm:$0xff] }
 0x5b2   :  { %4304 = vmatmul.msk.f32.gmra.mxu2 %vm2782_vm2, %v7932_v1  ;;  %v7939_v1 = vld [vmem:[#allocation59_spill] sm:$0xff] }
 0x5b3   :  { %v2928_v12 = vrot.slane %v2927_v27, 1 }
 0x5b5   :  { %v3179_v10 = vpop.f32.mrf.mxu2  ;;  %v2929_v41 = vadd.f32 %v2928_v12, %v2927_v27 }
 0x5b7   :  { %v2964_v63 = vmul.f32 %v7931_v24, %v2929_v41  ;;  %v7937_v24 = vld [vmem:[#allocation38_spill] sm:$0xff] }
 0x5b9   :  { %v3979_v60 = vsel %vm3940_vm9, %v2964_v63, %v3978_v22 }
 0x5ba   :  { %4305 = vmatmul.msk.f32.gmra.mxu2 %vm2782_vm2, %v7934_v53  ;;  %v3980_v51 = vsel %vm3942_vm10, %v2965_v18, %v3979_v60 }
 0x5bb   :  { %3981 = vrot.lane.b32.xlu0 %v3980_v51, %s4447_s5  ;;  %v3180_v51 = vadd.f32 %v7325_v35, %v3179_v10 }
 0x5bd   :  { %v3182_v57 = vpop.f32.mrf.mxu2 }
 0x5be   :  { %v3183_v60 = vadd.f32 %v7325_v35, %v3182_v57 }
 0x5c2   :  { %4306 = vmatmul.msk.f32.gmra.mxu2 %vm2782_vm2, %v7935_v47 }
 0x5c5   :  { %v3185_v3 = vpop.f32.mrf.mxu2 }
 0x5c6   :  { %v3186_v63 = vadd.f32 %v7325_v35, %v3185_v3 }
 0x5c8   :  { %v3371_v47 = vmax.f32 %v3186_v63, 0.0 }
 0x5ca   :  { %4307 = vmatmul.msk.f32.gmra.mxu2 %vm2782_vm2, %v7936_v25  ;;  %v3177_v25 = vadd.f32 %v7325_v35, %v3176_v29 }
 0x5cd   :  { %v3188_v20 = vpop.f32.mrf.mxu2 }
 0x5ce   :  { %v3189_v41 = vadd.f32 %v7325_v35, %v3188_v20  ;;  %v3370_v20 = vmax.f32 %v3183_v60, 0.0 }
 0x5d0   :  { %v3372_v53 = vmax.f32 %v3189_v41, 0.0 }
 0x5d2   :  { %4308 = vmatmul.msk.f32.gmra.mxu2 %vm2782_vm2, %v7937_v24  ;;  %v3368_v24 = vmax.f32 %v3177_v25, 0.0 }
 0x5d5   :  { %v3191_v23 = vpop.f32.mrf.mxu2 }
 0x5d6   :  { %v3192_v26 = vadd.f32 %v7325_v35, %v3191_v23 }
 0x5d8   :  { %v3373_v50 = vmax.f32 %v3192_v26, 0.0 }
 0x5da   :  { %4309 = vmatmul.msk.f32.gmra.mxu2 %vm2782_vm2, %v7938_v46 }
 0x5dd   :  { %v3194_v27 = vpop.f32.mrf.mxu2 }
 0x5de   :  { %v3195_v42 = vadd.f32 %v7325_v35, %v3194_v27 }
 0x5e0   :  { %v3374_v18 = vmax.f32 %v3195_v42, 0.0 }
 0x5e2   :  { %4310 = vmatmul.msk.f32.gmra.mxu2 %vm2782_vm2, %v7939_v1 }
 0x5e5   :  { %v3197_v12 = vpop.f32.mrf.mxu2 }
 0x5e6   :  { %v3198_v16 = vadd.f32 %v7325_v35, %v3197_v12 }
 0x5e8   :  { %v3375_v52 = vmax.f32 %v3198_v16, 0.0 }
 0x5ea   :  { %4311 = vmatmul.msk.f32.gmra.mxu2 %vm2782_vm2, %v7109_v40  ;;  %3447 = vmatpush.msra.mxu3 %v3375_v52  ;;  %v3369_v40 = vmax.f32 %v3180_v51, 0.0 }
 0x5ec   :  { %3448 = vmatpush.msra.mxu3 %v3374_v18 }
 0x5ed   :  { %v3200_v22 = vpop.f32.mrf.mxu2 }
 0x5ee   :  { %3449 = vmatpush.msra.mxu3 %v3373_v50  ;;  %v3201_v18 = vadd.f32 %v7325_v35, %v3200_v22  ;;  %v7941_v50 = vld [vmem:[#allocation19_spill] sm:$0xff]  ;;  %v7370_v22 = vld [vmem:[%s7695_s3 + $0x80] sm:$0xff] }
 0x5f0   :  { %3450 = vmatpush.msra.mxu3 %v3372_v53  ;;  %v3376_v51 = vmax.f32 %v3201_v18, 0.0 }
 0x5f2   :  { %4312 = vmatmul.msk.f32.gmra.mxu2 %vm2782_vm2, %v7099_v62  ;;  %3451 = vmatpush.msra.mxu3 %v3371_v47 }
 0x5f4   :  { %3452 = vmatpush.msra.mxu3 %v3370_v20 }
 0x5f5   :  { %v3203_v3 = vpop.f32.mrf.mxu2 }
 0x5f6   :  { %3453 = vmatpush.msra.mxu3 %v3369_v40  ;;  %v3204_v52 = vadd.f32 %v7325_v35, %v3203_v3 }
 0x5f8   :  { %3454 = vmatpush.msra.mxu3 %v3368_v24  ;;  %v3377_v60 = vmax.f32 %v3204_v52, 0.0 }
 0x5f9   :  { %4351 = vmatmul.msk.f32.vlgmr.msra.gmra.mxu3 %vm3432_vm11, %v7370_v22 }
 0x5fa   :  { %4313 = vmatmul.msk.f32.gmra.mxu2 %vm2782_vm2, %v7113_v45 }
 0x5fd   :  { %v3206_v57 = vpop.f32.mrf.mxu2 }
 0x5fe   :  { %v3207_v16 = vadd.f32 %v7325_v35, %v3206_v57 }
 0x600   :  { %v3378_v63 = vmax.f32 %v3207_v16, 0.0 }
 0x602   :  { %4314 = vmatmul.msk.f32.gmra.mxu2 %vm2782_vm2, %v7125_v59 }
 0x605   :  { %v3209_v10 = vpop.f32.mrf.mxu2 }
 0x60a   :  { %4315 = vmatmul.msk.f32.gmra.mxu2 %vm2782_vm2, %v7153_v28 }
 0x60d   :  { %v3212_v29 = vpop.f32.mrf.mxu2 }
 0x60e   :  { %v3213_v1 = vadd.f32 %v7325_v35, %v3212_v29 }
 0x610   :  { %v3380_v26 = vmax.f32 %v3213_v1, 0.0 }
 0x612   :  { %4316 = vmatmul.msk.f32.gmra.mxu2 %vm2782_vm2, %v7169_v48  ;;  %v7940_v48 = vld [vmem:[#allocation37_spill] sm:$0xff] }
 0x615   :  { %v3215_v62 = vpop.f32.mrf.mxu2 }
 0x616   :  { %v3216_v27 = vadd.f32 %v7325_v35, %v3215_v62 }
 0x618   :  { %v3381_v42 = vmax.f32 %v3216_v27, 0.0 }
 0x61a   :  { %4317 = vmatmul.msk.f32.gmra.mxu2 %vm2782_vm2, %v7187_v5  ;;  %v3210_v5 = vadd.f32 %v7325_v35, %v3209_v10 }
 0x61c   :  { %v3379_v41 = vmax.f32 %v3210_v5, 0.0 }
 0x61d   :  { %v3218_v23 = vpop.f32.mrf.mxu2 }
 0x61e   :  { %v3219_v46 = vadd.f32 %v7325_v35, %v3218_v23 }
 0x620   :  { %v3382_v12 = vmax.f32 %v3219_v46, 0.0 }
 0x622   :  { %4318 = vmatmul.msk.f32.gmra.mxu2 %vm2782_vm2, %v7207_v36 }
 0x625   :  { %v3221_v45 = vpop.f32.mrf.mxu2 }
 0x626   :  { %v3222_v59 = vadd.f32 %v7325_v35, %v3221_v45 }
 0x628   :  { %v3383_v28 = vmax.f32 %v3222_v59, 0.0 }
 0x62a   :  { %4319 = vmatmul.msk.f32.gmra.mxu2 %vm2782_vm2, %v7940_v48  ;;  %3470 = vmatpush.msrb.mxu3 %v3383_v28  ;;  %v7399_v48 = vld [vmem:[%s7695_s3 + $0x90] sm:$0xff] }
 0x62b   :  { %4352 = vmatmul.msk.f32.gmra.mxu3 %vm3432_vm11, %v7399_v48 }
 0x62c   :  { %3471 = vmatpush.msrb.mxu3 %v3382_v12 }
 0x62d   :  { %v3224_v36 = vpop.f32.mrf.mxu2 }
 0x62e   :  { %3472 = vmatpush.msrb.mxu3 %v3381_v42  ;;  %v3225_v59 = vadd.f32 %v7325_v35, %v3224_v36 }
 0x630   :  { %3473 = vmatpush.msrb.mxu3 %v3380_v26  ;;  %v3384_v1 = vmax.f32 %v3225_v59, 0.0 }
 0x632   :  { %4320 = vmatmul.msk.f32.gmra.mxu2 %vm2782_vm2, %v7941_v50  ;;  %3474 = vmatpush.msrb.mxu3 %v3379_v41 }
 0x634   :  { %3475 = vmatpush.msrb.mxu3 %v3378_v63 }
 0x635   :  { %v3227_v53 = vpop.f32.mrf.mxu2 }
 0x636   :  { %3476 = vmatpush.msrb.mxu3 %v3377_v60  ;;  %v3228_v45 = vadd.f32 %v7325_v35, %v3227_v53 }
 0x638   :  { %3477 = vmatpush.msrb.mxu3 %v3376_v51 }
 0x639   :  { %4353 = vmatmul.msk.f32.vlgmr.msrb.gmra.mxu3 %vm3432_vm11, %v7370_v22 }
 0x63a   :  { %4321 = vmatmul.msk.f32.gmra.mxu2 %vm2782_vm2, %v7081_v58 }
 0x63d   :  { %v3230_v47 = vpop.f32.mrf.mxu2 }
 0x63e   :  { %v3231_v62 = vadd.f32 %v7325_v35, %v3230_v47 }
 0x640   :  { %v3386_v27 = vmax.f32 %v3231_v62, 0.0 }
 0x641   :  { %4354 = vmatmul.msk.f32.gmra.mxu3 %vm3432_vm11, %v7399_v48 }
 0x642   :  { %4322 = vmatmul.msk.f32.gmra.mxu2 %vm2782_vm2, %v7093_v61 }
 0x645   :  { %v3233_v25 = vpop.f32.mrf.mxu2 }
 0x64a   :  { %4323 = vmatmul.msk.f32.gmra.mxu2 %vm2782_vm2, %v7119_v33 }
 0x64d   :  { %v3236_v20 = vpop.f32.mrf.mxu2 }
 0x64e   :  { %v3237_v10 = vadd.f32 %v7325_v35, %v3236_v20 }
 0x650   :  { %v3388_v23 = vmax.f32 %v3237_v10, 0.0 }
 0x652   :  { %4324 = vmatmul.msk.f32.gmra.mxu2 %vm2782_vm2, %v7139_v17  ;;  %v3234_v17 = vadd.f32 %v7325_v35, %v3233_v25 }
 0x654   :  { %v3387_v46 = vmax.f32 %v3234_v17, 0.0 }
 0x655   :  { %v3239_v58 = vpop.f32.mrf.mxu2 }
 0x656   :  { %v3240_v24 = vadd.f32 %v7325_v35, %v3239_v58 }
 0x65a   :  { %4325 = vmatmul.msk.f32.gmra.mxu2 %vm2782_vm2, %v7175_v11  ;;  %v3389_v11 = vmax.f32 %v3240_v24, 0.0 }
 0x65d   :  { %v3242_v61 = vpop.f32.mrf.mxu2 }
 0x65e   :  { %v3243_v3 = vadd.f32 %v7325_v35, %v3242_v61 }
 0x660   :  { %v3390_v29 = vmax.f32 %v3243_v3, 0.0 }
 0x662   :  { %4326 = vmatmul.msk.f32.gmra.mxu2 %vm2782_vm2, %v7225_v21 }
 0x665   :  { %v3245_v40 = vpop.f32.mrf.mxu2 }
 0x666   :  { %v3246_v33 = vadd.f32 %v7325_v35, %v3245_v40 }
 0x668   :  { %v3391_v57 = vmax.f32 %v3246_v33, 0.0 }
 0x66a   :  { %4327 = vmatmul.msk.f32.gmra.mxu2 %vm2782_vm2, %v7157_v4  ;;  %3493 = vmatpush.msra.mxu3 %v3391_v57  ;;  %v3385_v4 = vmax.f32 %v3228_v45, 0.0 }
 0x66c   :  { %3494 = vmatpush.msra.mxu3 %v3390_v29 }
 0x66d   :  { %v3248_v21 = vpop.f32.mrf.mxu2 }
 0x66e   :  { %3495 = vmatpush.msra.mxu3 %v3389_v11  ;;  %v3249_v53 = vadd.f32 %v7325_v35, %v3248_v21 }
 0x670   :  { %3496 = vmatpush.msra.mxu3 %v3388_v23  ;;  %v3392_v25 = vmax.f32 %v3249_v53, 0.0 }
 0x672   :  { %4328 = vmatmul.msk.f32.gmra.mxu2 %vm2782_vm2, %v7145_v2  ;;  %3497 = vmatpush.msra.mxu3 %v3387_v46 }
 0x674   :  { %3498 = vmatpush.msra.mxu3 %v3386_v27 }
 0x675   :  { %v3251_v28 = vpop.f32.mrf.mxu2 }
 0x676   :  { %3499 = vmatpush.msra.mxu3 %v3385_v4  ;;  %v3252_v50 = vadd.f32 %v7325_v35, %v3251_v28 }
 0x678   :  { %3500 = vmatpush.msra.mxu3 %v3384_v1 }
 0x679   :  { %4355 = vmatmul.msk.f32.vlgmr.msra.gmra.mxu3 %vm3432_vm11, %v7370_v22 }
 0x67a   :  { %4329 = vmatmul.msk.f32.gmra.mxu2 %vm2782_vm2, %v7161_v39 }
 0x67d   :  { %v3254_v12 = vpop.f32.mrf.mxu2 }
 0x67e   :  { %v3255_v18 = vadd.f32 %v7325_v35, %v3254_v12 }
 0x680   :  { %v3394_v51 = vmax.f32 %v3255_v18, 0.0 }
 0x681   :  { %4356 = vmatmul.msk.f32.gmra.mxu3 %vm3432_vm11, %v7399_v48 }
 0x682   :  { %4330 = vmatmul.msk.f32.gmra.mxu2 %vm2782_vm2, %v7181_v19 }
 0x685   :  { %v3257_v2 = vpop.f32.mrf.mxu2 }
 0x68a   :  { %4331 = vmatmul.msk.f32.gmra.mxu2 %vm2782_vm2, %v7197_v13 }
 0x68d   :  { %v3260_v39 = vpop.f32.mrf.mxu2 }
 0x692   :  { %4332 = vmatmul.msk.f32.gmra.mxu2 %vm2782_vm2, %v7049_v31 }
 0x695   :  { %v3263_v5 = vpop.f32.mrf.mxu2 }
 0x696   :  { %v3264_v36 = vadd.f32 %v7325_v35, %v3263_v5 }
 0x698   :  { %v3397_v52 = vmax.f32 %v3264_v36, 0.0 }
 0x69a   :  { %4333 = vmatmul.msk.f32.gmra.mxu2 %vm2782_vm2, %v7917_v0  ;;  %v3261_v0 = vadd.f32 %v7325_v35, %v3260_v39 }
 0x69c   :  { %v3396_v63 = vmax.f32 %v3261_v0, 0.0 }
 0x69d   :  { %v3266_v19 = vpop.f32.mrf.mxu2 }
 0x69e   :  { %v3267_v31 = vadd.f32 %v7325_v35, %v3266_v19 }
 0x6a0   :  { %v3398_v26 = vmax.f32 %v3267_v31, 0.0 }
 0x6a2   :  { %4334 = vmatmul.msk.f32.gmra.mxu2 %vm2782_vm2, %v7231_v9  ;;  %v3258_v9 = vadd.f32 %v7325_v35, %v3257_v2 }
 0x6a4   :  { %v3395_v60 = vmax.f32 %v3258_v9, 0.0 }
 0x6a5   :  { %v3269_v13 = vpop.f32.mrf.mxu2 }
 0x6a6   :  { %v3270_v42 = vadd.f32 %v7325_v35, %v3269_v13 }
 0x6a8   :  { %v3399_v16 = vmax.f32 %v3270_v42, 0.0 }
 0x6aa   :  { %4335 = vmatmul.msk.f32.gmra.mxu2 %vm2782_vm2, %v7253_v7  ;;  %3516 = vmatpush.msrb.mxu3 %v3399_v16  ;;  %v3393_v7 = vmax.f32 %v3252_v50, 0.0 }
 0x6ac   :  { %3517 = vmatpush.msrb.mxu3 %v3398_v26 }
 0x6ad   :  { %v3272_v41 = vpop.f32.mrf.mxu2 }
 0x6ae   :  { %3518 = vmatpush.msrb.mxu3 %v3397_v52  ;;  %v3273_v21 = vadd.f32 %v7325_v35, %v3272_v41 }
 0x6b0   :  { %3519 = vmatpush.msrb.mxu3 %v3396_v63  ;;  %v3400_v45 = vmax.f32 %v3273_v21, 0.0  ;;  %v3456_v63 = vpop.f32.mrf.mxu3 }
 0x6b2   :  { %4336 = vmatmul.msk.f32.gmra.mxu2 %vm2782_vm2, %v7247_v6  ;;  %3520 = vmatpush.msrb.mxu3 %v3395_v60 }
 0x6b4   :  { %3521 = vmatpush.msrb.mxu3 %v3394_v51 }
 0x6b5   :  { %v3275_v47 = vpop.f32.mrf.mxu2 }
 0x6b6   :  { %3522 = vmatpush.msrb.mxu3 %v3393_v7  ;;  %v3276_v17 = vadd.f32 %v7325_v35, %v3275_v47 }
 0x6b8   :  { %3523 = vmatpush.msrb.mxu3 %v3392_v25 }
 0x6b9   :  { %4357 = vmatmul.msk.f32.vlgmr.msrb.gmra.mxu3 %vm3432_vm11, %v7370_v22 }
 0x6ba   :  { %4337 = vmatmul.msk.f32.gmra.mxu2 %vm2782_vm2, %v7257_v34 }
 0x6bd   :  { %v3278_v20 = vpop.f32.mrf.mxu2 }
 0x6be   :  { %v3279_v10 = vadd.f32 %v7325_v35, %v3278_v20  ;;  %v3459_v20 = vpop.f32.mrf.mxu3 }
 0x6c0   :  { %v3402_v62 = vmax.f32 %v3279_v10, 0.0 }
 0x6c1   :  { %4358 = vmatmul.msk.f32.gmra.mxu3 %vm3432_vm11, %v7399_v48 }
 0x6c2   :  { %4338 = vmatmul.msk.f32.gmra.mxu2 %vm2782_vm2, %v7263_v38 }
 0x6c5   :  { %v3281_v6 = vpop.f32.mrf.mxu2 }
 0x6ca   :  { %4339 = vmatmul.msk.f32.gmra.mxu2 %vm2782_vm2, %v7272_v15 }
 0x6cd   :  { %v3284_v58 = vpop.f32.mrf.mxu2 }
 0x6ce   :  { %v3285_v24 = vadd.f32 %v7325_v35, %v3284_v58 }
 0x6d0   :  { %v3404_v29 = vmax.f32 %v3285_v24, 0.0 }
 0x6d2   :  { %4340 = vmatmul.msk.f32.gmra.mxu2 %vm2782_vm2, %v7277_v56  ;;  %v3282_v56 = vadd.f32 %v7325_v35, %v3281_v6 }
 0x6d4   :  { %v3403_v11 = vmax.f32 %v3282_v56, 0.0 }
 0x6d5   :  { %v3287_v61 = vpop.f32.mrf.mxu2 }
 0x6d6   :  { %v3288_v33 = vadd.f32 %v7325_v35, %v3287_v61 }
 0x6da   :  { %4341 = vmatmul.msk.f32.gmra.mxu2 %vm2782_vm2, %v7282_v32  ;;  %v3405_v32 = vmax.f32 %v3288_v33, 0.0 }
 0x6dd   :  { %v3290_v34 = vpop.f32.mrf.mxu2 }
 0x6de   :  { %v3291_v3 = vadd.f32 %v7325_v35, %v3290_v34 }
 0x6e0   :  { %v3406_v57 = vmax.f32 %v3291_v3, 0.0  ;;  %v3624_v3 = vsel %vm3623_vm12, %v3456_v63, 0.0 }
 0x6e2   :  { %4342 = vmatmul.msk.f32.gmra.mxu2 %vm2782_vm2, %v7291_v44 }
 0x6e5   :  { %v3293_v40 = vpop.f32.mrf.mxu2 }
 0x6e6   :  { %v3294_v38 = vadd.f32 %v7325_v35, %v3293_v40 }
 0x6e8   :  { %v3407_v15 = vmax.f32 %v3294_v38, 0.0 }
 0x6ea   :  { %4343 = vmatmul.msk.f32.gmra.mxu2 %vm2782_vm2, %v7085_v37  ;;  %3539 = vmatpush.msrb.mxu1 %v3407_v15  ;;  %v3401_v37 = vmax.f32 %v3276_v17, 0.0  ;;  %v3625_v15 = vsel %vm3623_vm12, %v3459_v20, 0.0  ;;  %v24_v17 = vld [vmem:[%s7693_s1 + $0x30] sm:$0xff] }
 0x6eb   :  { %v3626_v24 = vadd.f32 %v3625_v15, %v3624_v3 }
 0x6ec   :  { %3540 = vmatpush.msrb.mxu1 %v3406_v57 }
 0x6ed   :  { %v3296_v44 = vpop.f32.mrf.mxu2 }
 0x6ee   :  { %3541 = vmatpush.msrb.mxu1 %v3405_v32  ;;  %v3297_v31 = vadd.f32 %v7325_v35, %v3296_v44  ;;  %v3479_v32 = vpop.f32.mrf.mxu3 }
 0x6f0   :  { %3542 = vmatpush.msrb.mxu1 %v3404_v29  ;;  %v3408_v0 = vmax.f32 %v3297_v31, 0.0 }
 0x6f2   :  { %4344 = vmatmul.msk.f32.gmra.mxu2 %vm2782_vm2, %v7087_v49  ;;  %3543 = vmatpush.msrb.mxu1 %v3403_v11  ;;  %v23_v11 = vld [vmem:[%s7693_s1 + $0x28] sm:$0xff] }
 0x6f4   :  { %3544 = vmatpush.msrb.mxu1 %v3402_v62  ;;  %v22_v62 = vld [vmem:[%s7693_s1 + $0x20] sm:$0xff] }
 0x6f5   :  { %v3299_v23 = vpop.f32.mrf.mxu2 }
 0x6f6   :  { %3545 = vmatpush.msrb.mxu1 %v3401_v37  ;;  %v3300_v19 = vadd.f32 %v7325_v35, %v3299_v23  ;;  %v3482_v21 = vpop.f32.mrf.mxu3  ;;  %v21_v23 = vld [vmem:[%s7693_s1 + $0x18] sm:$0xff] }
 0x6f8   :  { %3546 = vmatpush.msrb.mxu1 %v3400_v45  ;;  %v3409_v36 = vmax.f32 %v3300_v19, 0.0  ;;  %v3633_v45 = vsel %vm3623_vm12, %v3479_v32, 0.0 }
 0x6f9   :  { %4359 = vmatmul.msk.f32.vlgmr.msrb.gmra.mxu1 %vm3432_vm11, %v7370_v22 }
 0x6fa   :  { %4345 = vmatmul.msk.f32.gmra.mxu2 %vm2782_vm2, %v7105_v30 }
 0x6fd   :  { %v3302_v46 = vpop.f32.mrf.mxu2 }
 0x6fe   :  { %v3303_v5 = vadd.f32 %v7325_v35, %v3302_v46  ;;  %v3634_v46 = vsel %vm3623_vm12, %v3482_v21, 0.0 }
 0x700   :  { %v3410_v42 = vmax.f32 %v3303_v5, 0.0 }
 0x701   :  { %4360 = vmatmul.msk.f32.gmra.mxu1 %vm3432_vm11, %v7399_v48 }
 0x702   :  { %4346 = vmatmul.msk.f32.gmra.mxu2 %vm2782_vm2, %v7131_v43 }
 0x705   :  { %v3305_v49 = vpop.f32.mrf.mxu2 }
 0x70a   :  { %4347 = vmatmul.msk.f32.gmra.mxu2 %vm2782_vm2, %v7165_v8 }
 0x70d   :  { %v3308_v59 = vpop.f32.mrf.mxu2 }
 0x70e   :  { %v3309_v12 = vadd.f32 %v7325_v35, %v3308_v59  ;;  %v3502_v59 = vpop.f32.mrf.mxu3 }
 0x712   :  { %4348 = vmatmul.msk.f32.gmra.mxu2 %vm2782_vm2, %v7201_v14  ;;  %v3306_v14 = vadd.f32 %v7325_v35, %v3305_v49  ;;  %v3635_v49 = vadd.f32 %v3634_v46, %v3633_v45 }
 0x714   :  { %v3411_v13 = vmax.f32 %v3306_v14, 0.0 }
 0x715   :  { %v3311_v27 = vpop.f32.mrf.mxu2 }
 0x716   :  { %v3312_v1 = vadd.f32 %v7325_v35, %v3311_v27 }
 0x718   :  { %v3413_v39 = vmax.f32 %v3312_v1, 0.0 }
 0x71a   :  { %4349 = vmatmul.msk.f32.gmra.mxu2 %vm2782_vm2, %v7219_v54 }
 0x71d   :  { %v3314_v30 = vpop.f32.mrf.mxu2 }
 0x71e   :  { %v3315_v28 = vadd.f32 %v7325_v35, %v3314_v30  ;;  %v7524_v30 = vpop.f32.mrf.mxu3 }
 0x720   :  { %v3414_v2 = vmax.f32 %v3315_v28, 0.0  ;;  %v3642_v28 = vsel %vm3623_vm12, %v3502_v59, 0.0 }
 0x722   :  { %4350 = vmatmul.msk.f32.gmra.mxu2 %vm2782_vm2, %v7239_v55  ;;  %v3412_v55 = vmax.f32 %v3309_v12, 0.0 }
 0x725   :  { %v3317_v4 = vpop.f32.mrf.mxu2 }
 0x726   :  { %v3318_v43 = vadd.f32 %v7325_v35, %v3317_v4 }
 0x728   :  { %v3415_v8 = vmax.f32 %v3318_v43, 0.0  ;;  %v3643_v43 = vsel %vm3623_vm12, %v7524_v30, 0.0 }
 0x729   :  { %v3644_v1 = vadd.f32 %v3643_v43, %v3642_v28 }
 0x72a   :  { %3562 = vmatpush.msra.mxu3 %v3415_v8 }
 0x72b   :  { %v3645_v31 = vrot.slane %v3644_v1, 4 }
 0x72c   :  { %3563 = vmatpush.msra.mxu3 %v3414_v2  ;;  %v4448_v2 = vmov 16.0  }
 0x72d   :  { %v3320_v54 = vpop.f32.mrf.mxu2  ;;  %4399 = vrcp.f32 %v4448_v2 }
 0x72e   :  { %3564 = vmatpush.msra.mxu3 %v3413_v39  ;;  %v3321_v57 = vadd.f32 %v7325_v35, %v3320_v54  ;;  %v3627_v54 = vrot.slane %v3626_v24, 4 }
 0x730   :  { %3565 = vmatpush.msra.mxu3 %v3412_v55  ;;  %v3416_v29 = vmax.f32 %v3321_v57, 0.0  ;;  %v3636_v55 = vrot.slane %v3635_v49, 4 }
 0x732   :  { %3566 = vmatpush.msra.mxu3 %v3411_v13 }
 0x734   :  { %3567 = vmatpush.msra.mxu3 %v3410_v42  ;;  %v4400_v42 = vpop.eup %4399 }
 0x735   :  { %v3323_v16 = vpop.f32.mrf.mxu2  ;;  %vm3701_vm13 = vweird.f32 %v4400_v42 }
 0x736   :  { %3568 = vmatpush.msra.mxu3 %v3409_v36  ;;  %v3324_v38 = vadd.f32 %v7325_v35, %v3323_v16  ;;  %v3628_v16 = vadd.f32 %v3627_v54, %v3626_v24 }
 0x738   :  { %3569 = vmatpush.msra.mxu3 %v3408_v0  ;;  %v3417_v44 = vmax.f32 %v3324_v38, 0.0  ;;  %v3637_v0 = vadd.f32 %v3636_v55, %v3635_v49 }
 0x739   :  { %4361 = vmatmul.msk.f32.vlgmr.msra.gmra.mxu3 %vm3432_vm11, %v7370_v22 }
 0x73c   :  { %v7530_v8 = vpop.f32.mrf.mxu3 }
 0x73d   :  { %v3326_v26 = vpop.f32.mrf.mxu2  ;;  %v3651_v14 = vsel %vm3623_vm12, %v7530_v8, 0.0 }
 0x73e   :  { %v3327_v34 = vadd.f32 %v7325_v35, %v3326_v26  ;;  %v3697_v26 = vmul.f32 16.0, %v4400_v42 }
 0x740   :  { %v3418_v56 = vmax.f32 %v3327_v34, 0.0 }
 0x741   :  { %4362 = vmatmul.msk.f32.gmra.mxu3 %vm3432_vm11, %v7399_v48 }
 0x744   :  { %v7535_v39 = vpop.f32.mrf.mxu3 }
 0x745   :  { %v3329_v9 = vpop.f32.mrf.mxu2  ;;  %v3652_v5 = vsel %vm3623_vm12, %v7535_v39, 0.0 }
 0x746   :  { %v3330_v6 = vadd.f32 %v7325_v35, %v3329_v9  ;;  %v3653_v19 = vadd.f32 %v3652_v5, %v3651_v14  ;;  %v3646_v9 = vadd.f32 %v3645_v31, %v3644_v1 }
 0x748   :  { %v3419_v33 = vmax.f32 %v3330_v6, 0.0  ;;  %v3654_v36 = vrot.slane %v3653_v19, 4 }
 0x74d   :  { %v3332_v52 = vpop.f32.mrf.mxu2 }
 0x74e   :  { %v3333_v47 = vadd.f32 %v7325_v35, %v3332_v52 }
 0x750   :  { %v3420_v40 = vmax.f32 %v3333_v47, 0.0 }
 0x755   :  { %v3335_v41 = vpop.f32.mrf.mxu2 }
 0x756   :  { %v3336_v51 = vadd.f32 %v7325_v35, %v3335_v41  ;;  %v3655_v41 = vadd.f32 %v3654_v36, %v3653_v19 }
 0x758   :  { %v3421_v58 = vmax.f32 %v3336_v51, 0.0  ;;  %v3656_v47 = vrot.slane %v3655_v41, 2 }
 0x75a   :  { %v3657_v24 = vadd.f32 %v3656_v47, %v3655_v41 }
 0x75c   :  { %v3658_v46 = vrot.slane %v3657_v24, 1 }
 0x75d   :  { %v3338_v18 = vpop.f32.mrf.mxu2 }
 0x75e   :  { %v3339_v60 = vadd.f32 %v7325_v35, %v3338_v18  ;;  %v3629_v18 = vrot.slane %v3628_v16, 2  ;;  %v3659_v14 = vadd.f32 %v3658_v46, %v3657_v24 }
 0x760   :  { %v3422_v25 = vmax.f32 %v3339_v60, 0.0 }
 0x765   :  { %v3341_v50 = vpop.f32.mrf.mxu2 }
 0x766   :  { %v3342_v53 = vadd.f32 %v7325_v35, %v3341_v50  ;;  %v3698_v50 = vsub.f32 1.0, %v3697_v26 }
 0x768   :  { %v3423_v7 = vmax.f32 %v3342_v53, 0.0  ;;  %v3647_v53 = vrot.slane %v3646_v9, 2 }
 0x76a   :  { %3585 = vmatpush.msra.mxu1 %v3423_v7  ;;  %v3648_v3 = vadd.f32 %v3647_v53, %v3646_v9 }
 0x76c   :  { %3586 = vmatpush.msra.mxu1 %v3422_v25  ;;  %v3630_v25 = vadd.f32 %v3629_v18, %v3628_v16 }
 0x76d   :  { %v7494_v61 = vpop.f32.mrf.mxu2 }
 0x76e   :  { %3587 = vmatpush.msra.mxu1 %v3421_v58 }
 0x770   :  { %3588 = vmatpush.msra.mxu1 %v3420_v40  ;;  %v3699_v40 = vmul.f32 %v4400_v42, %v3698_v50 }
 0x772   :  { %3589 = vmatpush.msra.mxu1 %v3419_v33 }
 0x774   :  { %3590 = vmatpush.msra.mxu1 %v3418_v56 }
 0x775   :  { %v7501_v10 = vpop.f32.mrf.mxu2 }
 0x776   :  { %3591 = vmatpush.msra.mxu1 %v3417_v44  ;;  %v7540_v52 = vpop.f32.mrf.mxu1  ;;  %v3631_v44 = vrot.slane %v3630_v25, 1 }
 0x777   :  { %v3660_v34 = vsel %vm3623_vm12, %v7540_v52, 0.0 }
 0x778   :  { %3592 = vmatpush.msra.mxu1 %v3416_v29 }
 0x779   :  { %4363 = vmatmul.msk.f32.vlgmr.msra.gmra.mxu1 %vm3432_vm11, %v7370_v22 }
 0x77a   :  { %3772 = vmatpush.msrb.mxu1 %v24_v17 }
 0x77c   :  { %3773 = vmatpush.msrb.mxu1 %v23_v11  ;;  %v3700_v11 = vadd.f32 %v4400_v42, %v3699_v40 }
 0x77d   :  { %v7514_v37 = vpop.f32.mrf.mxu2 }
 0x77e   :  { %3774 = vmatpush.msrb.mxu1 %v22_v62  ;;  %v7548_v38 = vpop.f32.mrf.mxu1  ;;  %v7558_v43 = vsel %vm3701_vm13, %v4400_v42, %v3700_v11 }
 0x77f   :  { %v3661_v57 = vsel %vm3623_vm12, %v7548_v38, 0.0 }
 0x780   :  { %3775 = vmatpush.msrb.mxu1 %v21_v23  ;;  %v3662_v56 = vadd.f32 %v3661_v57, %v3660_v34  ;;  %v3351_v23 = vadd.f32 %v7325_v35, %v7514_v37  ;;  %v3345_v37 = vadd.f32 %v7325_v35, %v7494_v61  ;;  %v7598_v34 = vld [vmem:[%s7694_s2 + $0x2] ss:$0 sm:$0xff] }
 0x781   :  { %4364 = vmatmul.msk.f32.gmra.mxu1 %vm3432_vm11, %v7399_v48 }
 0x782   :  { %v3663_v62 = vrot.slane %v3662_v56, 4  ;;  %v3426_v2 = vmax.f32 %v3351_v23, 0.0  ;;  %v3424_v31 = vmax.f32 %v3345_v37, 0.0 }
 0x784   :  { %v3664_v49 = vadd.f32 %v3663_v62, %v3662_v56 }
 0x785   :  { %v3353_v27 = vpop.f32.mrf.mxu2 }
 0x789   :  { %4367 = vmatmul.msk.f32.vlgmr.msrb.gmra.mxu1 %vm3623_vm12, %v3456_v63  ;;  %v3638_v63 = vrot.slane %v3637_v0, 2 }
 0x78b   :  { %v3639_v6 = vadd.f32 %v3638_v63, %v3637_v0 }
 0x78d   :  { %v3356_v4 = vpop.f32.mrf.mxu2  ;;  %v3640_v17 = vrot.slane %v3639_v6, 1 }
 0x78e   :  { %v3357_v33 = vadd.f32 %v7325_v35, %v3356_v4 }
 0x78f   :  { %v3641_v28 = vadd.f32 %v3640_v17, %v3639_v6 }
 0x790   :  { %v3428_v45 = vmax.f32 %v3357_v33, 0.0 }
 0x791   :  { %4368 = vmatmul.msk.f32.gmra.mxu1 %vm3623_vm12, %v3459_v20  ;;  %v3704_v55 = vmul.f32 %v7558_v43, %v3641_v28 }
 0x795   :  { %v3359_v12 = vpop.f32.mrf.mxu2 }
 0x796   :  { %v3360_v20 = vadd.f32 %v7325_v35, %v3359_v12  ;;  %v3665_v12 = vrot.slane %v3664_v49, 2 }
 0x798   :  { %v3429_v29 = vmax.f32 %v3360_v20, 0.0  ;;  %v3666_v54 = vadd.f32 %v3665_v12, %v3664_v49 }
 0x799   :  { %4369 = vmatmul.msk.f32.gmra.mxu1 %vm3623_vm12, %v3479_v32  ;;  %v3354_v32 = vadd.f32 %v7325_v35, %v3353_v27  ;;  %v3632_v27 = vadd.f32 %v3631_v44, %v3630_v25 }
 0x79b   :  { %v3427_v4 = vmax.f32 %v3354_v32, 0.0 }
 0x79d   :  { %v3362_v13 = vpop.f32.mrf.mxu2 }
 0x79e   :  { %v3363_v51 = vadd.f32 %v7325_v35, %v3362_v13  ;;  %v3667_v13 = vrot.slane %v3666_v54, 1 }
 0x7a0   :  { %v3430_v15 = vmax.f32 %v3363_v51, 0.0  ;;  %v3668_v42 = vadd.f32 %v3667_v13, %v3666_v54 }
 0x7a1   :  { %4370 = vmatmul.msk.f32.gmra.mxu1 %vm3623_vm12, %v3482_v21  ;;  %v3649_v21 = vrot.slane %v3648_v3, 1 }
 0x7a2   :  { %v3707_v61 = vmul.f32 %v7558_v43, %v3668_v42 }
 0x7a3   :  { %v3650_v1 = vadd.f32 %v3649_v21, %v3648_v3 }
 0x7a5   :  { %v3365_v60 = vpop.f32.mrf.mxu2  ;;  %v3705_v19 = vmul.f32 %v7558_v43, %v3650_v1 }
 0x7a6   :  { %v3366_v7 = vadd.f32 %v7325_v35, %v3365_v60 }
 0x7a8   :  { %v3431_v58 = vmax.f32 %v3366_v7, 0.0 }
 0x7a9   :  { %4371 = vmatmul.msk.f32.gmra.mxu1 %vm3623_vm12, %v3502_v59  ;;  %v3348_v59 = vadd.f32 %v7325_v35, %v7501_v10  ;;  %v3703_v10 = vmul.f32 %v7558_v43, %v3632_v27 }
 0x7aa   :  { %3608 = vmatpush.msrb.mxu3 %v3431_v58 }
 0x7ab   :  { %v3425_v5 = vmax.f32 %v3348_v59, 0.0  ;;  %v3992_v35 = vsel %vm3930_vm4, %v3704_v55, %v3703_v10 }
 0x7ac   :  { %3609 = vmatpush.msrb.mxu3 %v3430_v15  ;;  %v3993_v36 = vsel %vm3932_vm5, %v3705_v19, %v3992_v35 }
 0x7ae   :  { %3610 = vmatpush.msrb.mxu3 %v3429_v29 }
 0x7b0   :  { %3611 = vmatpush.msrb.mxu3 %v3428_v45 }
 0x7b1   :  { %4372 = vmatmul.msk.f32.gmra.mxu1 %vm3623_vm12, %v7524_v30  ;;  %v3706_v30 = vmul.f32 %v7558_v43, %v3659_v14 }
 0x7b2   :  { %3612 = vmatpush.msrb.mxu3 %v3427_v4 }
 0x7b3   :  { %v3994_v16 = vsel %vm3934_vm6, %v3706_v30, %v3993_v36 }
 0x7b4   :  { %3613 = vmatpush.msrb.mxu3 %v3426_v2  ;;  %v3995_v0 = vsel %vm3936_vm7, %v3707_v61, %v3994_v16 }
 0x7b6   :  { %3614 = vmatpush.msrb.mxu3 %v3425_v5 }
 0x7b8   :  { %3615 = vmatpush.msrb.mxu3 %v3424_v31 }
 0x7b9   :  { %4365 = vmatmul.msk.f32.vlgmr.msrb.gmra.mxu3 %vm3432_vm11, %v7370_v22  ;;  %4373 = vmatmul.msk.f32.gmra.mxu1 %vm3623_vm12, %v7530_v8 }
 0x7bc   :  { %v3571_v26 = vpop.f32.mrf.mxu3 }
 0x7bd   :  { %v3669_v22 = vsel %vm3623_vm12, %v3571_v26, 0.0 }
 0x7c1   :  { %4366 = vmatmul.msk.f32.gmra.mxu3 %vm3432_vm11, %v7399_v48  ;;  %4374 = vmatmul.msk.f32.gmra.mxu1 %vm3623_vm12, %v7535_v39 }
 0x7c4   :  { %v3574_v9 = vpop.f32.mrf.mxu3 }
 0x7c5   :  { %v3670_v8 = vsel %vm3623_vm12, %v3574_v9, 0.0 }
 0x7c6   :  { %v3671_v41 = vadd.f32 %v3670_v8, %v3669_v22 }
 0x7c8   :  { %v3672_v18 = vrot.slane %v3671_v41, 4 }
 0x7c9   :  { %4375 = vmatmul.msk.f32.gmra.mxu1 %vm3623_vm12, %v7540_v52 }
 0x7ca   :  { %v3673_v63 = vadd.f32 %v3672_v18, %v3671_v41 }
 0x7cc   :  { %v3674_v50 = vrot.slane %v3673_v63, 2 }
 0x7ce   :  { %v3675_v60 = vadd.f32 %v3674_v50, %v3673_v63 }
 0x7d0   :  { %v3676_v53 = vrot.slane %v3675_v60, 1 }
 0x7d1   :  { %4376 = vmatmul.msk.f32.gmra.mxu1 %vm3623_vm12, %v7548_v38 }
 0x7d2   :  { %v3677_v48 = vadd.f32 %v3676_v53, %v3675_v60 }
 0x7d4   :  { %v3708_v39 = vmul.f32 %v7558_v43, %v3677_v48 }
 0x7d6   :  { %v3996_v51 = vsel %vm3938_vm8, %v3708_v39, %v3995_v0 }
 0x7d9   :  { %4377 = vmatmul.msk.f32.gmra.mxu1 %vm3623_vm12, %v3571_v26 }
 0x7e1   :  { %4378 = vmatmul.msk.f32.gmra.mxu1 %vm3623_vm12, %v3574_v9 }
 0x7f6   :  { %v3594_v7 = vpop.f32.mrf.mxu1 }
 0x7f7   :  { %4379 = vmatmul.msk.f32.gmra.mxu1 %vm3623_vm12, %v3594_v7  ;;  %v3678_v52 = vsel %vm3623_vm12, %v3594_v7, 0.0 }
 0x7fe   :  { %v3597_v47 = vpop.f32.mrf.mxu1 }
 0x7ff   :  { %v3679_v25 = vsel %vm3623_vm12, %v3597_v47, 0.0  ;;  %4380 = vmatmul.msk.f32.gmra.mxu1 %vm3623_vm12, %v3597_v47 }
 0x800   :  { %v3680_v20 = vadd.f32 %v3679_v25, %v3678_v52 }
 0x802   :  { %v3681_v6 = vrot.slane %v3680_v20, 4 }
 0x804   :  { %v3682_v58 = vadd.f32 %v3681_v6, %v3680_v20 }
 0x806   :  { %v3683_v40 = vrot.slane %v3682_v58, 2  ;;  %v3777_v3 = vpop.f32.mrf.mxu1 }
 0x807   :  { %v3778_v33 = vadd.f32 %v7598_v34, %v3777_v3 }
 0x808   :  { %v3684_v38 = vadd.f32 %v3683_v40, %v3682_v58 }
 0x809   :  { %v3825_v57 = vmax.f32 %v3778_v33, 0.0 }
 0x80a   :  { %v3685_v15 = vrot.slane %v3684_v38, 1 }
 0x80b   :  { %v3841_v17 = vsel %vm3432_vm11, %v3825_v57, 0.0 }
 0x80c   :  { %v3686_v24 = vadd.f32 %v3685_v15, %v3684_v38 }
 0x80e   :  { %v3780_v56 = vpop.f32.mrf.mxu1  ;;  %v3709_v32 = vmul.f32 %v7558_v43, %v3686_v24 }
 0x80f   :  { %v3781_v44 = vadd.f32 %v7598_v34, %v3780_v56 }
 0x810   :  { %v7604_v29 = vsel %vm3940_vm9, %v3709_v32, %v3996_v51 }
 0x811   :  { %v3826_v11 = vmax.f32 %v3781_v44, 0.0 }
 0x813   :  { %v3842_v21 = vsel %vm3432_vm11, %v3826_v11, 0.0 }
 0x814   :  { %v3843_v62 = vadd.f32 %v3842_v21, %v3841_v17 }
 0x816   :  { %v3783_v23 = vpop.f32.mrf.mxu1  ;;  %v3844_v49 = vrot.slane %v3843_v62, 4 }
 0x817   :  { %v3784_v45 = vadd.f32 %v7598_v34, %v3783_v23 }
 0x818   :  { %v3845_v1 = vadd.f32 %v3844_v49, %v3843_v62 }
 0x819   :  { %v3827_v46 = vmax.f32 %v3784_v45, 0.0 }
 0x81a   :  { %v3846_v2 = vrot.slane %v3845_v1, 2 }
 0x81b   :  { %v3850_v27 = vsel %vm3432_vm11, %v3827_v46, 0.0 }
 0x81c   :  { %v3847_v55 = vadd.f32 %v3846_v2, %v3845_v1 }
 0x81e   :  { %v3786_v59 = vpop.f32.mrf.mxu1  ;;  %v3848_v30 = vrot.slane %v3847_v55, 1 }
 0x81f   :  { %v3787_v4 = vadd.f32 %v7598_v34, %v3786_v59 }
 0x820   :  { %v3849_v0 = vadd.f32 %v3848_v30, %v3847_v55  ;;  %v32_v55 = vld [vmem:[%s7693_s1 + $0x70] sm:$0xff]  ;;  %v31_v30 = vld [vmem:[%s7693_s1 + $0x68] sm:$0xff] }
 0x821   :  { %v3828_v28 = vmax.f32 %v3787_v4, 0.0  ;;  %3954 = vmatpush.msra.mxu3 %v32_v55 }
 0x822   :  { %v3913_v8 = vmul.f32 %v3849_v0, %v7558_v43 }
 0x823   :  { %v3851_v12 = vsel %vm3432_vm11, %v3828_v28, 0.0  ;;  %3955 = vmatpush.msra.mxu3 %v31_v30 }
 0x824   :  { %v3852_v37 = vadd.f32 %v3851_v12, %v3850_v27 }
 0x826   :  { %v3853_v14 = vrot.slane %v3852_v37, 4  ;;  %v3789_v54 = vpop.f32.mrf.mxu1 }
 0x827   :  { %v3790_v10 = vadd.f32 %v7598_v34, %v3789_v54 }
 0x828   :  { %v3854_v5 = vadd.f32 %v3853_v14, %v3852_v37 }
 0x829   :  { %v3829_v31 = vmax.f32 %v3790_v10, 0.0 }
 0x82a   :  { %v3855_v19 = vrot.slane %v3854_v5, 2 }
 0x82b   :  { %v3859_v36 = vsel %vm3432_vm11, %v3829_v31, 0.0 }
 0x82c   :  { %v3856_v13 = vadd.f32 %v3855_v19, %v3854_v5 }
 0x82e   :  { %v3857_v42 = vrot.slane %v3856_v13, 1  ;;  %v3792_v35 = vpop.f32.mrf.mxu1 }
 0x82f   :  { %v3793_v61 = vadd.f32 %v7598_v34, %v3792_v35 }
 0x830   :  { %v3858_v26 = vadd.f32 %v3857_v42, %v3856_v13 }
 0x831   :  { %v3830_v16 = vmax.f32 %v3793_v61, 0.0  ;;  %v30_v61 = vld [vmem:[%s7693_s1 + $0x60] sm:$0xff] }
 0x832   :  { %v3914_v41 = vmul.f32 %v3858_v26, %v7558_v43  ;;  %3956 = vmatpush.msra.mxu3 %v30_v61  ;;  %v3982_v61 = vpop.permute.xlu0 %3981 }
 0x833   :  { %v3860_v22 = vsel %vm3432_vm11, %v3830_v16, 0.0 }
 0x834   :  { %v3861_v9 = vadd.f32 %v3860_v22, %v3859_v36  ;;  %v3931_v48 = vsel %vm3930_vm4, %v3914_v41, %v3913_v8  ;;  %v29_v22 = vld [vmem:[%s7693_s1 + $0x58] sm:$0xff]  ;;  %v28_v41 = vld [vmem:[%s7693_s1 + $0x50] sm:$0xff] }
 0x835   :  { %3957 = vmatpush.msra.mxu3 %v29_v22 }
 0x836   :  { %v3862_v18 = vrot.slane %v3861_v9, 4  ;;  %v3795_v63 = vpop.f32.mrf.mxu1 }
 0x837   :  { %v3796_v60 = vadd.f32 %v7598_v34, %v3795_v63  ;;  %3958 = vmatpush.msra.mxu3 %v28_v41 }
 0x838   :  { %v3863_v50 = vadd.f32 %v3862_v18, %v3861_v9  ;;  %v27_v18 = vld [vmem:[%s7693_s1 + $0x48] sm:$0xff] }
 0x839   :  { %v3831_v7 = vmax.f32 %v3796_v60, 0.0  ;;  %3959 = vmatpush.msra.mxu3 %v27_v18 }
 0x83a   :  { %v3864_v53 = vrot.slane %v3863_v50, 2 }
 0x83b   :  { %v3868_v6 = vsel %vm3432_vm11, %v3831_v7, 0.0 }
 0x83c   :  { %v3865_v39 = vadd.f32 %v3864_v53, %v3863_v50  ;;  %v3617_v51 = vpop.f32.mrf.mxu3 }
 0x83d   :  { %4381 = vmatmul.msk.f32.gmra.mxu1 %vm3623_vm12, %v3617_v51  ;;  %v3687_v24 = vsel %vm3623_vm12, %v3617_v51, 0.0 }
 0x83e   :  { %v3866_v52 = vrot.slane %v3865_v39, 1  ;;  %v3798_v47 = vpop.f32.mrf.mxu1 }
 0x83f   :  { %v3799_v25 = vadd.f32 %v7598_v34, %v3798_v47 }
 0x840   :  { %v3867_v20 = vadd.f32 %v3866_v52, %v3865_v39  ;;  %v25_v52 = vld [vmem:[%s7693_s1 + $0x38] sm:$0xff] }
 0x841   :  { %v3832_v58 = vmax.f32 %v3799_v25, 0.0 }
 0x842   :  { %v3915_v40 = vmul.f32 %v3867_v20, %v7558_v43 }
 0x843   :  { %v3869_v3 = vsel %vm3432_vm11, %v3832_v58, 0.0 }
 0x844   :  { %v3870_v38 = vadd.f32 %v3869_v3, %v3868_v6  ;;  %v3620_v33 = vpop.f32.mrf.mxu3  ;;  %v3933_v15 = vsel %vm3932_vm5, %v3915_v40, %v3931_v48  ;;  %v26_v48 = vld [vmem:[%s7693_s1 + $0x40] sm:$0xff]  ;;  %s4450_s1 = smov 58  }
 0x845   :  { %v3688_v57 = vsel %vm3623_vm12, %v3620_v33, 0.0  ;;  %4382 = vmatmul.msk.f32.gmra.mxu1 %vm3623_vm12, %v3620_v33  ;;  %3960 = vmatpush.msra.mxu3 %v26_v48 }
 0x846   :  { %v3871_v56 = vrot.slane %v3870_v38, 4  ;;  %v3689_v32 = vadd.f32 %v3688_v57, %v3687_v24  ;;  %v3801_v37 = vpop.f32.mrf.mxu1 }
 0x847   :  { %v3802_v19 = vadd.f32 %v7598_v34, %v3801_v37  ;;  %3961 = vmatpush.msra.mxu3 %v25_v52 }
 0x848   :  { %v3872_v44 = vadd.f32 %v3871_v56, %v3870_v38  ;;  %v3690_v17 = vrot.slane %v3689_v32, 4 }
 0x849   :  { %v3833_v36 = vmax.f32 %v3802_v19, 0.0 }
 0x84a   :  { %v3873_v11 = vrot.slane %v3872_v44, 2  ;;  %v3691_v21 = vadd.f32 %v3690_v17, %v3689_v32 }
 0x84b   :  { %v3877_v63 = vsel %vm3432_vm11, %v3833_v36, 0.0  ;;  %v4396_v36 = vld [vmem:[%s7694_s2 + $0x3] ss:$0 sm:$0xff] }
 0x84c   :  { %v3874_v62 = vadd.f32 %v3873_v11, %v3872_v44  ;;  %v3692_v23 = vrot.slane %v3691_v21, 2 }
 0x84e   :  { %v3875_v45 = vrot.slane %v3874_v62, 1  ;;  %v3693_v46 = vadd.f32 %v3692_v23, %v3691_v21  ;;  %v3804_v2 = vpop.f32.mrf.mxu1 }
 0x84f   :  { %v3805_v13 = vadd.f32 %v7598_v34, %v3804_v2 }
 0x850   :  { %v3876_v49 = vadd.f32 %v3875_v45, %v3874_v62  ;;  %v3694_v59 = vrot.slane %v3693_v46, 1 }
 0x851   :  { %v3834_v16 = vmax.f32 %v3805_v13, 0.0 }
 0x852   :  { %v3916_v4 = vmul.f32 %v3876_v49, %v7558_v43  ;;  %v3695_v27 = vadd.f32 %v3694_v59, %v3693_v46 }
 0x853   :  { %v3878_v50 = vsel %vm3432_vm11, %v3834_v16, 0.0 }
 0x854   :  { %v3710_v28 = vmul.f32 %v7558_v43, %v3695_v27  ;;  %v7632_v1 = vsel %vm3934_vm6, %v3916_v4, %v3933_v15  ;;  %v3879_v7 = vadd.f32 %v3878_v50, %v3877_v63 }
 0x856   :  { %v3998_v12 = vsel %vm3942_vm10, %v3710_v28, %v7604_v29  ;;  %v3807_v14 = vpop.f32.mrf.mxu1  ;;  %v3880_v20 = vrot.slane %v3879_v7, 4 }
 0x857   :  { %3999 = vrot.lane.b32.xlu0 %v3998_v12, %s4449_s0  ;;  %v3808_v31 = vadd.f32 %v7598_v34, %v3807_v14 }
 0x858   :  { %v3881_v3 = vadd.f32 %v3880_v20, %v3879_v7 }
 0x859   :  { %v3835_v0 = vmax.f32 %v3808_v31, 0.0 }
 0x85a   :  { %v3882_v24 = vrot.slane %v3881_v3, 2 }
 0x85b   :  { %v3886_v60 = vsel %vm3432_vm11, %v3835_v0, 0.0 }
 0x85c   :  { %v3883_v11 = vadd.f32 %v3882_v24, %v3881_v3 }
 0x85e   :  { %v3810_v54 = vpop.f32.mrf.mxu1  ;;  %v3884_v59 = vrot.slane %v3883_v11, 1 }
 0x85f   :  { %v3811_v29 = vadd.f32 %v7598_v34, %v3810_v54 }
 0x860   :  { %v3885_v37 = vadd.f32 %v3884_v59, %v3883_v11 }
 0x861   :  { %v3836_v26 = vmax.f32 %v3811_v29, 0.0 }
 0x863   :  { %v3887_v53 = vsel %vm3432_vm11, %v3836_v26, 0.0 }
 0x864   :  { %v3888_v47 = vadd.f32 %v3887_v53, %v3886_v60 }
 0x866   :  { %v3889_v6 = vrot.slane %v3888_v47, 4 }
 0x868   :  { %v3890_v38 = vadd.f32 %v3889_v6, %v3888_v47 }
 0x86a   :  { %v3891_v57 = vrot.slane %v3890_v38, 2 }
 0x86c   :  { %v3892_v62 = vadd.f32 %v3891_v57, %v3890_v38 }
 0x86e   :  { %v3893_v4 = vrot.slane %v3892_v62, 1 }
 0x870   :  { %v3894_v2 = vadd.f32 %v3893_v4, %v3892_v62 }
 0x872   :  { %v3918_v55 = vmul.f32 %v3894_v2, %v7558_v43 }
 0x874   :  { %v3813_v5 = vpop.f32.mrf.mxu1 }
 0x875   :  { %v3814_v42 = vadd.f32 %v7598_v34, %v3813_v5 }
 0x877   :  { %v3837_v9 = vmax.f32 %v3814_v42, 0.0 }
 0x879   :  { %v3895_v39 = vsel %vm3432_vm11, %v3837_v9, 0.0 }
 0x87c   :  { %v3816_v10 = vpop.f32.mrf.mxu1 }
 0x87d   :  { %v3817_v35 = vadd.f32 %v7598_v34, %v3816_v10 }
 0x87f   :  { %v3838_v8 = vmax.f32 %v3817_v35, 0.0 }
 0x881   :  { %v3896_v51 = vsel %vm3432_vm11, %v3838_v8, 0.0 }
 0x882   :  { %v3897_v25 = vadd.f32 %v3896_v51, %v3895_v39 }
 0x884   :  { %v3898_v40 = vrot.slane %v3897_v25, 4 }
 0x886   :  { %v3899_v33 = vadd.f32 %v3898_v40, %v3897_v25 }
 0x888   :  { %v3900_v32 = vrot.slane %v3899_v33, 2 }
 0x88a   :  { %v3901_v23 = vadd.f32 %v3900_v32, %v3899_v33 }
 0x88c   :  { %v3902_v28 = vrot.slane %v3901_v23, 1 }
 0x88e   :  { %v3903_v54 = vadd.f32 %v3902_v28, %v3901_v23 }
 0x890   :  { %v3919_v19 = vmul.f32 %v3903_v54, %v7558_v43 }
 0x8ba   :  { %v3819_v58 = vpop.f32.mrf.mxu1 }
 0x8bb   :  { %v3820_v15 = vadd.f32 %v7598_v34, %v3819_v58 }
 0x8bd   :  { %v3839_v44 = vmax.f32 %v3820_v15, 0.0 }
 0x8bf   :  { %v3904_v45 = vsel %vm3432_vm11, %v3839_v44, 0.0 }
 0x8c2   :  { %v3822_v56 = vpop.f32.mrf.mxu1 }
 0x8c3   :  { %v3823_v17 = vadd.f32 %v7598_v34, %v3822_v56  ;;  %v3917_v34 = vmul.f32 %v3885_v37, %v7558_v43 }
 0x8c5   :  { %v3840_v21 = vmax.f32 %v3823_v17, 0.0  ;;  %v3937_v31 = vsel %vm3936_vm7, %v3917_v34, %v7632_v1 }
 0x8c6   :  { %v3939_v30 = vsel %vm3938_vm8, %v3918_v55, %v3937_v31 }
 0x8c7   :  { %v3905_v46 = vsel %vm3432_vm11, %v3840_v21, 0.0  ;;  %v3941_v42 = vsel %vm3940_vm9, %v3919_v19, %v3939_v30 }
 0x8c8   :  { %v3906_v49 = vadd.f32 %v3905_v46, %v3904_v45 }
 0x8ca   :  { %v3907_v27 = vrot.slane %v3906_v49, 4 }
 0x8cc   :  { %v3908_v12 = vadd.f32 %v3907_v27, %v3906_v49 }
 0x8ce   :  { %v3909_v14 = vrot.slane %v3908_v12, 2 }
 0x8d0   :  { %v3910_v5 = vadd.f32 %v3909_v14, %v3908_v12 }
 0x8d2   :  { %v3911_v10 = vrot.slane %v3910_v5, 1 }
 0x8d4   :  { %v3912_v13 = vadd.f32 %v3911_v10, %v3910_v5 }
 0x8d6   :  { %v3920_v29 = vmul.f32 %v3912_v13, %v7558_v43  ;;  %v4000_v43 = vpop.permute.xlu0 %3999 }
 0x8d8   :  { %v3943_v35 = vsel %vm3942_vm10, %v3920_v29, %v3941_v42 }
 0x8d9   :  { %4002 = vrot.lane.b32.xlu1 %v3943_v35, %s4450_s1  ;;  %4383 = vmatmul.msk.f32.vlgmr.msra.gmra.mxu3 %vm3432_vm11, %v3943_v35 }
 0x94b   :  { %v4003_v26 = vpop.permute.xlu1 %4002 }
 0x95c   :  { %v3963_v16 = vpop.f32.mrf.mxu3 }
 0x95d   :  { %v3964_v1 = vadd.f32 %v4396_v36, %v3963_v16 }
 0x95f   :  { %v4006_v0 = vsel %vm4005_vm14, %v3964_v1, %v3982_v61 }
 0x960   :  { %v4008_v22 = vsel %vm4007_vm15, %v4006_v0, %v4000_v43 }
 0x961   :  { %v4010_v9 = vsel %vm4009_vm0, %v4008_v22, %v4003_v26 }
 0x962   :  { %v4012_v8 = vsel %vm4011_vm1, %v4010_v9, 0.0 }
 0x963   :  { %4013 = vst [vmem:[#allocation2] sm:$0xff] %v4012_v8 }
 0x964   :  { %4024 = dma.vmem_to_hbm [thread:$0]  %s4020_s13, 128, %s4022_s16, [#allocation3]  }
 0x965   :  { %4444 = dma.done.wait [#allocation3], 128  }
 0x966   :  { %4445 = vsyncadd [#allocation3], 4294967168 }
 0x967   :  { %4029 = vsyncpa [#allocation3], 1 }

</bundles_post_ra>
